<compile_context>
chip_gen: v5e
topology: v5e:2x2
jax: 0.10.0
libtpu: 0.0.40
codegen_flags: <defaults>
</compile_context>

<pallas_src>
import jax
import jax.numpy as jnp
from jax import lax
from jax.experimental import pallas as pl
from jax.experimental.pallas import tpu as pltpu


_FLAT_STRIDE = 64   # lane stride per conv-3 channel in the flattened-feature scratch


# ----------------------------------------------------------------------------
# Fused Pallas kernel: conv stack + MLP head, everything VMEM/scratch-resident
# ----------------------------------------------------------------------------
def fused_net_kernel(x_ref, w1_ref, w2_ref, w3_ref,
                     fw1_ref, fb1_ref, fw2_ref, fb2_ref, fw3_ref, fb3_ref,
                     o_ref,
                     cat1, y1, act1, cat2, y2, act2, cat3, y3,
                     pt_scr, flat_scr):
    """Whole Network9layersNet forward, batch packed on the lane axis.

    x_ref   : (L, B*C)            channels+batch on lanes, length on sublanes
    wK_ref  : (K*B*Cin, B*Cout)   tap-fused, batch-block-diagonal conv weight
    fw1_ref : (O3*64, 30)         first Linear, reordered + lane-padded to the kernel's
                                  flatten layout (rows o*64+t hold fw1[:, o*35+t])
    fw2/fw3 : (in, out)           pre-transposed Linear weights; fbK: (1, out)
    o_ref   : (B, num_classes)
    """
    B = o_ref.shape[0]

    def conv_relu_pool(prev_ref, w_ref, cat_ref, y_ref):
        """Conv1d(bias=False) -> ReLU -> MaxPool1d(2,2), all batch rows in one dot."""
        bcin = prev_ref.shape[1]            # B * Cin
        K = w_ref.shape[0] // bcin          # kernel taps
        lout = cat_ref.shape[0]             # VALID conv output length
        lp = lout // 2                      # pooled length
        # Lane-pack the K shifted tap slices into one (Lout, K*B*Cin) scratch.
        for k in range(K):
            cat_ref[:, pl.ds(k * bcin, bcin)] = prev_ref[pl.ds(k, lout), :]
        # Whole conv layer as a single MXU dot.
        y_ref[...] = jnp.dot(cat_ref[...], w_ref[...],
                             preferred_element_type=jnp.float32)
        # MaxPool(2,2) via sublane-strided reads; ReLU applied after (max/ReLU commute).
        even = y_ref[pl.ds(0, lp, stride=2), :]
        odd = y_ref[pl.ds(1, lp, stride=2), :]
        return jnp.maximum(jnp.maximum(even, odd), 0.0)

    act1[...] = conv_relu_pool(x_ref, w1_ref, cat1, y1)
    act2[...] = conv_relu_pool(act1, w2_ref, cat2, y2)
    pooled3 = conv_relu_pool(act2, w3_ref, cat3, y3)          # (Lp3, B*O3)

    # ---- flatten to PyTorch channel-major order (lane-padded), batched ----
    # pt_scr[b*O3 + o, t] = pooled3[t, b*O3 + o]
    pt_scr[...] = jnp.transpose(pooled3)
    o3 = pt_scr.shape[0] // B
    lp3 = pt_scr.shape[1]
    fstride = flat_scr.shape[1] // o3
    # Zero first so padding lanes contribute exactly 0 through the zero-padded fw1.
    flat_scr[...] = jnp.zeros(flat_scr.shape, flat_scr.dtype)
    for b in range(B):
        for o in range(o3):
            flat_scr[pl.ds(b, 1), pl.ds(o * fstride, lp3)] = \
                pt_scr[pl.ds(b * o3 + o, 1), :]

    # ---- MLP head, batched over B on the sublane axis ----
    h = jnp.dot(flat_scr[...], fw1_ref[...],
                preferred_element_type=jnp.float32) + fb1_ref[...]
    h = jnp.maximum(h, 0.0)
    h = jnp.dot(h, fw2_ref[...], preferred_element_type=jnp.float32) + fb2_ref[...]
    h = jnp.maximum(h, 0.0)
    o_ref[...] = jnp.dot(h, fw3_ref[...],
                         preferred_element_type=jnp.float32) + fb3_ref[...]


# ----------------------------------------------------------------------------
# Host-side one-time weight packing
# ----------------------------------------------------------------------------
def _pack_conv_weight(w_torch, batch):
    """(O, Cin, K) Conv1d weight -> (K*B*Cin, B*O), tap-fused + batch-block-diagonal."""
    _, _, k = w_torch.shape
    w_kco = jnp.transpose(w_torch, (2, 1, 0))                 # (K, Cin, O)
    eye = jnp.eye(batch, dtype=w_torch.dtype)
    blocks = [jnp.kron(eye, w_kco[i]) for i in range(k)]      # each (B*Cin, B*O)
    return jnp.concatenate(blocks, axis=0)                    # (K*B*Cin, B*O)


def prepare_params(params, batch):
    """One-time weight-layout preprocessing.  Batch-size specific: conv weights are
    packed block-diagonally over the batch so every batch row shares one MXU dot."""
    o3 = params["w3"].shape[0]                     # conv-3 output channels (20)
    nf = params["fw1"].shape[1]                    # flattened features (700)
    assert nf % o3 == 0
    lp3 = nf // o3                                 # pooled positions (35)
    assert lp3 <= _FLAT_STRIDE
    n_hidden = params["fw1"].shape[0]
    # fw1 reordered to the kernel's lane-padded flatten layout:
    #   fw1p[o*FS + t, j] = fw1[j, o*lp3 + t], zero on padding rows.
    fw1_otj = jnp.transpose(params["fw1"].reshape(n_hidden, o3, lp3), (1, 2, 0))
    fw1p = jnp.zeros((o3, _FLAT_STRIDE, n_hidden), params["fw1"].dtype)
    fw1p = fw1p.at[:, :lp3, :].set(fw1_otj).reshape(o3 * _FLAT_STRIDE, n_hidden)
    return {
        "w1": _pack_conv_weight(params["w1"], batch),
        "w2": _pack_conv_weight(params["w2"], batch),
        "w3": _pack_conv_weight(params["w3"], batch),
        "fw1": fw1p,            "fb1": params["fb1"][None, :],
        "fw2": params["fw2"].T, "fb2": params["fb2"][None, :],
        "fw3": params["fw3"].T, "fb3": params["fb3"][None, :],
        "batch": batch, "lp3": lp3,
    }


# ----------------------------------------------------------------------------
# Wrapper
# ----------------------------------------------------------------------------
def _vmem_spec():
    return pl.BlockSpec(memory_space=pltpu.MemorySpace.VMEM)


def network9_forward(x, kp):
    """x: (B, C, L) float32 (PyTorch NCL layout).  Returns (B, num_classes)."""
    B, C, L = x.shape
    assert B == kp["batch"], "prepare_params() was built for a different batch size"
    num_classes = kp["fw3"].shape[1]
    f32 = jnp.float32

    # Static per-layer geometry derived from the packed weights.
    dims = []
    lin, bcin = L, B * C
    for w in (kp["w1"], kp["w2"], kp["w3"]):
        kbc, bco = w.shape
        assert kbc % bcin == 0
        k = kbc // bcin
        lout = lin - k + 1
        assert lout > 0 and lout % 2 == 0, "MaxPool1d(2,2) needs an even conv length"
        dims.append((lout, kbc, bco))
        lin, bcin = lout // 2, bco
    lp3, bo3 = lin, bcin
    o3 = bo3 // B
    assert lp3 == kp["lp3"], "input length inconsistent with Linear(35*20, 30)"
    assert o3 * _FLAT_STRIDE == kp["fw1"].shape[0]

    # Batch packed on lanes: x_packed[l, b*C + c] = x[b, c, l].
    x_packed = jnp.transpose(x, (2, 0, 1)).reshape(L, B * C)

    args = (x_packed, kp["w1"], kp["w2"], kp["w3"],
            kp["fw1"], kp["fb1"], kp["fw2"], kp["fb2"], kp["fw3"], kp["fb3"])

    (lout1, kbc1, bco1), (lout2, kbc2, bco2), (lout3, kbc3, bco3) = dims
    scratch_shapes = [
        pltpu.VMEM((lout1, kbc1), f32), pltpu.VMEM((lout1, bco1), f32),
        pltpu.VMEM((lout1 // 2, bco1), f32),
        pltpu.VMEM((lout2, kbc2), f32), pltpu.VMEM((lout2, bco2), f32),
        pltpu.VMEM((lout2 // 2, bco2), f32),
        pltpu.VMEM((lout3, kbc3), f32), pltpu.VMEM((lout3, bco3), f32),
        pltpu.VMEM((bo3, lp3), f32),                       # transposed pooled conv-3 map
        pltpu.VMEM((B, o3 * _FLAT_STRIDE), f32),           # lane-padded flat features
    ]

    # Advisory cost estimate (tiny kernel; keeps XLA from over-serializing around it).
    flops = sum(2 * lout * kbc * bco for lout, kbc, bco in dims)
    flops += 2 * B * (kp["fw1"].shape[0] * kp["fw1"].shape[1]
                      + kp["fw2"].shape[0] * kp["fw2"].shape[1]
                      + kp["fw3"].shape[0] * kp["fw3"].shape[1])
    bytes_accessed = sum(int(a.size) * 4 for a in args) + B * num_classes * 4

    return pl.pallas_call(
        fused_net_kernel,
        out_shape=jax.ShapeDtypeStruct((B, num_classes), f32),
        in_specs=[_vmem_spec()] * len(args),
        out_specs=_vmem_spec(),
        scratch_shapes=scratch_shapes,
        cost_estimate=pl.CostEstimate(flops=int(flops), transcendentals=0,
                                      bytes_accessed=int(bytes_accessed)),
    )(*args)


# ----------------------------------------------------------------------------
# Pure-JAX reference (numerical check, full f32 precision)
# ----------------------------------------------------------------------------
def reference_forward(x, params):
    h = x
    for w in (params["w1"], params["w2"], params["w3"]):
        h = lax.conv_general_dilated(h, w, window_strides=(1,), padding="VALID",
                                     dimension_numbers=("NCH", "OIH", "NCH"),
                                     precision=lax.Precision.HIGHEST)
        h = jnp.maximum(h, 0.0)
        h = lax.reduce_window(h, -jnp.inf, lax.max,
                              window_dimensions=(1, 1, 2),
                              window_strides=(1, 1, 2), padding="VALID")
    h = h.reshape(h.shape[0], -1)
    mm = lambda a, b: jnp.dot(a, b, precision=lax.Precision.HIGHEST)
    h = jnp.maximum(mm(h, params["fw1"].T) + params["fb1"], 0.0)
    h = jnp.maximum(mm(h, params["fw2"].T) + params["fb2"], 0.0)
    return mm(h, params["fw3"].T) + params["fb3"]


# ----------------------------------------------------------------------------
# Main
# ----------------------------------------------------------------------------
if __name__ == "__main__":
    # L must be 300 so the conv stack yields 20 channels x 35 positions -> 700
    # features, matching nn.Linear(35 * 20, 30) in the PyTorch module.
    B, C, L, num_classes = 2, 4, 300, 5

    key = jax.random.PRNGKey(0)
    ks = jax.random.split(key, 10)

    def init(k, shape, fan_in):
        return jax.random.normal(k, shape, jnp.float32) / jnp.sqrt(float(fan_in))

    params = {
        # Conv1d weights (out, in, kernel), bias=False
        "w1": init(ks[0], (5, C, 3), C * 3),
        "w2": init(ks[1], (10, 5, 4), 5 * 4),
        "w3": init(ks[2], (20, 10, 4), 10 * 4),
        # Linear weights (out, in) + biases
        "fw1": init(ks[3], (30, 35 * 20), 35 * 20),
        "fb1": init(ks[4], (30,), 35 * 20),
        "fw2": init(ks[5], (20, 30), 30),
        "fb2": init(ks[6], (20,), 30),
        "fw3": init(ks[7], (num_classes, 20), 20),
        "fb3": init(ks[8], (num_classes,), 20),
    }
    x = jax.random.normal(ks[9], (B, C, L), jnp.float32)

    kparams = prepare_params(params, B)
    out = jax.block_until_ready(network9_forward(x, kparams))
    ref = jax.block_until_ready(reference_forward(x, params))

    assert out.shape == (B, num_classes), out.shape
    max_err = float(jnp.max(jnp.abs(out - ref)))
    assert jnp.allclose(out, ref, rtol=5e-3, atol=5e-3), (max_err, out, ref)

    print("KERNEL_OK")
</pallas_src>

<mosaic_0001>
module attributes {stable_mosaic.version = 11 : i64} {
  func.func @fused_net_kernel(%arg0: memref<300x8xf32, #tpu.memory_space<vmem>>, %arg1: memref<24x10xf32, #tpu.memory_space<vmem>>, %arg2: memref<40x20xf32, #tpu.memory_space<vmem>>, %arg3: memref<80x40xf32, #tpu.memory_space<vmem>>, %arg4: memref<1280x30xf32, #tpu.memory_space<vmem>>, %arg5: memref<1x30xf32, #tpu.memory_space<vmem>>, %arg6: memref<30x20xf32, #tpu.memory_space<vmem>>, %arg7: memref<1x20xf32, #tpu.memory_space<vmem>>, %arg8: memref<20x5xf32, #tpu.memory_space<vmem>>, %arg9: memref<1x5xf32, #tpu.memory_space<vmem>>, %arg10: memref<2x5xf32, #tpu.memory_space<vmem>>, %arg11: memref<298x24xf32, #tpu.memory_space<vmem>>, %arg12: memref<298x10xf32, #tpu.memory_space<vmem>>, %arg13: memref<149x10xf32, #tpu.memory_space<vmem>>, %arg14: memref<146x40xf32, #tpu.memory_space<vmem>>, %arg15: memref<146x20xf32, #tpu.memory_space<vmem>>, %arg16: memref<73x20xf32, #tpu.memory_space<vmem>>, %arg17: memref<70x80xf32, #tpu.memory_space<vmem>>, %arg18: memref<70x40xf32, #tpu.memory_space<vmem>>, %arg19: memref<40x35xf32, #tpu.memory_space<vmem>>, %arg20: memref<2x1280xf32, #tpu.memory_space<vmem>>) attributes {dimension_semantics = [], scalar_prefetch = 0 : i64, scratch_operands = 10 : i64, tpu.core_type = #tpu.core_type<tc>} {
    %c0 = arith.constant 0 : index
    %c0_0 = arith.constant 0 : index
    %0 = vector.load %arg0[%c0, %c0_0] : memref<300x8xf32, #tpu.memory_space<vmem>>, vector<298x8xf32>
    %c0_1 = arith.constant 0 : index
    %c0_2 = arith.constant 0 : index
    %1 = vector.load %arg11[%c0_1, %c0_2] : memref<298x24xf32, #tpu.memory_space<vmem>>, vector<298x8xf32>
    tpu.vector_store %arg11[%c0_1, %c0_2], %0 {strides = array<i32>} : memref<298x24xf32, #tpu.memory_space<vmem>>, vector<298x8xf32>,
    %c1 = arith.constant 1 : index
    %c0_3 = arith.constant 0 : index
    %2 = vector.load %arg0[%c1, %c0_3] : memref<300x8xf32, #tpu.memory_space<vmem>>, vector<298x8xf32>
    %c0_4 = arith.constant 0 : index
    %c8 = arith.constant 8 : index
    %3 = vector.load %arg11[%c0_4, %c8] : memref<298x24xf32, #tpu.memory_space<vmem>>, vector<298x8xf32>
    tpu.vector_store %arg11[%c0_4, %c8], %2 {strides = array<i32>} : memref<298x24xf32, #tpu.memory_space<vmem>>, vector<298x8xf32>,
    %c2 = arith.constant 2 : index
    %c0_5 = arith.constant 0 : index
    %4 = vector.load %arg0[%c2, %c0_5] : memref<300x8xf32, #tpu.memory_space<vmem>>, vector<298x8xf32>
    %c0_6 = arith.constant 0 : index
    %c16 = arith.constant 16 : index
    %5 = vector.load %arg11[%c0_6, %c16] : memref<298x24xf32, #tpu.memory_space<vmem>>, vector<298x8xf32>
    tpu.vector_store %arg11[%c0_6, %c16], %4 {strides = array<i32>} : memref<298x24xf32, #tpu.memory_space<vmem>>, vector<298x8xf32>,
    %c0_7 = arith.constant 0 : index
    %c0_8 = arith.constant 0 : index
    %6 = vector.load %arg11[%c0_7, %c0_8] : memref<298x24xf32, #tpu.memory_space<vmem>>, vector<298x24xf32>
    %c0_9 = arith.constant 0 : index
    %c0_10 = arith.constant 0 : index
    %7 = vector.load %arg1[%c0_9, %c0_10] : memref<24x10xf32, #tpu.memory_space<vmem>>, vector<24x10xf32>
    %cst = arith.constant dense<0.000000e+00> : vector<298x10xf32>
    %8 = tpu.matmul %6, %7, %cst {dimension_numbers = #tpu.dot_dimension_numbers<[1], [0], [0], [1], [0, 0, 1, 1], [], []>} : vector<298x24xf32>, vector<24x10xf32>, vector<298x10xf32> -> vector<298x10xf32>
    %c0_11 = arith.constant 0 : index
    %c0_12 = arith.constant 0 : index
    %9 = vector.load %arg12[%c0_11, %c0_12] : memref<298x10xf32, #tpu.memory_space<vmem>>, vector<298x10xf32>
    tpu.vector_store %arg12[%c0_11, %c0_12], %8 {strides = array<i32>} : memref<298x10xf32, #tpu.memory_space<vmem>>, vector<298x10xf32>,
    %c0_13 = arith.constant 0 : index
    %c0_14 = arith.constant 0 : index
    %10 = tpu.strided_load %arg12[%c0_13, %c0_14] {strides = array<i32: 2, 1>} : memref<298x10xf32, #tpu.memory_space<vmem>>, vector<149x10xf32>
    %c1_15 = arith.constant 1 : index
    %c0_16 = arith.constant 0 : index
    %11 = tpu.strided_load %arg12[%c1_15, %c0_16] {strides = array<i32: 2, 1>} : memref<298x10xf32, #tpu.memory_space<vmem>>, vector<149x10xf32>
    %12 = arith.maximumf %10, %11 : vector<149x10xf32>
    %cst_17 = arith.constant 0.000000e+00 : f32
    %13 = vector.broadcast %cst_17 : f32 to vector<149x10xf32>
    %14 = arith.maximumf %12, %13 : vector<149x10xf32>
    %c0_18 = arith.constant 0 : index
    %c0_19 = arith.constant 0 : index
    %15 = vector.load %arg13[%c0_18, %c0_19] : memref<149x10xf32, #tpu.memory_space<vmem>>, vector<149x10xf32>
    tpu.vector_store %arg13[%c0_18, %c0_19], %14 {strides = array<i32>} : memref<149x10xf32, #tpu.memory_space<vmem>>, vector<149x10xf32>,
    %c0_20 = arith.constant 0 : index
    %c0_21 = arith.constant 0 : index
    %16 = vector.load %arg13[%c0_20, %c0_21] : memref<149x10xf32, #tpu.memory_space<vmem>>, vector<146x10xf32>
    %c0_22 = arith.constant 0 : index
    %c0_23 = arith.constant 0 : index
    %17 = vector.load %arg14[%c0_22, %c0_23] : memref<146x40xf32, #tpu.memory_space<vmem>>, vector<146x10xf32>
    tpu.vector_store %arg14[%c0_22, %c0_23], %16 {strides = array<i32>} : memref<146x40xf32, #tpu.memory_space<vmem>>, vector<146x10xf32>,
    %c1_24 = arith.constant 1 : index
    %c0_25 = arith.constant 0 : index
    %18 = vector.load %arg13[%c1_24, %c0_25] : memref<149x10xf32, #tpu.memory_space<vmem>>, vector<146x10xf32>
    %c0_26 = arith.constant 0 : index
    %c10 = arith.constant 10 : index
    %19 = vector.load %arg14[%c0_26, %c10] : memref<146x40xf32, #tpu.memory_space<vmem>>, vector<146x10xf32>
    tpu.vector_store %arg14[%c0_26, %c10], %18 {strides = array<i32>} : memref<146x40xf32, #tpu.memory_space<vmem>>, vector<146x10xf32>,
    %c2_27 = arith.constant 2 : index
    %c0_28 = arith.constant 0 : index
    %20 = vector.load %arg13[%c2_27, %c0_28] : memref<149x10xf32, #tpu.memory_space<vmem>>, vector<146x10xf32>
    %c0_29 = arith.constant 0 : index
    %c20 = arith.constant 20 : index
    %21 = vector.load %arg14[%c0_29, %c20] : memref<146x40xf32, #tpu.memory_space<vmem>>, vector<146x10xf32>
    tpu.vector_store %arg14[%c0_29, %c20], %20 {strides = array<i32>} : memref<146x40xf32, #tpu.memory_space<vmem>>, vector<146x10xf32>,
    %c3 = arith.constant 3 : index
    %c0_30 = arith.constant 0 : index
    %22 = vector.load %arg13[%c3, %c0_30] : memref<149x10xf32, #tpu.memory_space<vmem>>, vector<146x10xf32>
    %c0_31 = arith.constant 0 : index
    %c30 = arith.constant 30 : index
    %23 = vector.load %arg14[%c0_31, %c30] : memref<146x40xf32, #tpu.memory_space<vmem>>, vector<146x10xf32>
    tpu.vector_store %arg14[%c0_31, %c30], %22 {strides = array<i32>} : memref<146x40xf32, #tpu.memory_space<vmem>>, vector<146x10xf32>,
    %c0_32 = arith.constant 0 : index
    %c0_33 = arith.constant 0 : index
    %24 = vector.load %arg14[%c0_32, %c0_33] : memref<146x40xf32, #tpu.memory_space<vmem>>, vector<146x40xf32>
    %c0_34 = arith.constant 0 : index
    %c0_35 = arith.constant 0 : index
    %25 = vector.load %arg2[%c0_34, %c0_35] : memref<40x20xf32, #tpu.memory_space<vmem>>, vector<40x20xf32>
    %cst_36 = arith.constant dense<0.000000e+00> : vector<146x20xf32>
    %26 = tpu.matmul %24, %25, %cst_36 {dimension_numbers = #tpu.dot_dimension_numbers<[1], [0], [0], [1], [0, 0, 1, 1], [], []>} : vector<146x40xf32>, vector<40x20xf32>, vector<146x20xf32> -> vector<146x20xf32>
    %c0_37 = arith.constant 0 : index
    %c0_38 = arith.constant 0 : index
    %27 = vector.load %arg15[%c0_37, %c0_38] : memref<146x20xf32, #tpu.memory_space<vmem>>, vector<146x20xf32>
    tpu.vector_store %arg15[%c0_37, %c0_38], %26 {strides = array<i32>} : memref<146x20xf32, #tpu.memory_space<vmem>>, vector<146x20xf32>,
    %c0_39 = arith.constant 0 : index
    %c0_40 = arith.constant 0 : index
    %28 = tpu.strided_load %arg15[%c0_39, %c0_40] {strides = array<i32: 2, 1>} : memref<146x20xf32, #tpu.memory_space<vmem>>, vector<73x20xf32>
    %c1_41 = arith.constant 1 : index
    %c0_42 = arith.constant 0 : index
    %29 = tpu.strided_load %arg15[%c1_41, %c0_42] {strides = array<i32: 2, 1>} : memref<146x20xf32, #tpu.memory_space<vmem>>, vector<73x20xf32>
    %30 = arith.maximumf %28, %29 : vector<73x20xf32>
    %cst_43 = arith.constant 0.000000e+00 : f32
    %31 = vector.broadcast %cst_43 : f32 to vector<73x20xf32>
    %32 = arith.maximumf %30, %31 : vector<73x20xf32>
    %c0_44 = arith.constant 0 : index
    %c0_45 = arith.constant 0 : index
    %33 = vector.load %arg16[%c0_44, %c0_45] : memref<73x20xf32, #tpu.memory_space<vmem>>, vector<73x20xf32>
    tpu.vector_store %arg16[%c0_44, %c0_45], %32 {strides = array<i32>} : memref<73x20xf32, #tpu.memory_space<vmem>>, vector<73x20xf32>,
    %c0_46 = arith.constant 0 : index
    %c0_47 = arith.constant 0 : index
    %34 = vector.load %arg16[%c0_46, %c0_47] : memref<73x20xf32, #tpu.memory_space<vmem>>, vector<70x20xf32>
    %c0_48 = arith.constant 0 : index
    %c0_49 = arith.constant 0 : index
    %35 = vector.load %arg17[%c0_48, %c0_49] : memref<70x80xf32, #tpu.memory_space<vmem>>, vector<70x20xf32>
    tpu.vector_store %arg17[%c0_48, %c0_49], %34 {strides = array<i32>} : memref<70x80xf32, #tpu.memory_space<vmem>>, vector<70x20xf32>,
    %c1_50 = arith.constant 1 : index
    %c0_51 = arith.constant 0 : index
    %36 = vector.load %arg16[%c1_50, %c0_51] : memref<73x20xf32, #tpu.memory_space<vmem>>, vector<70x20xf32>
    %c0_52 = arith.constant 0 : index
    %c20_53 = arith.constant 20 : index
    %37 = vector.load %arg17[%c0_52, %c20_53] : memref<70x80xf32, #tpu.memory_space<vmem>>, vector<70x20xf32>
    tpu.vector_store %arg17[%c0_52, %c20_53], %36 {strides = array<i32>} : memref<70x80xf32, #tpu.memory_space<vmem>>, vector<70x20xf32>,
    %c2_54 = arith.constant 2 : index
    %c0_55 = arith.constant 0 : index
    %38 = vector.load %arg16[%c2_54, %c0_55] : memref<73x20xf32, #tpu.memory_space<vmem>>, vector<70x20xf32>
    %c0_56 = arith.constant 0 : index
    %c40 = arith.constant 40 : index
    %39 = vector.load %arg17[%c0_56, %c40] : memref<70x80xf32, #tpu.memory_space<vmem>>, vector<70x20xf32>
    tpu.vector_store %arg17[%c0_56, %c40], %38 {strides = array<i32>} : memref<70x80xf32, #tpu.memory_space<vmem>>, vector<70x20xf32>,
    %c3_57 = arith.constant 3 : index
    %c0_58 = arith.constant 0 : index
    %40 = vector.load %arg16[%c3_57, %c0_58] : memref<73x20xf32, #tpu.memory_space<vmem>>, vector<70x20xf32>
    %c0_59 = arith.constant 0 : index
    %c60 = arith.constant 60 : index
    %41 = vector.load %arg17[%c0_59, %c60] : memref<70x80xf32, #tpu.memory_space<vmem>>, vector<70x20xf32>
    tpu.vector_store %arg17[%c0_59, %c60], %40 {strides = array<i32>} : memref<70x80xf32, #tpu.memory_space<vmem>>, vector<70x20xf32>,
    %c0_60 = arith.constant 0 : index
    %c0_61 = arith.constant 0 : index
    %42 = vector.load %arg17[%c0_60, %c0_61] : memref<70x80xf32, #tpu.memory_space<vmem>>, vector<70x80xf32>
    %c0_62 = arith.constant 0 : index
    %c0_63 = arith.constant 0 : index
    %43 = vector.load %arg3[%c0_62, %c0_63] : memref<80x40xf32, #tpu.memory_space<vmem>>, vector<80x40xf32>
    %cst_64 = arith.constant dense<0.000000e+00> : vector<70x40xf32>
    %44 = tpu.matmul %42, %43, %cst_64 {dimension_numbers = #tpu.dot_dimension_numbers<[1], [0], [0], [1], [0, 0, 1, 1], [], []>} : vector<70x80xf32>, vector<80x40xf32>, vector<70x40xf32> -> vector<70x40xf32>
    %c0_65 = arith.constant 0 : index
    %c0_66 = arith.constant 0 : index
    %45 = vector.load %arg18[%c0_65, %c0_66] : memref<70x40xf32, #tpu.memory_space<vmem>>, vector<70x40xf32>
    tpu.vector_store %arg18[%c0_65, %c0_66], %44 {strides = array<i32>} : memref<70x40xf32, #tpu.memory_space<vmem>>, vector<70x40xf32>,
    %c0_67 = arith.constant 0 : index
    %c0_68 = arith.constant 0 : index
    %46 = tpu.strided_load %arg18[%c0_67, %c0_68] {strides = array<i32: 2, 1>} : memref<70x40xf32, #tpu.memory_space<vmem>>, vector<35x40xf32>
    %c1_69 = arith.constant 1 : index
    %c0_70 = arith.constant 0 : index
    %47 = tpu.strided_load %arg18[%c1_69, %c0_70] {strides = array<i32: 2, 1>} : memref<70x40xf32, #tpu.memory_space<vmem>>, vector<35x40xf32>
    %48 = arith.maximumf %46, %47 : vector<35x40xf32>
    %cst_71 = arith.constant 0.000000e+00 : f32
    %49 = vector.broadcast %cst_71 : f32 to vector<35x40xf32>
    %50 = arith.maximumf %48, %49 : vector<35x40xf32>
    %51 = tpu.transpose %50, [1, 0] : vector<35x40xf32> -> vector<40x35xf32>
    %c0_72 = arith.constant 0 : index
    %c0_73 = arith.constant 0 : index
    %52 = vector.load %arg19[%c0_72, %c0_73] : memref<40x35xf32, #tpu.memory_space<vmem>>, vector<40x35xf32>
    tpu.vector_store %arg19[%c0_72, %c0_73], %51 {strides = array<i32>} : memref<40x35xf32, #tpu.memory_space<vmem>>, vector<40x35xf32>,
    %cst_74 = arith.constant 0.000000e+00 : f32
    %53 = vector.broadcast %cst_74 : f32 to vector<2x1280xf32>
    %c0_75 = arith.constant 0 : index
    %c0_76 = arith.constant 0 : index
    %54 = vector.load %arg20[%c0_75, %c0_76] : memref<2x1280xf32, #tpu.memory_space<vmem>>, vector<2x1280xf32>
    tpu.vector_store %arg20[%c0_75, %c0_76], %53 {strides = array<i32>} : memref<2x1280xf32, #tpu.memory_space<vmem>>, vector<2x1280xf32>,
    %c0_77 = arith.constant 0 : index
    %c0_78 = arith.constant 0 : index
    %55 = vector.load %arg19[%c0_77, %c0_78] : memref<40x35xf32, #tpu.memory_space<vmem>>, vector<1x35xf32>
    %c0_79 = arith.constant 0 : index
    %c0_80 = arith.constant 0 : index
    %56 = vector.load %arg20[%c0_79, %c0_80] : memref<2x1280xf32, #tpu.memory_space<vmem>>, vector<1x35xf32>
    tpu.vector_store %arg20[%c0_79, %c0_80], %55 {strides = array<i32>} : memref<2x1280xf32, #tpu.memory_space<vmem>>, vector<1x35xf32>,
    %c1_81 = arith.constant 1 : index
    %c0_82 = arith.constant 0 : index
    %57 = vector.load %arg19[%c1_81, %c0_82] : memref<40x35xf32, #tpu.memory_space<vmem>>, vector<1x35xf32>
    %c0_83 = arith.constant 0 : index
    %c64 = arith.constant 64 : index
    %58 = vector.load %arg20[%c0_83, %c64] : memref<2x1280xf32, #tpu.memory_space<vmem>>, vector<1x35xf32>
    tpu.vector_store %arg20[%c0_83, %c64], %57 {strides = array<i32>} : memref<2x1280xf32, #tpu.memory_space<vmem>>, vector<1x35xf32>,
    %c2_84 = arith.constant 2 : index
    %c0_85 = arith.constant 0 : index
    %59 = vector.load %arg19[%c2_84, %c0_85] : memref<40x35xf32, #tpu.memory_space<vmem>>, vector<1x35xf32>
    %c0_86 = arith.constant 0 : index
    %c128 = arith.constant 128 : index
    %60 = vector.load %arg20[%c0_86, %c128] : memref<2x1280xf32, #tpu.memory_space<vmem>>, vector<1x35xf32>
    tpu.vector_store %arg20[%c0_86, %c128], %59 {strides = array<i32>} : memref<2x1280xf32, #tpu.memory_space<vmem>>, vector<1x35xf32>,
    %c3_87 = arith.constant 3 : index
    %c0_88 = arith.constant 0 : index
    %61 = vector.load %arg19[%c3_87, %c0_88] : memref<40x35xf32, #tpu.memory_space<vmem>>, vector<1x35xf32>
    %c0_89 = arith.constant 0 : index
    %c192 = arith.constant 192 : index
    %62 = vector.load %arg20[%c0_89, %c192] : memref<2x1280xf32, #tpu.memory_space<vmem>>, vector<1x35xf32>
    tpu.vector_store %arg20[%c0_89, %c192], %61 {strides = array<i32>} : memref<2x1280xf32, #tpu.memory_space<vmem>>, vector<1x35xf32>,
    %c4 = arith.constant 4 : index
    %c0_90 = arith.constant 0 : index
    %63 = vector.load %arg19[%c4, %c0_90] : memref<40x35xf32, #tpu.memory_space<vmem>>, vector<1x35xf32>
    %c0_91 = arith.constant 0 : index
    %c256 = arith.constant 256 : index
    %64 = vector.load %arg20[%c0_91, %c256] : memref<2x1280xf32, #tpu.memory_space<vmem>>, vector<1x35xf32>
    tpu.vector_store %arg20[%c0_91, %c256], %63 {strides = array<i32>} : memref<2x1280xf32, #tpu.memory_space<vmem>>, vector<1x35xf32>,
    %c5 = arith.constant 5 : index
    %c0_92 = arith.constant 0 : index
    %65 = vector.load %arg19[%c5, %c0_92] : memref<40x35xf32, #tpu.memory_space<vmem>>, vector<1x35xf32>
    %c0_93 = arith.constant 0 : index
    %c320 = arith.constant 320 : index
    %66 = vector.load %arg20[%c0_93, %c320] : memref<2x1280xf32, #tpu.memory_space<vmem>>, vector<1x35xf32>
    tpu.vector_store %arg20[%c0_93, %c320], %65 {strides = array<i32>} : memref<2x1280xf32, #tpu.memory_space<vmem>>, vector<1x35xf32>,
    %c6 = arith.constant 6 : index
    %c0_94 = arith.constant 0 : index
    %67 = vector.load %arg19[%c6, %c0_94] : memref<40x35xf32, #tpu.memory_space<vmem>>, vector<1x35xf32>
    %c0_95 = arith.constant 0 : index
    %c384 = arith.constant 384 : index
    %68 = vector.load %arg20[%c0_95, %c384] : memref<2x1280xf32, #tpu.memory_space<vmem>>, vector<1x35xf32>
    tpu.vector_store %arg20[%c0_95, %c384], %67 {strides = array<i32>} : memref<2x1280xf32, #tpu.memory_space<vmem>>, vector<1x35xf32>,
    %c7 = arith.constant 7 : index
    %c0_96 = arith.constant 0 : index
    %69 = vector.load %arg19[%c7, %c0_96] : memref<40x35xf32, #tpu.memory_space<vmem>>, vector<1x35xf32>
    %c0_97 = arith.constant 0 : index
    %c448 = arith.constant 448 : index
    %70 = vector.load %arg20[%c0_97, %c448] : memref<2x1280xf32, #tpu.memory_space<vmem>>, vector<1x35xf32>
    tpu.vector_store %arg20[%c0_97, %c448], %69 {strides = array<i32>} : memref<2x1280xf32, #tpu.memory_space<vmem>>, vector<1x35xf32>,
    %c8_98 = arith.constant 8 : index
    %c0_99 = arith.constant 0 : index
    %71 = vector.load %arg19[%c8_98, %c0_99] : memref<40x35xf32, #tpu.memory_space<vmem>>, vector<1x35xf32>
    %c0_100 = arith.constant 0 : index
    %c512 = arith.constant 512 : index
    %72 = vector.load %arg20[%c0_100, %c512] : memref<2x1280xf32, #tpu.memory_space<vmem>>, vector<1x35xf32>
    tpu.vector_store %arg20[%c0_100, %c512], %71 {strides = array<i32>} : memref<2x1280xf32, #tpu.memory_space<vmem>>, vector<1x35xf32>,
    %c9 = arith.constant 9 : index
    %c0_101 = arith.constant 0 : index
    %73 = vector.load %arg19[%c9, %c0_101] : memref<40x35xf32, #tpu.memory_space<vmem>>, vector<1x35xf32>
    %c0_102 = arith.constant 0 : index
    %c576 = arith.constant 576 : index
    %74 = vector.load %arg20[%c0_102, %c576] : memref<2x1280xf32, #tpu.memory_space<vmem>>, vector<1x35xf32>
    tpu.vector_store %arg20[%c0_102, %c576], %73 {strides = array<i32>} : memref<2x1280xf32, #tpu.memory_space<vmem>>, vector<1x35xf32>,
    %c10_103 = arith.constant 10 : index
    %c0_104 = arith.constant 0 : index
    %75 = vector.load %arg19[%c10_103, %c0_104] : memref<40x35xf32, #tpu.memory_space<vmem>>, vector<1x35xf32>
    %c0_105 = arith.constant 0 : index
    %c640 = arith.constant 640 : index
    %76 = vector.load %arg20[%c0_105, %c640] : memref<2x1280xf32, #tpu.memory_space<vmem>>, vector<1x35xf32>
    tpu.vector_store %arg20[%c0_105, %c640], %75 {strides = array<i32>} : memref<2x1280xf32, #tpu.memory_space<vmem>>, vector<1x35xf32>,
    %c11 = arith.constant 11 : index
    %c0_106 = arith.constant 0 : index
    %77 = vector.load %arg19[%c11, %c0_106] : memref<40x35xf32, #tpu.memory_space<vmem>>, vector<1x35xf32>
    %c0_107 = arith.constant 0 : index
    %c704 = arith.constant 704 : index
    %78 = vector.load %arg20[%c0_107, %c704] : memref<2x1280xf32, #tpu.memory_space<vmem>>, vector<1x35xf32>
    tpu.vector_store %arg20[%c0_107, %c704], %77 {strides = array<i32>} : memref<2x1280xf32, #tpu.memory_space<vmem>>, vector<1x35xf32>,
    %c12 = arith.constant 12 : index
    %c0_108 = arith.constant 0 : index
    %79 = vector.load %arg19[%c12, %c0_108] : memref<40x35xf32, #tpu.memory_space<vmem>>, vector<1x35xf32>
    %c0_109 = arith.constant 0 : index
    %c768 = arith.constant 768 : index
    %80 = vector.load %arg20[%c0_109, %c768] : memref<2x1280xf32, #tpu.memory_space<vmem>>, vector<1x35xf32>
    tpu.vector_store %arg20[%c0_109, %c768], %79 {strides = array<i32>} : memref<2x1280xf32, #tpu.memory_space<vmem>>, vector<1x35xf32>,
    %c13 = arith.constant 13 : index
    %c0_110 = arith.constant 0 : index
    %81 = vector.load %arg19[%c13, %c0_110] : memref<40x35xf32, #tpu.memory_space<vmem>>, vector<1x35xf32>
    %c0_111 = arith.constant 0 : index
    %c832 = arith.constant 832 : index
    %82 = vector.load %arg20[%c0_111, %c832] : memref<2x1280xf32, #tpu.memory_space<vmem>>, vector<1x35xf32>
    tpu.vector_store %arg20[%c0_111, %c832], %81 {strides = array<i32>} : memref<2x1280xf32, #tpu.memory_space<vmem>>, vector<1x35xf32>,
    %c14 = arith.constant 14 : index
    %c0_112 = arith.constant 0 : index
    %83 = vector.load %arg19[%c14, %c0_112] : memref<40x35xf32, #tpu.memory_space<vmem>>, vector<1x35xf32>
    %c0_113 = arith.constant 0 : index
    %c896 = arith.constant 896 : index
    %84 = vector.load %arg20[%c0_113, %c896] : memref<2x1280xf32, #tpu.memory_space<vmem>>, vector<1x35xf32>
    tpu.vector_store %arg20[%c0_113, %c896], %83 {strides = array<i32>} : memref<2x1280xf32, #tpu.memory_space<vmem>>, vector<1x35xf32>,
    %c15 = arith.constant 15 : index
    %c0_114 = arith.constant 0 : index
    %85 = vector.load %arg19[%c15, %c0_114] : memref<40x35xf32, #tpu.memory_space<vmem>>, vector<1x35xf32>
    %c0_115 = arith.constant 0 : index
    %c960 = arith.constant 960 : index
    %86 = vector.load %arg20[%c0_115, %c960] : memref<2x1280xf32, #tpu.memory_space<vmem>>, vector<1x35xf32>
    tpu.vector_store %arg20[%c0_115, %c960], %85 {strides = array<i32>} : memref<2x1280xf32, #tpu.memory_space<vmem>>, vector<1x35xf32>,
    %c16_116 = arith.constant 16 : index
    %c0_117 = arith.constant 0 : index
    %87 = vector.load %arg19[%c16_116, %c0_117] : memref<40x35xf32, #tpu.memory_space<vmem>>, vector<1x35xf32>
    %c0_118 = arith.constant 0 : index
    %c1024 = arith.constant 1024 : index
    %88 = vector.load %arg20[%c0_118, %c1024] : memref<2x1280xf32, #tpu.memory_space<vmem>>, vector<1x35xf32>
    tpu.vector_store %arg20[%c0_118, %c1024], %87 {strides = array<i32>} : memref<2x1280xf32, #tpu.memory_space<vmem>>, vector<1x35xf32>,
    %c17 = arith.constant 17 : index
    %c0_119 = arith.constant 0 : index
    %89 = vector.load %arg19[%c17, %c0_119] : memref<40x35xf32, #tpu.memory_space<vmem>>, vector<1x35xf32>
    %c0_120 = arith.constant 0 : index
    %c1088 = arith.constant 1088 : index
    %90 = vector.load %arg20[%c0_120, %c1088] : memref<2x1280xf32, #tpu.memory_space<vmem>>, vector<1x35xf32>
    tpu.vector_store %arg20[%c0_120, %c1088], %89 {strides = array<i32>} : memref<2x1280xf32, #tpu.memory_space<vmem>>, vector<1x35xf32>,
    %c18 = arith.constant 18 : index
    %c0_121 = arith.constant 0 : index
    %91 = vector.load %arg19[%c18, %c0_121] : memref<40x35xf32, #tpu.memory_space<vmem>>, vector<1x35xf32>
    %c0_122 = arith.constant 0 : index
    %c1152 = arith.constant 1152 : index
    %92 = vector.load %arg20[%c0_122, %c1152] : memref<2x1280xf32, #tpu.memory_space<vmem>>, vector<1x35xf32>
    tpu.vector_store %arg20[%c0_122, %c1152], %91 {strides = array<i32>} : memref<2x1280xf32, #tpu.memory_space<vmem>>, vector<1x35xf32>,
    %c19 = arith.constant 19 : index
    %c0_123 = arith.constant 0 : index
    %93 = vector.load %arg19[%c19, %c0_123] : memref<40x35xf32, #tpu.memory_space<vmem>>, vector<1x35xf32>
    %c0_124 = arith.constant 0 : index
    %c1216 = arith.constant 1216 : index
    %94 = vector.load %arg20[%c0_124, %c1216] : memref<2x1280xf32, #tpu.memory_space<vmem>>, vector<1x35xf32>
    tpu.vector_store %arg20[%c0_124, %c1216], %93 {strides = array<i32>} : memref<2x1280xf32, #tpu.memory_space<vmem>>, vector<1x35xf32>,
    %c20_125 = arith.constant 20 : index
    %c0_126 = arith.constant 0 : index
    %95 = vector.load %arg19[%c20_125, %c0_126] : memref<40x35xf32, #tpu.memory_space<vmem>>, vector<1x35xf32>
    %c1_127 = arith.constant 1 : index
    %c0_128 = arith.constant 0 : index
    %96 = vector.load %arg20[%c1_127, %c0_128] : memref<2x1280xf32, #tpu.memory_space<vmem>>, vector<1x35xf32>
    tpu.vector_store %arg20[%c1_127, %c0_128], %95 {strides = array<i32>} : memref<2x1280xf32, #tpu.memory_space<vmem>>, vector<1x35xf32>,
    %c21 = arith.constant 21 : index
    %c0_129 = arith.constant 0 : index
    %97 = vector.load %arg19[%c21, %c0_129] : memref<40x35xf32, #tpu.memory_space<vmem>>, vector<1x35xf32>
    %c1_130 = arith.constant 1 : index
    %c64_131 = arith.constant 64 : index
    %98 = vector.load %arg20[%c1_130, %c64_131] : memref<2x1280xf32, #tpu.memory_space<vmem>>, vector<1x35xf32>
    tpu.vector_store %arg20[%c1_130, %c64_131], %97 {strides = array<i32>} : memref<2x1280xf32, #tpu.memory_space<vmem>>, vector<1x35xf32>,
    %c22 = arith.constant 22 : index
    %c0_132 = arith.constant 0 : index
    %99 = vector.load %arg19[%c22, %c0_132] : memref<40x35xf32, #tpu.memory_space<vmem>>, vector<1x35xf32>
    %c1_133 = arith.constant 1 : index
    %c128_134 = arith.constant 128 : index
    %100 = vector.load %arg20[%c1_133, %c128_134] : memref<2x1280xf32, #tpu.memory_space<vmem>>, vector<1x35xf32>
    tpu.vector_store %arg20[%c1_133, %c128_134], %99 {strides = array<i32>} : memref<2x1280xf32, #tpu.memory_space<vmem>>, vector<1x35xf32>,
    %c23 = arith.constant 23 : index
    %c0_135 = arith.constant 0 : index
    %101 = vector.load %arg19[%c23, %c0_135] : memref<40x35xf32, #tpu.memory_space<vmem>>, vector<1x35xf32>
    %c1_136 = arith.constant 1 : index
    %c192_137 = arith.constant 192 : index
    %102 = vector.load %arg20[%c1_136, %c192_137] : memref<2x1280xf32, #tpu.memory_space<vmem>>, vector<1x35xf32>
    tpu.vector_store %arg20[%c1_136, %c192_137], %101 {strides = array<i32>} : memref<2x1280xf32, #tpu.memory_space<vmem>>, vector<1x35xf32>,
    %c24 = arith.constant 24 : index
    %c0_138 = arith.constant 0 : index
    %103 = vector.load %arg19[%c24, %c0_138] : memref<40x35xf32, #tpu.memory_space<vmem>>, vector<1x35xf32>
    %c1_139 = arith.constant 1 : index
    %c256_140 = arith.constant 256 : index
    %104 = vector.load %arg20[%c1_139, %c256_140] : memref<2x1280xf32, #tpu.memory_space<vmem>>, vector<1x35xf32>
    tpu.vector_store %arg20[%c1_139, %c256_140], %103 {strides = array<i32>} : memref<2x1280xf32, #tpu.memory_space<vmem>>, vector<1x35xf32>,
    %c25 = arith.constant 25 : index
    %c0_141 = arith.constant 0 : index
    %105 = vector.load %arg19[%c25, %c0_141] : memref<40x35xf32, #tpu.memory_space<vmem>>, vector<1x35xf32>
    %c1_142 = arith.constant 1 : index
    %c320_143 = arith.constant 320 : index
    %106 = vector.load %arg20[%c1_142, %c320_143] : memref<2x1280xf32, #tpu.memory_space<vmem>>, vector<1x35xf32>
    tpu.vector_store %arg20[%c1_142, %c320_143], %105 {strides = array<i32>} : memref<2x1280xf32, #tpu.memory_space<vmem>>, vector<1x35xf32>,
    %c26 = arith.constant 26 : index
    %c0_144 = arith.constant 0 : index
    %107 = vector.load %arg19[%c26, %c0_144] : memref<40x35xf32, #tpu.memory_space<vmem>>, vector<1x35xf32>
    %c1_145 = arith.constant 1 : index
    %c384_146 = arith.constant 384 : index
    %108 = vector.load %arg20[%c1_145, %c384_146] : memref<2x1280xf32, #tpu.memory_space<vmem>>, vector<1x35xf32>
    tpu.vector_store %arg20[%c1_145, %c384_146], %107 {strides = array<i32>} : memref<2x1280xf32, #tpu.memory_space<vmem>>, vector<1x35xf32>,
    %c27 = arith.constant 27 : index
    %c0_147 = arith.constant 0 : index
    %109 = vector.load %arg19[%c27, %c0_147] : memref<40x35xf32, #tpu.memory_space<vmem>>, vector<1x35xf32>
    %c1_148 = arith.constant 1 : index
    %c448_149 = arith.constant 448 : index
    %110 = vector.load %arg20[%c1_148, %c448_149] : memref<2x1280xf32, #tpu.memory_space<vmem>>, vector<1x35xf32>
    tpu.vector_store %arg20[%c1_148, %c448_149], %109 {strides = array<i32>} : memref<2x1280xf32, #tpu.memory_space<vmem>>, vector<1x35xf32>,
    %c28 = arith.constant 28 : index
    %c0_150 = arith.constant 0 : index
    %111 = vector.load %arg19[%c28, %c0_150] : memref<40x35xf32, #tpu.memory_space<vmem>>, vector<1x35xf32>
    %c1_151 = arith.constant 1 : index
    %c512_152 = arith.constant 512 : index
    %112 = vector.load %arg20[%c1_151, %c512_152] : memref<2x1280xf32, #tpu.memory_space<vmem>>, vector<1x35xf32>
    tpu.vector_store %arg20[%c1_151, %c512_152], %111 {strides = array<i32>} : memref<2x1280xf32, #tpu.memory_space<vmem>>, vector<1x35xf32>,
    %c29 = arith.constant 29 : index
    %c0_153 = arith.constant 0 : index
    %113 = vector.load %arg19[%c29, %c0_153] : memref<40x35xf32, #tpu.memory_space<vmem>>, vector<1x35xf32>
    %c1_154 = arith.constant 1 : index
    %c576_155 = arith.constant 576 : index
    %114 = vector.load %arg20[%c1_154, %c576_155] : memref<2x1280xf32, #tpu.memory_space<vmem>>, vector<1x35xf32>
    tpu.vector_store %arg20[%c1_154, %c576_155], %113 {strides = array<i32>} : memref<2x1280xf32, #tpu.memory_space<vmem>>, vector<1x35xf32>,
    %c30_156 = arith.constant 30 : index
    %c0_157 = arith.constant 0 : index
    %115 = vector.load %arg19[%c30_156, %c0_157] : memref<40x35xf32, #tpu.memory_space<vmem>>, vector<1x35xf32>
    %c1_158 = arith.constant 1 : index
    %c640_159 = arith.constant 640 : index
    %116 = vector.load %arg20[%c1_158, %c640_159] : memref<2x1280xf32, #tpu.memory_space<vmem>>, vector<1x35xf32>
    tpu.vector_store %arg20[%c1_158, %c640_159], %115 {strides = array<i32>} : memref<2x1280xf32, #tpu.memory_space<vmem>>, vector<1x35xf32>,
    %c31 = arith.constant 31 : index
    %c0_160 = arith.constant 0 : index
    %117 = vector.load %arg19[%c31, %c0_160] : memref<40x35xf32, #tpu.memory_space<vmem>>, vector<1x35xf32>
    %c1_161 = arith.constant 1 : index
    %c704_162 = arith.constant 704 : index
    %118 = vector.load %arg20[%c1_161, %c704_162] : memref<2x1280xf32, #tpu.memory_space<vmem>>, vector<1x35xf32>
    tpu.vector_store %arg20[%c1_161, %c704_162], %117 {strides = array<i32>} : memref<2x1280xf32, #tpu.memory_space<vmem>>, vector<1x35xf32>,
    %c32 = arith.constant 32 : index
    %c0_163 = arith.constant 0 : index
    %119 = vector.load %arg19[%c32, %c0_163] : memref<40x35xf32, #tpu.memory_space<vmem>>, vector<1x35xf32>
    %c1_164 = arith.constant 1 : index
    %c768_165 = arith.constant 768 : index
    %120 = vector.load %arg20[%c1_164, %c768_165] : memref<2x1280xf32, #tpu.memory_space<vmem>>, vector<1x35xf32>
    tpu.vector_store %arg20[%c1_164, %c768_165], %119 {strides = array<i32>} : memref<2x1280xf32, #tpu.memory_space<vmem>>, vector<1x35xf32>,
    %c33 = arith.constant 33 : index
    %c0_166 = arith.constant 0 : index
    %121 = vector.load %arg19[%c33, %c0_166] : memref<40x35xf32, #tpu.memory_space<vmem>>, vector<1x35xf32>
    %c1_167 = arith.constant 1 : index
    %c832_168 = arith.constant 832 : index
    %122 = vector.load %arg20[%c1_167, %c832_168] : memref<2x1280xf32, #tpu.memory_space<vmem>>, vector<1x35xf32>
    tpu.vector_store %arg20[%c1_167, %c832_168], %121 {strides = array<i32>} : memref<2x1280xf32, #tpu.memory_space<vmem>>, vector<1x35xf32>,
    %c34 = arith.constant 34 : index
    %c0_169 = arith.constant 0 : index
    %123 = vector.load %arg19[%c34, %c0_169] : memref<40x35xf32, #tpu.memory_space<vmem>>, vector<1x35xf32>
    %c1_170 = arith.constant 1 : index
    %c896_171 = arith.constant 896 : index
    %124 = vector.load %arg20[%c1_170, %c896_171] : memref<2x1280xf32, #tpu.memory_space<vmem>>, vector<1x35xf32>
    tpu.vector_store %arg20[%c1_170, %c896_171], %123 {strides = array<i32>} : memref<2x1280xf32, #tpu.memory_space<vmem>>, vector<1x35xf32>,
    %c35 = arith.constant 35 : index
    %c0_172 = arith.constant 0 : index
    %125 = vector.load %arg19[%c35, %c0_172] : memref<40x35xf32, #tpu.memory_space<vmem>>, vector<1x35xf32>
    %c1_173 = arith.constant 1 : index
    %c960_174 = arith.constant 960 : index
    %126 = vector.load %arg20[%c1_173, %c960_174] : memref<2x1280xf32, #tpu.memory_space<vmem>>, vector<1x35xf32>
    tpu.vector_store %arg20[%c1_173, %c960_174], %125 {strides = array<i32>} : memref<2x1280xf32, #tpu.memory_space<vmem>>, vector<1x35xf32>,
    %c36 = arith.constant 36 : index
    %c0_175 = arith.constant 0 : index
    %127 = vector.load %arg19[%c36, %c0_175] : memref<40x35xf32, #tpu.memory_space<vmem>>, vector<1x35xf32>
    %c1_176 = arith.constant 1 : index
    %c1024_177 = arith.constant 1024 : index
    %128 = vector.load %arg20[%c1_176, %c1024_177] : memref<2x1280xf32, #tpu.memory_space<vmem>>, vector<1x35xf32>
    tpu.vector_store %arg20[%c1_176, %c1024_177], %127 {strides = array<i32>} : memref<2x1280xf32, #tpu.memory_space<vmem>>, vector<1x35xf32>,
    %c37 = arith.constant 37 : index
    %c0_178 = arith.constant 0 : index
    %129 = vector.load %arg19[%c37, %c0_178] : memref<40x35xf32, #tpu.memory_space<vmem>>, vector<1x35xf32>
    %c1_179 = arith.constant 1 : index
    %c1088_180 = arith.constant 1088 : index
    %130 = vector.load %arg20[%c1_179, %c1088_180] : memref<2x1280xf32, #tpu.memory_space<vmem>>, vector<1x35xf32>
    tpu.vector_store %arg20[%c1_179, %c1088_180], %129 {strides = array<i32>} : memref<2x1280xf32, #tpu.memory_space<vmem>>, vector<1x35xf32>,
    %c38 = arith.constant 38 : index
    %c0_181 = arith.constant 0 : index
    %131 = vector.load %arg19[%c38, %c0_181] : memref<40x35xf32, #tpu.memory_space<vmem>>, vector<1x35xf32>
    %c1_182 = arith.constant 1 : index
    %c1152_183 = arith.constant 1152 : index
    %132 = vector.load %arg20[%c1_182, %c1152_183] : memref<2x1280xf32, #tpu.memory_space<vmem>>, vector<1x35xf32>
    tpu.vector_store %arg20[%c1_182, %c1152_183], %131 {strides = array<i32>} : memref<2x1280xf32, #tpu.memory_space<vmem>>, vector<1x35xf32>,
    %c39 = arith.constant 39 : index
    %c0_184 = arith.constant 0 : index
    %133 = vector.load %arg19[%c39, %c0_184] : memref<40x35xf32, #tpu.memory_space<vmem>>, vector<1x35xf32>
    %c1_185 = arith.constant 1 : index
    %c1216_186 = arith.constant 1216 : index
    %134 = vector.load %arg20[%c1_185, %c1216_186] : memref<2x1280xf32, #tpu.memory_space<vmem>>, vector<1x35xf32>
    tpu.vector_store %arg20[%c1_185, %c1216_186], %133 {strides = array<i32>} : memref<2x1280xf32, #tpu.memory_space<vmem>>, vector<1x35xf32>,
    %c0_187 = arith.constant 0 : index
    %c0_188 = arith.constant 0 : index
    %135 = vector.load %arg20[%c0_187, %c0_188] : memref<2x1280xf32, #tpu.memory_space<vmem>>, vector<2x1280xf32>
    %c0_189 = arith.constant 0 : index
    %c0_190 = arith.constant 0 : index
    %136 = vector.load %arg4[%c0_189, %c0_190] : memref<1280x30xf32, #tpu.memory_space<vmem>>, vector<1280x30xf32>
    %cst_191 = arith.constant dense<0.000000e+00> : vector<2x30xf32>
    %137 = tpu.matmul %135, %136, %cst_191 {dimension_numbers = #tpu.dot_dimension_numbers<[1], [0], [0], [1], [0, 0, 1, 1], [], []>} : vector<2x1280xf32>, vector<1280x30xf32>, vector<2x30xf32> -> vector<2x30xf32>
    %c0_192 = arith.constant 0 : index
    %c0_193 = arith.constant 0 : index
    %138 = vector.load %arg5[%c0_192, %c0_193] : memref<1x30xf32, #tpu.memory_space<vmem>>, vector<1x30xf32>
    %139 = vector.broadcast %138 : vector<1x30xf32> to vector<2x30xf32>
    %140 = arith.addf %137, %139 : vector<2x30xf32>
    %cst_194 = arith.constant 0.000000e+00 : f32
    %141 = vector.broadcast %cst_194 : f32 to vector<2x30xf32>
    %142 = arith.maximumf %140, %141 : vector<2x30xf32>
    %c0_195 = arith.constant 0 : index
    %c0_196 = arith.constant 0 : index
    %143 = vector.load %arg6[%c0_195, %c0_196] : memref<30x20xf32, #tpu.memory_space<vmem>>, vector<30x20xf32>
    %cst_197 = arith.constant dense<0.000000e+00> : vector<2x20xf32>
    %144 = tpu.matmul %142, %143, %cst_197 {dimension_numbers = #tpu.dot_dimension_numbers<[1], [0], [0], [1], [0, 0, 1, 1], [], []>} : vector<2x30xf32>, vector<30x20xf32>, vector<2x20xf32> -> vector<2x20xf32>
    %c0_198 = arith.constant 0 : index
    %c0_199 = arith.constant 0 : index
    %145 = vector.load %arg7[%c0_198, %c0_199] : memref<1x20xf32, #tpu.memory_space<vmem>>, vector<1x20xf32>
    %146 = vector.broadcast %145 : vector<1x20xf32> to vector<2x20xf32>
    %147 = arith.addf %144, %146 : vector<2x20xf32>
    %cst_200 = arith.constant 0.000000e+00 : f32
    %148 = vector.broadcast %cst_200 : f32 to vector<2x20xf32>
    %149 = arith.maximumf %147, %148 : vector<2x20xf32>
    %c0_201 = arith.constant 0 : index
    %c0_202 = arith.constant 0 : index
    %150 = vector.load %arg8[%c0_201, %c0_202] : memref<20x5xf32, #tpu.memory_space<vmem>>, vector<20x5xf32>
    %cst_203 = arith.constant dense<0.000000e+00> : vector<2x5xf32>
    %151 = tpu.matmul %149, %150, %cst_203 {dimension_numbers = #tpu.dot_dimension_numbers<[1], [0], [0], [1], [0, 0, 1, 1], [], []>} : vector<2x20xf32>, vector<20x5xf32>, vector<2x5xf32> -> vector<2x5xf32>
    %c0_204 = arith.constant 0 : index
    %c0_205 = arith.constant 0 : index
    %152 = vector.load %arg9[%c0_204, %c0_205] : memref<1x5xf32, #tpu.memory_space<vmem>>, vector<1x5xf32>
    %153 = vector.broadcast %152 : vector<1x5xf32> to vector<2x5xf32>
    %154 = arith.addf %151, %153 : vector<2x5xf32>
    %c0_206 = arith.constant 0 : index
    %c0_207 = arith.constant 0 : index
    %155 = vector.load %arg10[%c0_206, %c0_207] : memref<2x5xf32, #tpu.memory_space<vmem>>, vector<2x5xf32>
    tpu.vector_store %arg10[%c0_206, %c0_207], %154 {strides = array<i32>} : memref<2x5xf32, #tpu.memory_space<vmem>>, vector<2x5xf32>,
    return
  }
}

</mosaic_0001>

<bundles_post_ra>
// kernel: tpu_custom_call.1
= control target key start
LH: loop header
LB: loop body
LE: loop exit
PB: predicated region body
PF: predicated region fallthrough
CT: control target
= control target key end

     0   :  { %s2786_s17 = smov 8   ;;  %s4359_s0 = inlined_call_operand.vmem [shape: f32[300,8], index: 0, kind: input, shape index: {}]   ;;  %s4360_s1 = inlined_call_operand.vmem [shape: f32[24,10], index: 1, kind: input, shape index: {}]   ;;  %s4361_s2 = inlined_call_operand.vmem [shape: f32[40,20], index: 2, kind: input, shape index: {}]   ;;  %s4362_s3 = inlined_call_operand.vmem [shape: f32[80,40], index: 3, kind: input, shape index: {}]   ;;  %s4363_s4 = inlined_call_operand.vmem [shape: f32[1280,30], index: 4, kind: input, shape index: {}]   ;;  %s4364_s5 = inlined_call_operand.vmem [shape: f32[1,30], index: 5, kind: input, shape index: {}]   ;;  %s4365_s6 = inlined_call_operand.vmem [shape: f32[30,20], index: 6, kind: input, shape index: {}]   ;;  %s4366_s7 = inlined_call_operand.vmem [shape: f32[1,20], index: 7, kind: input, shape index: {}]   ;;  %s4367_s8 = inlined_call_operand.vmem [shape: f32[20,5], index: 8, kind: input, shape index: {}]   ;;  %s4368_s9 = inlined_call_operand.vmem [shape: f32[1,5], index: 9, kind: input, shape index: {}]   ;;  %s4369_s10 = inlined_call_operand.hbm [shape: f32[2,5], index: 10, kind: output, shape index: {}]  }
   0x1   :  { %v114_v0 = vld [vmem:[%s4359_s0 + $0x1] sm:$0xff]  ;;  %v115_v1 = vld [vmem:[%s4359_s0 + $0x9] sm:$0xff]  ;;  %v116_v2 = vld [vmem:[%s4359_s0 + $0x11] sm:$0xff] }
   0x2   :  { %190 = vrot.lane.b32.xlu0 %v114_v0, %s2786_s17  ;;  %192 = vrot.lane.b32.xlu1 %v115_v1, %s2786_s17 }
   0x3   :  { %194 = vrot.lane.b32.xlu2 %v116_v2, %s2786_s17 }
   0x4   :  { %15 = vsyncpa [#allocation13], 0  ;;  %v344_v3 = vld [vmem:[%s4359_s0 + $0x2] sm:$0xff]  ;;  %v345_v4 = vld [vmem:[%s4359_s0 + $0xa] sm:$0xff]  ;;  %s2787_s24 = smov 16   ;;  %vm74_vm0 = vcmask 64512  }
   0x5   :  { %v346_v5 = vld [vmem:[%s4359_s0 + $0x12] sm:$0xff]  ;;  %v347_v7 = vld [vmem:[%s4359_s0 + $0x1a] sm:$0xff]  ;;  %v348_v9 = vld [vmem:[%s4359_s0 + $0x22] sm:$0xff]  ;;  %vm304_vm1 = vcmask 130112   ;;  %vm534_vm2 = vcmask 195712   ;;  %vm615_vm3 = vcmask 195584  }
   0x6   :  { %v117_v6 = vld [vmem:[%s4359_s0 + $0x19] sm:$0xff]  ;;  %v118_v8 = vld [vmem:[%s4359_s0 + $0x21] sm:$0xff]  ;;  %v119_v10 = vld [vmem:[%s4359_s0 + $0x29] sm:$0xff]  ;;  %vm861_vm4 = vcmask 80896   ;;  %s2788_s19 = smov 30   ;;  %s2790_s20 = smov 10  }
   0x7   :  { %v349_v11 = vld [vmem:[%s4359_s0 + $0x2a] sm:$0xff]  ;;  %v350_v13 = vld [vmem:[%s4359_s0 + $0x32] sm:$0xff]  ;;  %v351_v15 = vld [vmem:[%s4359_s0 + $0x3a] sm:$0xff]  ;;  %vm112_vm5 = vcmask 58368   ;;  %vm342_vm6 = vcmask 123968   ;;  %vm572_vm7 = vcmask 189568  }
   0x8   :  { %v120_v12 = vld [vmem:[%s4359_s0 + $0x31] sm:$0xff]  ;;  %v121_v14 = vld [vmem:[%s4359_s0 + $0x39] sm:$0xff]  ;;  %v122_v16 = vld [vmem:[%s4359_s0 + $0x41] sm:$0xff]  ;;  %vm1167_vm8 = vcmask 162896   ;;  %vm1283_vm9 = vcmask 244896   ;;  %vm1399_vm10 = vcmask 326896  }
   0x9   :  { %v352_v17 = vld [vmem:[%s4359_s0 + $0x42] sm:$0xff]  ;;  %v353_v19 = vld [vmem:[%s4359_s0 + $0x4a] sm:$0xff]  ;;  %v354_v21 = vld [vmem:[%s4359_s0 + $0x52] sm:$0xff]  ;;  %vm1444_vm11 = vcmask 326656   ;;  %vm899_vm12 = vcmask 74752   ;;  %vm1032_vm13 = vcmask 77824  }
   0xa   :  { %420 = vrot.lane.b32.xlu0 %v344_v3, %s2787_s24  ;;  %422 = vrot.lane.b32.xlu1 %v345_v4, %s2787_s24  ;;  %v123_v18 = vld [vmem:[%s4359_s0 + $0x49] sm:$0xff]  ;;  %v124_v20 = vld [vmem:[%s4359_s0 + $0x51] sm:$0xff]  ;;  %vm1576_vm14 = vcmask 162816   ;;  %vm1186_vm15 = vcmask 156752  }
   0xb   :  { %424 = vrot.lane.b32.xlu2 %v346_v5, %s2787_s24  ;;  %v125_v22 = vld [vmem:[%s4359_s0 + $0x59] sm:$0xff]  ;;  %v126_v24 = vld [vmem:[%s4359_s0 + $0x61] sm:$0xff]  ;;  %v127_v26 = vld [vmem:[%s4359_s0 + $0x69] sm:$0xff] }
   0xc   :  { %v355_v23 = vld [vmem:[%s4359_s0 + $0x5a] sm:$0xff]  ;;  %v356_v25 = vld [vmem:[%s4359_s0 + $0x62] sm:$0xff]  ;;  %v357_v27 = vld [vmem:[%s4359_s0 + $0x6a] sm:$0xff] }
   0xd   :  { %v128_v28 = vld [vmem:[%s4359_s0 + $0x71] sm:$0xff]  ;;  %v129_v30 = vld [vmem:[%s4359_s0 + $0x79] sm:$0xff]  ;;  %v130_v32 = vld [vmem:[%s4359_s0 + $0x81] sm:$0xff] }
   0xe   :  { %v358_v29 = vld [vmem:[%s4359_s0 + $0x72] sm:$0xff]  ;;  %v359_v31 = vld [vmem:[%s4359_s0 + $0x7a] sm:$0xff]  ;;  %v37_v34 = vld [vmem:[%s4359_s0 + $0x8] sm:$0xff] }
   0xf   :  { %v36_v33 = vld [vmem:[%s4359_s0] sm:$0xff]  ;;  %v38_v35 = vld [vmem:[%s4359_s0 + $0x10] sm:$0xff]  ;;  %76 = vst.msk [vmem:[#allocation2 + $0x8] sm:$0xff] %vm74_vm0, %v37_v34  ;;  %v613_v40 = vld [vmem:[%s4360_s1 + $0x8] sm:$0xff] }
  0x10   :  { %75 = vst.msk [vmem:[#allocation2] sm:$0xff] %vm74_vm0, %v36_v33  ;;  %v360_v36 = vld [vmem:[%s4359_s0 + $0x82] sm:$0xff]  ;;  %v361_v38 = vld [vmem:[%s4359_s0 + $0x8a] sm:$0xff]  ;;  %v362_v42 = vld [vmem:[%s4359_s0 + $0x92] sm:$0xff] }
  0x11   :  { %v131_v37 = vld [vmem:[%s4359_s0 + $0x89] sm:$0xff]  ;;  %77 = vst.msk [vmem:[#allocation2 + $0x10] sm:$0xff] %vm74_vm0, %v38_v35  ;;  %v132_v41 = vld [vmem:[%s4359_s0 + $0x91] sm:$0xff]  ;;  %v612_v44 = vld [vmem:[%s4360_s1] sm:$0xff] }
  0x12   :  { %196 = vrot.lane.b32.xlu0 %v117_v6, %s2786_s17  ;;  %426 = vrot.lane.b32.xlu1 %v347_v7, %s2787_s24  ;;  %v614_v39 = vld [vmem:[%s4360_s1 + $0x10] sm:$0xff]  ;;  %v133_v45 = vld [vmem:[%s4359_s0 + $0x99] sm:$0xff] }
  0x13   :  { %198 = vrot.lane.b32.xlu2 %v118_v8, %s2786_s17  ;;  %743 = vmatpush.msra.mxu0 %v614_v39  ;;  %v39_v46 = vld [vmem:[%s4359_s0 + $0x18] sm:$0xff]  ;;  %v40_v47 = vld [vmem:[%s4359_s0 + $0x20] sm:$0xff]  ;;  %v41_v52 = vld [vmem:[%s4359_s0 + $0x28] sm:$0xff] }
  0x14   :  { %2742 = vmatpush.msra.mxu3 %v614_v39  ;;  %2741 = vmatpush.msra.mxu1 %v614_v39  ;;  %78 = vst.msk [vmem:[#allocation2 + $0x18] sm:$0xff] %vm74_vm0, %v39_v46  ;;  %v363_v48 = vld [vmem:[%s4359_s0 + $0x9a] sm:$0xff]  ;;  %v364_v51 = vld [vmem:[%s4359_s0 + $0xa2] sm:$0xff]  ;;  %v365_v54 = vld [vmem:[%s4359_s0 + $0xaa] sm:$0xff] }
  0x15   :  { %744 = vmatpush.msra.mxu0 %v613_v40  ;;  %v134_v49 = vld [vmem:[%s4359_s0 + $0xa1] sm:$0xff]  ;;  %79 = vst.msk [vmem:[#allocation2 + $0x20] sm:$0xff] %vm74_vm0, %v40_v47  ;;  %v135_v53 = vld [vmem:[%s4359_s0 + $0xa9] sm:$0xff]  ;;  %v136_v56 = vld [vmem:[%s4359_s0 + $0xb1] sm:$0xff] }
  0x16   :  { %2744 = vmatpush.msra.mxu3 %v613_v40  ;;  %2743 = vmatpush.msra.mxu1 %v613_v40  ;;  %80 = vst.msk [vmem:[#allocation2 + $0x28] sm:$0xff] %vm74_vm0, %v41_v52  ;;  %v42_v59 = vld [vmem:[%s4359_s0 + $0x30] sm:$0xff]  ;;  %v43_v60 = vld [vmem:[%s4359_s0 + $0x38] sm:$0xff]  ;;  %v44_v3 = vld [vmem:[%s4359_s0 + $0x40] sm:$0xff] }
  0x17   :  { %745 = vmatpush.msra.mxu0 %v612_v44  ;;  %v366_v61 = vld [vmem:[%s4359_s0 + $0xb2] sm:$0xff]  ;;  %81 = vst.msk [vmem:[#allocation2 + $0x30] sm:$0xff] %vm74_vm0, %v42_v59  ;;  %v367_v0 = vld [vmem:[%s4359_s0 + $0xba] sm:$0xff]  ;;  %v376_v39 = vld [vmem:[%s4359_s0 + $0x102] sm:$0xff] }
  0x18   :  { %2746 = vmatpush.msra.mxu3 %v612_v44  ;;  %2745 = vmatpush.msra.mxu1 %v612_v44  ;;  %v137_v62 = vld [vmem:[%s4359_s0 + $0xb9] sm:$0xff]  ;;  %82 = vst.msk [vmem:[#allocation2 + $0x38] sm:$0xff] %vm74_vm0, %v43_v60  ;;  %v144_v4 = vld [vmem:[%s4359_s0 + $0xf1] sm:$0xff]  ;;  %v138_v7 = vld [vmem:[%s4359_s0 + $0xc1] sm:$0xff] }
  0x19   :  { %v374_v5 = vld [vmem:[%s4359_s0 + $0xf2] sm:$0xff]  ;;  %83 = vst.msk [vmem:[#allocation2 + $0x40] sm:$0xff] %vm74_vm0, %v44_v3  ;;  %v371_v34 = vld [vmem:[%s4359_s0 + $0xda] sm:$0xff]  ;;  %v372_v47 = vld [vmem:[%s4359_s0 + $0xe2] sm:$0xff] }
  0x1a   :  { %428 = vrot.lane.b32.xlu0 %v348_v9, %s2787_s24  ;;  %200 = vrot.lane.b32.xlu1 %v119_v10, %s2786_s17  ;;  %v52_v46 = vld [vmem:[%s4359_s0 + $0x80] sm:$0xff] }
  0x1b   :  { %430 = vrot.lane.b32.xlu2 %v349_v11, %s2787_s24  ;;  %v45_v11 = vld [vmem:[%s4359_s0 + $0x48] sm:$0xff]  ;;  %91 = vst.msk [vmem:[#allocation2 + $0x80] sm:$0xff] %vm74_vm0, %v52_v46 }
  0x1c   :  { %84 = vst.msk [vmem:[#allocation2 + $0x48] sm:$0xff] %vm74_vm0, %v45_v11 }
  0x22   :  { %202 = vrot.lane.b32.xlu0 %v120_v12, %s2786_s17  ;;  %432 = vrot.lane.b32.xlu1 %v350_v13, %s2787_s24  ;;  %v46_v12 = vld [vmem:[%s4359_s0 + $0x50] sm:$0xff] }
  0x23   :  { %204 = vrot.lane.b32.xlu2 %v121_v14, %s2786_s17  ;;  %v140_v13 = vld [vmem:[%s4359_s0 + $0xd1] sm:$0xff]  ;;  %v368_v14 = vld [vmem:[%s4359_s0 + $0xc2] sm:$0xff]  ;;  %85 = vst.msk [vmem:[#allocation2 + $0x50] sm:$0xff] %vm74_vm0, %v46_v12 }
  0x2a   :  { %434 = vrot.lane.b32.xlu0 %v351_v15, %s2787_s24  ;;  %206 = vrot.lane.b32.xlu1 %v122_v16, %s2786_s17 }
  0x2b   :  { %436 = vrot.lane.b32.xlu2 %v352_v17, %s2787_s24  ;;  %v370_v17 = vld [vmem:[%s4359_s0 + $0xd2] sm:$0xff] }
  0x32   :  { %208 = vrot.lane.b32.xlu0 %v123_v18, %s2786_s17  ;;  %438 = vrot.lane.b32.xlu1 %v353_v19, %s2787_s24 }
  0x33   :  { %210 = vrot.lane.b32.xlu2 %v124_v20, %s2786_s17  ;;  %v47_v20 = vld [vmem:[%s4359_s0 + $0x58] sm:$0xff] }
  0x34   :  { %86 = vst.msk [vmem:[#allocation2 + $0x58] sm:$0xff] %vm74_vm0, %v47_v20 }
  0x3a   :  { %440 = vrot.lane.b32.xlu0 %v354_v21, %s2787_s24  ;;  %212 = vrot.lane.b32.xlu1 %v125_v22, %s2786_s17  ;;  %v145_v21 = vld [vmem:[%s4359_s0 + $0xf9] sm:$0xff] }
  0x3b   :  { %442 = vrot.lane.b32.xlu2 %v355_v23, %s2787_s24  ;;  %v375_v22 = vld [vmem:[%s4359_s0 + $0xfa] sm:$0xff] }
  0x42   :  { %214 = vrot.lane.b32.xlu0 %v126_v24, %s2786_s17  ;;  %444 = vrot.lane.b32.xlu1 %v356_v25, %s2787_s24  ;;  %v139_v25 = vld [vmem:[%s4359_s0 + $0xc9] sm:$0xff] }
  0x43   :  { %216 = vrot.lane.b32.xlu2 %v127_v26, %s2786_s17 }
  0x4a   :  { %446 = vrot.lane.b32.xlu0 %v357_v27, %s2787_s24  ;;  %218 = vrot.lane.b32.xlu1 %v128_v28, %s2786_s17  ;;  %v48_v28 = vld [vmem:[%s4359_s0 + $0x60] sm:$0xff] }
  0x4b   :  { %448 = vrot.lane.b32.xlu2 %v358_v29, %s2787_s24  ;;  %v49_v29 = vld [vmem:[%s4359_s0 + $0x68] sm:$0xff]  ;;  %87 = vst.msk [vmem:[#allocation2 + $0x60] sm:$0xff] %vm74_vm0, %v48_v28  ;;  %v60_v28 = vld [vmem:[%s4359_s0 + $0xc0] sm:$0xff] }
  0x4c   :  { %88 = vst.msk [vmem:[#allocation2 + $0x68] sm:$0xff] %vm74_vm0, %v49_v29 }
  0x4d   :  { %99 = vst.msk [vmem:[#allocation2 + $0xc0] sm:$0xff] %vm74_vm0, %v60_v28 }
  0x52   :  { %220 = vrot.lane.b32.xlu0 %v129_v30, %s2786_s17  ;;  %450 = vrot.lane.b32.xlu1 %v359_v31, %s2787_s24  ;;  %v141_v30 = vld [vmem:[%s4359_s0 + $0xd9] sm:$0xff]  ;;  %v369_v31 = vld [vmem:[%s4359_s0 + $0xca] sm:$0xff] }
  0x53   :  { %222 = vrot.lane.b32.xlu2 %v130_v32, %s2786_s17 }
  0x5a   :  { %452 = vrot.lane.b32.xlu0 %v360_v36, %s2787_s24  ;;  %224 = vrot.lane.b32.xlu1 %v131_v37, %s2786_s17  ;;  %v50_v37 = vld [vmem:[%s4359_s0 + $0x70] sm:$0xff] }
  0x5b   :  { %454 = vrot.lane.b32.xlu2 %v361_v38, %s2787_s24  ;;  %v146_v38 = vld [vmem:[%s4359_s0 + $0x101] sm:$0xff]  ;;  %89 = vst.msk [vmem:[#allocation2 + $0x70] sm:$0xff] %vm74_vm0, %v50_v37 }
  0x5d   :  { %v195_v43 = vpop.permute.xlu2 %194 }
  0x5e   :  { %307 = vst.msk [vmem:[#allocation2 + $0x10] sm:$0xff] %vm304_vm1, %v195_v43 }
  0x62   :  { %226 = vrot.lane.b32.xlu0 %v132_v41, %s2786_s17  ;;  %456 = vrot.lane.b32.xlu1 %v362_v42, %s2787_s24  ;;  %v142_v42 = vld [vmem:[%s4359_s0 + $0xe1] sm:$0xff] }
  0x63   :  { %228 = vrot.lane.b32.xlu2 %v133_v45, %s2786_s17  ;;  %v51_v45 = vld [vmem:[%s4359_s0 + $0x78] sm:$0xff] }
  0x64   :  { %90 = vst.msk [vmem:[#allocation2 + $0x78] sm:$0xff] %vm74_vm0, %v51_v45 }
  0x65   :  { %v425_v50 = vpop.permute.xlu2 %424 }
  0x66   :  { %537 = vst.msk [vmem:[#allocation2 + $0x10] sm:$0xff] %vm534_vm2, %v425_v50 }
  0x6a   :  { %458 = vrot.lane.b32.xlu0 %v363_v48, %s2787_s24  ;;  %230 = vrot.lane.b32.xlu1 %v134_v49, %s2786_s17  ;;  %v147_v48 = vld [vmem:[%s4359_s0 + $0x109] sm:$0xff] }
  0x6b   :  { %460 = vrot.lane.b32.xlu2 %v364_v51, %s2787_s24  ;;  %v377_v51 = vld [vmem:[%s4359_s0 + $0x10a] sm:$0xff] }
  0x6d   :  { %v199_v55 = vpop.permute.xlu2 %198  ;;  %v576_v24 = vld [vmem:[#allocation2 + $0x10] sm:$0xff] }
  0x6e   :  { %309 = vst.msk [vmem:[#allocation2 + $0x20] sm:$0xff] %vm304_vm1, %v199_v55  ;;  %v143_v55 = vld [vmem:[%s4359_s0 + $0xe9] sm:$0xff] }
  0x72   :  { %232 = vrot.lane.b32.xlu0 %v135_v53, %s2786_s17  ;;  %462 = vrot.lane.b32.xlu1 %v365_v54, %s2787_s24  ;;  %v53_v54 = vld [vmem:[%s4359_s0 + $0x88] sm:$0xff] }
  0x73   :  { %234 = vrot.lane.b32.xlu2 %v136_v56, %s2786_s17  ;;  %v373_v56 = vld [vmem:[%s4359_s0 + $0xea] sm:$0xff]  ;;  %92 = vst.msk [vmem:[#allocation2 + $0x88] sm:$0xff] %vm74_vm0, %v53_v54 }
  0x74   :  { %v191_v57 = vpop.permute.xlu0 %190  ;;  %v193_v58 = vpop.permute.xlu1 %192 }
  0x75   :  { %305 = vst.msk [vmem:[#allocation2] sm:$0xff] %vm304_vm1, %v191_v57  ;;  %v431_v63 = vpop.permute.xlu2 %430 }
  0x76   :  { %306 = vst.msk [vmem:[#allocation2 + $0x8] sm:$0xff] %vm304_vm1, %v193_v58 }
  0x7a   :  { %464 = vrot.lane.b32.xlu0 %v366_v61, %s2787_s24  ;;  %236 = vrot.lane.b32.xlu1 %v137_v62, %s2786_s17  ;;  %v54_v61 = vld [vmem:[%s4359_s0 + $0x90] sm:$0xff]  ;;  %v55_v62 = vld [vmem:[%s4359_s0 + $0x98] sm:$0xff] }
  0x7b   :  { %466 = vrot.lane.b32.xlu2 %v367_v0, %s2787_s24  ;;  %v149_v0 = vld [vmem:[%s4359_s0 + $0x119] sm:$0xff]  ;;  %93 = vst.msk [vmem:[#allocation2 + $0x90] sm:$0xff] %vm74_vm0, %v54_v61 }
  0x7c   :  { %v421_v1 = vpop.permute.xlu0 %420  ;;  %v423_v2 = vpop.permute.xlu1 %422  ;;  %94 = vst.msk [vmem:[#allocation2 + $0x98] sm:$0xff] %vm74_vm0, %v55_v62 }
  0x7d   :  { %535 = vst.msk [vmem:[#allocation2] sm:$0xff] %vm534_vm2, %v421_v1  ;;  %v205_v6 = vpop.permute.xlu2 %204 }
  0x7e   :  { %536 = vst.msk [vmem:[#allocation2 + $0x8] sm:$0xff] %vm534_vm2, %v423_v2 }
  0x7f   :  { %312 = vst.msk [vmem:[#allocation2 + $0x38] sm:$0xff] %vm304_vm1, %v205_v6  ;;  %v56_v6 = vld [vmem:[%s4359_s0 + $0xa0] sm:$0xff] }
  0x80   :  { %95 = vst.msk [vmem:[#allocation2 + $0xa0] sm:$0xff] %vm74_vm0, %v56_v6 }
  0x82   :  { %250 = vrot.lane.b32.xlu0 %v144_v4, %s2786_s17  ;;  %480 = vrot.lane.b32.xlu1 %v374_v5, %s2787_s24  ;;  %v148_v5 = vld [vmem:[%s4359_s0 + $0x111] sm:$0xff] }
  0x83   :  { %238 = vrot.lane.b32.xlu2 %v138_v7, %s2786_s17  ;;  %v150_v7 = vld [vmem:[%s4359_s0 + $0x121] sm:$0xff] }
  0x84   :  { %v574_v8 = vld [vmem:[#allocation2] sm:$0xff]  ;;  %v197_v9 = vpop.permute.xlu0 %196  ;;  %v427_v10 = vpop.permute.xlu1 %426 }
  0x85   :  { %2671 = vmatmul.msk.f32.vlgmr.msra.gmra.mxu0 %vm615_vm3, %v574_v8  ;;  %308 = vst.msk [vmem:[#allocation2 + $0x18] sm:$0xff] %vm304_vm1, %v197_v9  ;;  %v437_v15 = vpop.permute.xlu2 %436  ;;  %v575_v16 = vld [vmem:[#allocation2 + $0x8] sm:$0xff]  ;;  %v380_v9 = vld [vmem:[%s4359_s0 + $0x122] sm:$0xff] }
  0x86   :  { %538 = vst.msk [vmem:[#allocation2 + $0x18] sm:$0xff] %vm534_vm2, %v427_v10 }
  0x8a   :  { %242 = vrot.lane.b32.xlu0 %v140_v13, %s2786_s17  ;;  %468 = vrot.lane.b32.xlu1 %v368_v14, %s2787_s24  ;;  %v57_v13 = vld [vmem:[%s4359_s0 + $0xa8] sm:$0xff]  ;;  %v379_v14 = vld [vmem:[%s4359_s0 + $0x11a] sm:$0xff] }
  0x8b   :  { %472 = vrot.lane.b32.xlu2 %v370_v17, %s2787_s24  ;;  %v381_v17 = vld [vmem:[%s4359_s0 + $0x12a] sm:$0x3]  ;;  %96 = vst.msk [vmem:[#allocation2 + $0xa8] sm:$0xff] %vm74_vm0, %v57_v13 }
  0x8c   :  { %v429_v18 = vpop.permute.xlu0 %428  ;;  %v201_v19 = vpop.permute.xlu1 %200 }
  0x8d   :  { %2672 = vmatmul.msk.f32.gmra.mxu0 %vm615_vm3, %v575_v16  ;;  %539 = vst.msk [vmem:[#allocation2 + $0x20] sm:$0xff] %vm534_vm2, %v429_v18  ;;  %v211_v23 = vpop.permute.xlu2 %210  ;;  %v577_v33 = vld [vmem:[#allocation2 + $0x18] sm:$0xff] }
  0x8e   :  { %310 = vst.msk [vmem:[#allocation2 + $0x28] sm:$0xff] %vm304_vm1, %v201_v19 }
  0x8f   :  { %540 = vst.msk [vmem:[#allocation2 + $0x28] sm:$0xff] %vm534_vm2, %v431_v63  ;;  %v378_v63 = vld [vmem:[%s4359_s0 + $0x112] sm:$0xff] }
  0x90   :  { %315 = vst.msk [vmem:[#allocation2 + $0x50] sm:$0xff] %vm304_vm1, %v211_v23 }
  0x92   :  { %252 = vrot.lane.b32.xlu0 %v145_v21, %s2786_s17  ;;  %482 = vrot.lane.b32.xlu1 %v375_v22, %s2787_s24  ;;  %v59_v21 = vld [vmem:[%s4359_s0 + $0xb8] sm:$0xff] }
  0x93   :  { %240 = vrot.lane.b32.xlu2 %v139_v25, %s2786_s17  ;;  %98 = vst.msk [vmem:[#allocation2 + $0xb8] sm:$0xff] %vm74_vm0, %v59_v21 }
  0x94   :  { %v203_v26 = vpop.permute.xlu0 %202  ;;  %v433_v27 = vpop.permute.xlu1 %432  ;;  %v578_v41 = vld [vmem:[#allocation2 + $0x20] sm:$0xff] }
  0x95   :  { %2673 = vmatmul.msk.f32.gmra.mxu0 %vm615_vm3, %v576_v24  ;;  %311 = vst.msk [vmem:[#allocation2 + $0x30] sm:$0xff] %vm304_vm1, %v203_v26  ;;  %v443_v32 = vpop.permute.xlu2 %442  ;;  %v66_v26 = vld [vmem:[%s4359_s0 + $0xf0] sm:$0xff] }
  0x96   :  { %541 = vst.msk [vmem:[#allocation2 + $0x30] sm:$0xff] %vm534_vm2, %v433_v27  ;;  %v579_v50 = vld [vmem:[#allocation2 + $0x28] sm:$0xff]  ;;  %v151_v27 = vld [vmem:[%s4359_s0 + $0x129] sm:$0x3] }
  0x97   :  { %105 = vst.msk [vmem:[#allocation2 + $0xf0] sm:$0xff] %vm74_vm0, %v66_v26 }
  0x9a   :  { %244 = vrot.lane.b32.xlu0 %v141_v30, %s2786_s17  ;;  %470 = vrot.lane.b32.xlu1 %v369_v31, %s2787_s24 }
  0x9b   :  { %474 = vrot.lane.b32.xlu2 %v371_v34, %s2787_s24 }
  0x9c   :  { %v435_v35 = vpop.permute.xlu0 %434  ;;  %v207_v36 = vpop.permute.xlu1 %206 }
  0x9d   :  { %2674 = vmatmul.msk.f32.gmra.mxu0 %vm615_vm3, %v577_v33  ;;  %542 = vst.msk [vmem:[#allocation2 + $0x38] sm:$0xff] %vm534_vm2, %v435_v35  ;;  %v217_v40 = vpop.permute.xlu2 %216  ;;  %v580_v58 = vld [vmem:[#allocation2 + $0x30] sm:$0xff]  ;;  %v62_v33 = vld [vmem:[%s4359_s0 + $0xd0] sm:$0xff] }
  0x9e   :  { %313 = vst.msk [vmem:[#allocation2 + $0x40] sm:$0xff] %vm304_vm1, %v207_v36 }
  0x9f   :  { %543 = vst.msk [vmem:[#allocation2 + $0x40] sm:$0xff] %vm534_vm2, %v437_v15  ;;  %v58_v15 = vld [vmem:[%s4359_s0 + $0xb0] sm:$0xff] }
  0xa0   :  { %318 = vst.msk [vmem:[#allocation2 + $0x68] sm:$0xff] %vm304_vm1, %v217_v40 }
  0xa1   :  { %97 = vst.msk [vmem:[#allocation2 + $0xb0] sm:$0xff] %vm74_vm0, %v58_v15 }
  0xa2   :  { %254 = vrot.lane.b32.xlu0 %v146_v38, %s2786_s17  ;;  %484 = vrot.lane.b32.xlu1 %v376_v39, %s2787_s24  ;;  %101 = vst.msk [vmem:[#allocation2 + $0xd0] sm:$0xff] %vm74_vm0, %v62_v33  ;;  %v67_v38 = vld [vmem:[%s4359_s0 + $0xf8] sm:$0xff] }
  0xa3   :  { %246 = vrot.lane.b32.xlu2 %v142_v42, %s2786_s17  ;;  %106 = vst.msk [vmem:[#allocation2 + $0xf8] sm:$0xff] %vm74_vm0, %v67_v38 }
  0xa4   :  { %v209_v43 = vpop.permute.xlu0 %208  ;;  %v439_v44 = vpop.permute.xlu1 %438  ;;  %v581_v2 = vld [vmem:[#allocation2 + $0x38] sm:$0xff] }
  0xa5   :  { %2675 = vmatmul.msk.f32.gmra.mxu0 %vm615_vm3, %v578_v41  ;;  %314 = vst.msk [vmem:[#allocation2 + $0x48] sm:$0xff] %vm304_vm1, %v209_v43  ;;  %v449_v49 = vpop.permute.xlu2 %448 }
  0xa6   :  { %544 = vst.msk [vmem:[#allocation2 + $0x48] sm:$0xff] %vm534_vm2, %v439_v44  ;;  %v582_v10 = vld [vmem:[#allocation2 + $0x40] sm:$0xff] }
  0xaa   :  { %476 = vrot.lane.b32.xlu0 %v372_v47, %s2787_s24  ;;  %256 = vrot.lane.b32.xlu1 %v147_v48, %s2786_s17  ;;  %v61_v47 = vld [vmem:[%s4359_s0 + $0xc8] sm:$0xff]  ;;  %v63_v48 = vld [vmem:[%s4359_s0 + $0xd8] sm:$0xff] }
  0xab   :  { %486 = vrot.lane.b32.xlu2 %v377_v51, %s2787_s24  ;;  %100 = vst.msk [vmem:[#allocation2 + $0xc8] sm:$0xff] %vm74_vm0, %v61_v47 }
  0xac   :  { %v441_v52 = vpop.permute.xlu0 %440  ;;  %v213_v53 = vpop.permute.xlu1 %212  ;;  %102 = vst.msk [vmem:[#allocation2 + $0xd8] sm:$0xff] %vm74_vm0, %v63_v48 }
  0xad   :  { %2676 = vmatmul.msk.f32.gmra.mxu0 %vm615_vm3, %v579_v50  ;;  %545 = vst.msk [vmem:[#allocation2 + $0x50] sm:$0xff] %vm534_vm2, %v441_v52  ;;  %v223_v57 = vpop.permute.xlu2 %222  ;;  %v583_v18 = vld [vmem:[#allocation2 + $0x48] sm:$0xff]  ;;  %v68_v50 = vld [vmem:[%s4359_s0 + $0x100] sm:$0xff] }
  0xae   :  { %316 = vst.msk [vmem:[#allocation2 + $0x58] sm:$0xff] %vm304_vm1, %v213_v53 }
  0xaf   :  { %546 = vst.msk [vmem:[#allocation2 + $0x58] sm:$0xff] %vm534_vm2, %v443_v32 }
  0xb0   :  { %321 = vst.msk [vmem:[#allocation2 + $0x80] sm:$0xff] %vm304_vm1, %v223_v57 }
  0xb1   :  { %107 = vst.msk [vmem:[#allocation2 + $0x100] sm:$0xff] %vm74_vm0, %v68_v50 }
  0xb2   :  { %248 = vrot.lane.b32.xlu0 %v143_v55, %s2786_s17  ;;  %478 = vrot.lane.b32.xlu1 %v373_v56, %s2787_s24  ;;  %v64_v55 = vld [vmem:[%s4359_s0 + $0xe0] sm:$0xff] }
  0xb3   :  { %258 = vrot.lane.b32.xlu2 %v148_v5, %s2786_s17  ;;  %103 = vst.msk [vmem:[#allocation2 + $0xe0] sm:$0xff] %vm74_vm0, %v64_v55 }
  0xb4   :  { %v215_v59 = vpop.permute.xlu0 %214  ;;  %v445_v60 = vpop.permute.xlu1 %444  ;;  %v584_v23 = vld [vmem:[#allocation2 + $0x50] sm:$0xff] }
  0xb5   :  { %2677 = vmatmul.msk.f32.gmra.mxu0 %vm615_vm3, %v580_v58  ;;  %317 = vst.msk [vmem:[#allocation2 + $0x60] sm:$0xff] %vm304_vm1, %v215_v59  ;;  %v455_v1 = vpop.permute.xlu2 %454  ;;  %v69_v58 = vld [vmem:[%s4359_s0 + $0x108] sm:$0xff] }
  0xb6   :  { %547 = vst.msk [vmem:[#allocation2 + $0x60] sm:$0xff] %vm534_vm2, %v445_v60  ;;  %v585_v30 = vld [vmem:[#allocation2 + $0x58] sm:$0xff] }
  0xb7   :  { %108 = vst.msk [vmem:[#allocation2 + $0x108] sm:$0xff] %vm74_vm0, %v69_v58 }
  0xba   :  { %488 = vrot.lane.b32.xlu0 %v378_v63, %s2787_s24  ;;  %260 = vrot.lane.b32.xlu1 %v149_v0, %s2786_s17  ;;  %v65_v63 = vld [vmem:[%s4359_s0 + $0xe8] sm:$0xff] }
  0xbb   :  { %490 = vrot.lane.b32.xlu2 %v379_v14, %s2787_s24  ;;  %104 = vst.msk [vmem:[#allocation2 + $0xe8] sm:$0xff] %vm74_vm0, %v65_v63 }
  0xbc   :  { %v447_v3 = vpop.permute.xlu0 %446  ;;  %v219_v4 = vpop.permute.xlu1 %218 }
  0xbd   :  { %2678 = vmatmul.msk.f32.gmra.mxu0 %vm615_vm3, %v581_v2  ;;  %548 = vst.msk [vmem:[#allocation2 + $0x68] sm:$0xff] %vm534_vm2, %v447_v3  ;;  %v229_v8 = vpop.permute.xlu2 %228  ;;  %v586_v35 = vld [vmem:[#allocation2 + $0x60] sm:$0xff] }
  0xbe   :  { %319 = vst.msk [vmem:[#allocation2 + $0x70] sm:$0xff] %vm304_vm1, %v219_v4 }
  0xbf   :  { %549 = vst.msk [vmem:[#allocation2 + $0x70] sm:$0xff] %vm534_vm2, %v449_v49 }
  0xc0   :  { %324 = vst.msk [vmem:[#allocation2 + $0x98] sm:$0xff] %vm304_vm1, %v229_v8 }
  0xc2   :  { %262 = vrot.lane.b32.xlu0 %v150_v7, %s2786_s17  ;;  %492 = vrot.lane.b32.xlu1 %v380_v9, %s2787_s24 }
  0xc3   :  { %264 = vrot.lane.b32.xlu2 %v151_v27, %s2786_s17  ;;  %v71_v27 = vld [vmem:[%s4359_s0 + $0x118] sm:$0xff]  ;;  %s2789_s17 = smov 20  }
  0xc4   :  { %v221_v11 = vpop.permute.xlu0 %220  ;;  %v451_v12 = vpop.permute.xlu1 %450  ;;  %v587_v40 = vld [vmem:[#allocation2 + $0x68] sm:$0xff]  ;;  %110 = vst.msk [vmem:[#allocation2 + $0x118] sm:$0xff] %vm74_vm0, %v71_v27 }
  0xc5   :  { %2679 = vmatmul.msk.f32.gmra.mxu0 %vm615_vm3, %v582_v10  ;;  %320 = vst.msk [vmem:[#allocation2 + $0x78] sm:$0xff] %vm304_vm1, %v221_v11  ;;  %v461_v16 = vpop.permute.xlu2 %460 }
  0xc6   :  { %550 = vst.msk [vmem:[#allocation2 + $0x78] sm:$0xff] %vm534_vm2, %v451_v12  ;;  %v588_v44 = vld [vmem:[#allocation2 + $0x70] sm:$0xff] }
  0xca   :  { %494 = vrot.lane.b32.xlu0 %v381_v17, %s2787_s24  ;;  %s2792_s24 = smov 40  }
  0xcc   :  { %v453_v19 = vpop.permute.xlu0 %452  ;;  %v225_v20 = vpop.permute.xlu1 %224 }
  0xcd   :  { %2680 = vmatmul.msk.f32.gmra.mxu0 %vm615_vm3, %v583_v18  ;;  %551 = vst.msk [vmem:[#allocation2 + $0x80] sm:$0xff] %vm534_vm2, %v453_v19  ;;  %v235_v22 = vpop.permute.xlu2 %234  ;;  %v589_v51 = vld [vmem:[#allocation2 + $0x78] sm:$0xff] }
  0xce   :  { %322 = vst.msk [vmem:[#allocation2 + $0x88] sm:$0xff] %vm304_vm1, %v225_v20 }
  0xcf   :  { %552 = vst.msk [vmem:[#allocation2 + $0x88] sm:$0xff] %vm534_vm2, %v455_v1 }
  0xd0   :  { %327 = vst.msk [vmem:[#allocation2 + $0xb0] sm:$0xff] %vm304_vm1, %v235_v22 }
  0xd4   :  { %v227_v24 = vpop.permute.xlu0 %226  ;;  %v457_v25 = vpop.permute.xlu1 %456  ;;  %v590_v59 = vld [vmem:[#allocation2 + $0x80] sm:$0xff] }
  0xd5   :  { %2681 = vmatmul.msk.f32.gmra.mxu0 %vm615_vm3, %v584_v23  ;;  %323 = vst.msk [vmem:[#allocation2 + $0x90] sm:$0xff] %vm304_vm1, %v227_v24  ;;  %v467_v29 = vpop.permute.xlu2 %466 }
  0xd6   :  { %553 = vst.msk [vmem:[#allocation2 + $0x90] sm:$0xff] %vm534_vm2, %v457_v25  ;;  %v591_v1 = vld [vmem:[#allocation2 + $0x88] sm:$0xff] }
  0xdc   :  { %v459_v31 = vpop.permute.xlu0 %458  ;;  %v231_v32 = vpop.permute.xlu1 %230 }
  0xdd   :  { %2682 = vmatmul.msk.f32.gmra.mxu0 %vm615_vm3, %v585_v30  ;;  %554 = vst.msk [vmem:[#allocation2 + $0x98] sm:$0xff] %vm534_vm2, %v459_v31  ;;  %v239_v34 = vpop.permute.xlu2 %238  ;;  %v592_v9 = vld [vmem:[#allocation2 + $0x90] sm:$0xff] }
  0xde   :  { %325 = vst.msk [vmem:[#allocation2 + $0xa0] sm:$0xff] %vm304_vm1, %v231_v32 }
  0xdf   :  { %555 = vst.msk [vmem:[#allocation2 + $0xa0] sm:$0xff] %vm534_vm2, %v461_v16  ;;  %v70_v16 = vld [vmem:[%s4359_s0 + $0x110] sm:$0xff] }
  0xe0   :  { %329 = vst.msk [vmem:[#allocation2 + $0xc0] sm:$0xff] %vm304_vm1, %v239_v34 }
  0xe1   :  { %109 = vst.msk [vmem:[#allocation2 + $0x110] sm:$0xff] %vm74_vm0, %v70_v16 }
  0xe4   :  { %v233_v36 = vpop.permute.xlu0 %232  ;;  %v463_v37 = vpop.permute.xlu1 %462  ;;  %v593_v17 = vld [vmem:[#allocation2 + $0x98] sm:$0xff] }
  0xe5   :  { %2683 = vmatmul.msk.f32.gmra.mxu0 %vm615_vm3, %v586_v35  ;;  %326 = vst.msk [vmem:[#allocation2 + $0xa8] sm:$0xff] %vm304_vm1, %v233_v36  ;;  %v473_v39 = vpop.permute.xlu2 %472 }
  0xe6   :  { %556 = vst.msk [vmem:[#allocation2 + $0xa8] sm:$0xff] %vm534_vm2, %v463_v37  ;;  %v594_v28 = vld [vmem:[#allocation2 + $0xa0] sm:$0xff] }
  0xec   :  { %v465_v41 = vpop.permute.xlu0 %464  ;;  %v237_v42 = vpop.permute.xlu1 %236 }
  0xed   :  { %2684 = vmatmul.msk.f32.gmra.mxu0 %vm615_vm3, %v587_v40  ;;  %557 = vst.msk [vmem:[#allocation2 + $0xb0] sm:$0xff] %vm534_vm2, %v465_v41  ;;  %v241_v43 = vpop.permute.xlu2 %240  ;;  %v595_v36 = vld [vmem:[#allocation2 + $0xa8] sm:$0xff]  ;;  %v72_v40 = vld [vmem:[%s4359_s0 + $0x120] sm:$0xff] }
  0xee   :  { %328 = vst.msk [vmem:[#allocation2 + $0xb8] sm:$0xff] %vm304_vm1, %v237_v42 }
  0xef   :  { %558 = vst.msk [vmem:[#allocation2 + $0xb8] sm:$0xff] %vm534_vm2, %v467_v29 }
  0xf0   :  { %330 = vst.msk [vmem:[#allocation2 + $0xc8] sm:$0xff] %vm304_vm1, %v241_v43 }
  0xf1   :  { %111 = vst.msk [vmem:[#allocation2 + $0x120] sm:$0xff] %vm74_vm0, %v72_v40  ;;  %vm1302_vm0 = vcmask 238752  }
  0xf4   :  { %v251_v45 = vpop.permute.xlu0 %250  ;;  %v481_v46 = vpop.permute.xlu1 %480 }
  0xf5   :  { %2685 = vmatmul.msk.f32.gmra.mxu0 %vm615_vm3, %v588_v44  ;;  %335 = vst.msk [vmem:[#allocation2 + $0xf0] sm:$0xff] %vm304_vm1, %v251_v45  ;;  %v475_v49 = vpop.permute.xlu2 %474 }
  0xf6   :  { %565 = vst.msk [vmem:[#allocation2 + $0xf0] sm:$0xff] %vm534_vm2, %v481_v46  ;;  %v597_v58 = vld [vmem:[#allocation2 + $0xb8] sm:$0xff] }
  0xfc   :  { %v243_v52 = vpop.permute.xlu0 %242  ;;  %v469_v53 = vpop.permute.xlu1 %468 }
  0xfd   :  { %2686 = vmatmul.msk.f32.gmra.mxu0 %vm615_vm3, %v589_v51  ;;  %331 = vst.msk [vmem:[#allocation2 + $0xd0] sm:$0xff] %vm304_vm1, %v243_v52  ;;  %v604_v54 = vld [vmem:[#allocation2 + $0xf0] sm:$0xff]  ;;  %v247_v56 = vpop.permute.xlu2 %246 }
  0xfe   :  { %559 = vst.msk [vmem:[#allocation2 + $0xc0] sm:$0xff] %vm534_vm2, %v469_v53  ;;  %2701 = vmatmul.msk.f32.vlgmr.msra.gmra.mxu3 %vm615_vm3, %v604_v54  ;;  %v73_v54 = vld [vmem:[%s4359_s0 + $0x128] sm:$0x3] }
  0xff   :  { %561 = vst.msk [vmem:[#allocation2 + $0xd0] sm:$0xff] %vm534_vm2, %v473_v39 }
 0x100   :  { %333 = vst.msk [vmem:[#allocation2 + $0xe0] sm:$0xff] %vm304_vm1, %v247_v56 }
 0x101   :  { %113 = vst.msk [vmem:[#allocation2 + $0x128] sm:$0x3] %vm112_vm5, %v73_v54  ;;  %v1440_v54 = vld [vmem:[%s4361_s2 + $0x8] sm:$0xff]  ;;  %vm1873_vm5 = vcmask 654336  }
 0x102   :  { %v747_v57 = vpop.f32.mrf.mxu0 }
 0x103   :  { %862 = vst.msk [vmem:[#allocation3] sm:$0xff] %vm861_vm4, %v747_v57 }
 0x104   :  { %v253_v60 = vpop.permute.xlu0 %252  ;;  %v483_v61 = vpop.permute.xlu1 %482 }
 0x105   :  { %2687 = vmatmul.msk.f32.gmra.mxu0 %vm615_vm3, %v590_v59  ;;  %336 = vst.msk [vmem:[#allocation2 + $0xf8] sm:$0xff] %vm304_vm1, %v253_v60  ;;  %v487_v13 = vpop.permute.xlu2 %486 }
 0x106   :  { %566 = vst.msk [vmem:[#allocation2 + $0xf8] sm:$0xff] %vm534_vm2, %v483_v61  ;;  %v600_v62 = vld [vmem:[#allocation2 + $0xd0] sm:$0xff] }
 0x107   :  { %2697 = vmatmul.msk.f32.vlgmr.msra.gmra.mxu1 %vm615_vm3, %v600_v62 }
 0x10a   :  { %v750_v0 = vpop.f32.mrf.mxu0 }
 0x10b   :  { %863 = vst.msk [vmem:[#allocation3 + $0x8] sm:$0xff] %vm861_vm4, %v750_v0 }
 0x10c   :  { %v245_v2 = vpop.permute.xlu0 %244  ;;  %v471_v3 = vpop.permute.xlu1 %470 }
 0x10d   :  { %2688 = vmatmul.msk.f32.gmra.mxu0 %vm615_vm3, %v591_v1  ;;  %332 = vst.msk [vmem:[#allocation2 + $0xd8] sm:$0xff] %vm304_vm1, %v245_v2  ;;  %v605_v4 = vld [vmem:[#allocation2 + $0xf8] sm:$0xff]  ;;  %v259_v21 = vpop.permute.xlu2 %258 }
 0x10e   :  { %560 = vst.msk [vmem:[#allocation2 + $0xc8] sm:$0xff] %vm534_vm2, %v471_v3  ;;  %2702 = vmatmul.msk.f32.gmra.mxu3 %vm615_vm3, %v605_v4 }
 0x10f   :  { %562 = vst.msk [vmem:[#allocation2 + $0xd8] sm:$0xff] %vm534_vm2, %v475_v49  ;;  %v596_v49 = vld [vmem:[#allocation2 + $0xb0] sm:$0xff] }
 0x110   :  { %339 = vst.msk [vmem:[#allocation2 + $0x110] sm:$0xff] %vm304_vm1, %v259_v21 }
 0x112   :  { %v901_v5 = vld [vmem:[#allocation3] ss:$2 sm:$0xff]  ;;  %v939_v6 = vld [vmem:[#allocation3 + $0x1] ss:$2 sm:$0xff]  ;;  %v753_v7 = vpop.f32.mrf.mxu0 }
 0x113   :  { %v976_v8 = vmax.f32 %v901_v5, %v939_v6  ;;  %864 = vst.msk [vmem:[#allocation3 + $0x10] sm:$0xff] %vm861_vm4, %v753_v7  ;;  %v598_v5 = vld [vmem:[#allocation2 + $0xc0] sm:$0xff] }
 0x114   :  { %v255_v10 = vpop.permute.xlu0 %254  ;;  %v485_v11 = vpop.permute.xlu1 %484 }
 0x115   :  { %v995_v12 = vmax.f32 %v976_v8, 0.0  ;;  %2689 = vmatmul.msk.f32.gmra.mxu0 %vm615_vm3, %v592_v9  ;;  %337 = vst.msk [vmem:[#allocation2 + $0x100] sm:$0xff] %vm304_vm1, %v255_v10  ;;  %v491_v35 = vpop.permute.xlu2 %490  ;;  %v599_v9 = vld [vmem:[#allocation2 + $0xc8] sm:$0xff] }
 0x116   :  { %567 = vst.msk [vmem:[#allocation2 + $0x100] sm:$0xff] %vm534_vm2, %v485_v11  ;;  %v601_v14 = vld [vmem:[#allocation2 + $0xd8] sm:$0xff] }
 0x117   :  { %1014 = vst.msk [vmem:[#allocation4] sm:$0xff] %vm861_vm4, %v995_v12  ;;  %2698 = vmatmul.msk.f32.gmra.mxu1 %vm615_vm3, %v601_v14 }
 0x11a   :  { %v756_v15 = vpop.f32.mrf.mxu0 }
 0x11b   :  { %865 = vst.msk [vmem:[#allocation3 + $0x18] sm:$0xff] %vm861_vm4, %v756_v15 }
 0x11c   :  { %v477_v18 = vpop.permute.xlu0 %476  ;;  %v257_v19 = vpop.permute.xlu1 %256 }
 0x11d   :  { %2690 = vmatmul.msk.f32.gmra.mxu0 %vm615_vm3, %v593_v17  ;;  %563 = vst.msk [vmem:[#allocation2 + $0xe0] sm:$0xff] %vm534_vm2, %v477_v18  ;;  %v606_v20 = vld [vmem:[#allocation2 + $0x100] sm:$0xff]  ;;  %v265_v55 = vpop.permute.xlu2 %264 }
 0x11e   :  { %338 = vst.msk [vmem:[#allocation2 + $0x108] sm:$0xff] %vm304_vm1, %v257_v19  ;;  %2703 = vmatmul.msk.f32.gmra.mxu3 %vm615_vm3, %v606_v20  ;;  %v1034_v22 = vld [vmem:[#allocation4] sm:$0xff] }
 0x11f   :  { %568 = vst.msk [vmem:[#allocation2 + $0x108] sm:$0xff] %vm534_vm2, %v487_v13 }
 0x120   :  { %1053 = vst.msk [vmem:[#allocation5] sm:$0xff] %vm861_vm4, %v1034_v22 }
 0x121   :  { %343 = vst.msk [vmem:[#allocation2 + $0x128] sm:$0x3] %vm342_vm6, %v265_v55  ;;  %vm1595_vm6 = vcmask 156672  }
 0x122   :  { %v903_v23 = vld [vmem:[#allocation3 + $0x10] ss:$2 sm:$0xff]  ;;  %v941_v24 = vld [vmem:[#allocation3 + $0x11] ss:$2 sm:$0xff]  ;;  %v759_v25 = vpop.f32.mrf.mxu0 }
 0x123   :  { %v977_v26 = vmax.f32 %v903_v23, %v941_v24  ;;  %866 = vst.msk [vmem:[#allocation3 + $0x20] sm:$0xff] %vm861_vm4, %v759_v25 }
 0x124   :  { %v249_v29 = vpop.permute.xlu0 %248  ;;  %v479_v30 = vpop.permute.xlu1 %478  ;;  %v602_v31 = vld [vmem:[#allocation2 + $0xe0] sm:$0xff] }
 0x125   :  { %v996_v32 = vmax.f32 %v977_v26, 0.0  ;;  %2691 = vmatmul.msk.f32.gmra.mxu0 %vm615_vm3, %v594_v28  ;;  %334 = vst.msk [vmem:[#allocation2 + $0xe8] sm:$0xff] %vm304_vm1, %v249_v29  ;;  %2699 = vmatmul.msk.f32.gmra.mxu1 %vm615_vm3, %v602_v31 }
 0x126   :  { %564 = vst.msk [vmem:[#allocation2 + $0xe8] sm:$0xff] %vm534_vm2, %v479_v30  ;;  %v607_v33 = vld [vmem:[#allocation2 + $0x108] sm:$0xff] }
 0x127   :  { %1015 = vst.msk [vmem:[#allocation4 + $0x8] sm:$0xff] %vm861_vm4, %v996_v32  ;;  %2704 = vmatmul.msk.f32.gmra.mxu3 %vm615_vm3, %v607_v33 }
 0x12a   :  { %v762_v34 = vpop.f32.mrf.mxu0 }
 0x12b   :  { %867 = vst.msk [vmem:[#allocation3 + $0x28] sm:$0xff] %vm861_vm4, %v762_v34 }
 0x12c   :  { %v489_v37 = vpop.permute.xlu0 %488  ;;  %v261_v38 = vpop.permute.xlu1 %260 }
 0x12d   :  { %2692 = vmatmul.msk.f32.gmra.mxu0 %vm615_vm3, %v595_v36  ;;  %v603_v39 = vld [vmem:[#allocation2 + $0xe8] sm:$0xff]  ;;  %569 = vst.msk [vmem:[#allocation2 + $0x110] sm:$0xff] %vm534_vm2, %v489_v37 }
 0x12e   :  { %v1304_v41 = vld [vmem:[#allocation4 + $0x3] sm:$0xff]  ;;  %2700 = vmatmul.msk.f32.gmra.mxu1 %vm615_vm3, %v603_v39  ;;  %340 = vst.msk [vmem:[#allocation2 + $0x118] sm:$0xff] %vm304_vm1, %v261_v38 }
 0x12f   :  { %v1188_v42 = vld [vmem:[#allocation4 + $0x2] sm:$0xff]  ;;  %1342 = vrot.lane.b32.xlu0 %v1304_v41, %s2788_s19  ;;  %570 = vst.msk [vmem:[#allocation2 + $0x118] sm:$0xff] %vm534_vm2, %v491_v35 }
 0x130   :  { %v1072_v43 = vld [vmem:[#allocation4 + $0x1] sm:$0xff]  ;;  %1226 = vrot.lane.b32.xlu2 %v1188_v42, %s2789_s17 }
 0x131   :  { %v1035_v44 = vld [vmem:[#allocation4 + $0x8] sm:$0xff]  ;;  %1110 = vrot.lane.b32.xlu1 %v1072_v43, %s2790_s20 }
 0x132   :  { %1054 = vst.msk [vmem:[#allocation5 + $0x8] sm:$0xff] %vm861_vm4, %v1035_v44  ;;  %v905_v45 = vld [vmem:[#allocation3 + $0x20] ss:$2 sm:$0xff]  ;;  %v943_v46 = vld [vmem:[#allocation3 + $0x21] ss:$2 sm:$0xff]  ;;  %v765_v47 = vpop.f32.mrf.mxu0 }
 0x133   :  { %v978_v48 = vmax.f32 %v905_v45, %v943_v46  ;;  %868 = vst.msk [vmem:[#allocation3 + $0x30] sm:$0xff] %vm861_vm4, %v765_v47 }
 0x134   :  { %v608_v50 = vld [vmem:[#allocation2 + $0x110] sm:$0xff]  ;;  %v263_v51 = vpop.permute.xlu0 %262  ;;  %v493_v52 = vpop.permute.xlu1 %492 }
 0x135   :  { %v997_v53 = vmax.f32 %v978_v48, 0.0  ;;  %2693 = vmatmul.msk.f32.gmra.mxu0 %vm615_vm3, %v596_v49  ;;  %2705 = vmatmul.msk.f32.gmra.mxu3 %vm615_vm3, %v608_v50  ;;  %341 = vst.msk [vmem:[#allocation2 + $0x120] sm:$0xff] %vm304_vm1, %v263_v51  ;;  %v1443_v51 = vld [vmem:[%s4361_s2 + $0x20] sm:$0xff]  ;;  %vm1418_vm1 = vcmask 320752  }
 0x136   :  { %571 = vst.msk [vmem:[#allocation2 + $0x120] sm:$0xff] %vm534_vm2, %v493_v52  ;;  %v609_v57 = vld [vmem:[#allocation2 + $0x118] sm:$0xff]  ;;  %1513 = vmatpush.msrb.mxu1 %v1443_v51  ;;  %v1442_v52 = vld [vmem:[%s4361_s2 + $0x18] sm:$0xff]  ;;  %vm1731_vm2 = vcmask 326816  }
 0x137   :  { %1016 = vst.msk [vmem:[#allocation4 + $0x10] sm:$0xff] %vm861_vm4, %v997_v53  ;;  %v1441_v53 = vld [vmem:[%s4361_s2 + $0x10] sm:$0xff] }
 0x138   :  { %1514 = vmatpush.msrb.mxu1 %v1442_v52 }
 0x13a   :  { %v768_v56 = vpop.f32.mrf.mxu0  ;;  %1515 = vmatpush.msrb.mxu1 %v1441_v53 }
 0x13b   :  { %869 = vst.msk [vmem:[#allocation3 + $0x38] sm:$0xff] %vm861_vm4, %v768_v56  ;;  %v1439_v56 = vld [vmem:[%s4361_s2] sm:$0xff]  ;;  %s2791_s2 = smov 60  }
 0x13c   :  { %v495_v59 = vpop.permute.xlu0 %494  ;;  %1516 = vmatpush.msrb.mxu1 %v1440_v54 }
 0x13d   :  { %2694 = vmatmul.msk.f32.gmra.mxu0 %vm615_vm3, %v597_v58  ;;  %2706 = vmatmul.msk.f32.gmra.mxu3 %vm615_vm3, %v609_v57  ;;  %573 = vst.msk [vmem:[#allocation2 + $0x128] sm:$0x3] %vm572_vm7, %v495_v59  ;;  %v610_v3 = vld [vmem:[#allocation2 + $0x120] sm:$0xff]  ;;  %vm1665_vm7 = vcmask 155648  }
 0x13e   :  { %v1305_v60 = vld [vmem:[#allocation4 + $0xb] sm:$0xff]  ;;  %1517 = vmatpush.msrb.mxu1 %v1439_v56 }
 0x13f   :  { %v1189_v61 = vld [vmem:[#allocation4 + $0xa] sm:$0xff]  ;;  %1344 = vrot.lane.b32.xlu0 %v1305_v60, %s2788_s19 }
 0x140   :  { %v1073_v62 = vld [vmem:[#allocation4 + $0x9] sm:$0xff]  ;;  %1228 = vrot.lane.b32.xlu2 %v1189_v61, %s2789_s17 }
 0x141   :  { %v1036_v63 = vld [vmem:[#allocation4 + $0x10] sm:$0xff]  ;;  %1112 = vrot.lane.b32.xlu1 %v1073_v62, %s2790_s20 }
 0x142   :  { %1055 = vst.msk [vmem:[#allocation5 + $0x10] sm:$0xff] %vm861_vm4, %v1036_v63  ;;  %v907_v0 = vld [vmem:[#allocation3 + $0x30] ss:$2 sm:$0xff]  ;;  %v945_v1 = vld [vmem:[#allocation3 + $0x31] ss:$2 sm:$0xff]  ;;  %v771_v2 = vpop.f32.mrf.mxu0 }
 0x143   :  { %v979_v4 = vmax.f32 %v907_v0, %v945_v1  ;;  %870 = vst.msk [vmem:[#allocation3 + $0x40] sm:$0xff] %vm861_vm4, %v771_v2 }
 0x144   :  { %v611_v8 = vld [vmem:[#allocation2 + $0x128] sm:$0x3] }
 0x145   :  { %v998_v6 = vmax.f32 %v979_v4, 0.0  ;;  %2695 = vmatmul.msk.f32.gmra.mxu0 %vm615_vm3, %v598_v5  ;;  %2707 = vmatmul.msk.f32.gmra.mxu3 %vm615_vm3, %v610_v3 }
 0x147   :  { %1017 = vst.msk [vmem:[#allocation4 + $0x18] sm:$0xff] %vm861_vm4, %v998_v6 }
 0x14a   :  { %v774_v7 = vpop.f32.mrf.mxu0 }
 0x14b   :  { %871 = vst.msk [vmem:[#allocation3 + $0x48] sm:$0xff] %vm861_vm4, %v774_v7 }
 0x14d   :  { %2696 = vmatmul.msk.f32.gmra.mxu0 %vm615_vm3, %v599_v9  ;;  %2708 = vmatmul.msk.f32.gmra.mxu3 %vm615_vm3, %v611_v8  ;;  %vm1787_vm3 = vcmask 490816  }
 0x14e   :  { %v1306_v10 = vld [vmem:[#allocation4 + $0x13] sm:$0xff] }
 0x14f   :  { %v1190_v11 = vld [vmem:[#allocation4 + $0x12] sm:$0xff]  ;;  %1346 = vrot.lane.b32.xlu0 %v1306_v10, %s2788_s19 }
 0x150   :  { %v1074_v12 = vld [vmem:[#allocation4 + $0x11] sm:$0xff]  ;;  %1230 = vrot.lane.b32.xlu2 %v1190_v11, %s2789_s17 }
 0x151   :  { %v1037_v13 = vld [vmem:[#allocation4 + $0x18] sm:$0xff]  ;;  %1114 = vrot.lane.b32.xlu1 %v1074_v12, %s2790_s20 }
 0x152   :  { %1056 = vst.msk [vmem:[#allocation5 + $0x18] sm:$0xff] %vm861_vm4, %v1037_v13  ;;  %v909_v14 = vld [vmem:[#allocation3 + $0x40] ss:$2 sm:$0xff]  ;;  %v947_v15 = vld [vmem:[#allocation3 + $0x41] ss:$2 sm:$0xff]  ;;  %v777_v16 = vpop.f32.mrf.mxu0 }
 0x153   :  { %v980_v17 = vmax.f32 %v909_v14, %v947_v15  ;;  %872 = vst.msk [vmem:[#allocation3 + $0x50] sm:$0xff] %vm861_vm4, %v777_v16 }
 0x155   :  { %v999_v18 = vmax.f32 %v980_v17, 0.0 }
 0x157   :  { %1018 = vst.msk [vmem:[#allocation4 + $0x20] sm:$0xff] %vm861_vm4, %v999_v18 }
 0x15a   :  { %v780_v19 = vpop.f32.mrf.mxu0 }
 0x15b   :  { %873 = vst.msk [vmem:[#allocation3 + $0x58] sm:$0xff] %vm861_vm4, %v780_v19 }
 0x15e   :  { %v1307_v20 = vld [vmem:[#allocation4 + $0x1b] sm:$0xff] }
 0x15f   :  { %v1191_v21 = vld [vmem:[#allocation4 + $0x1a] sm:$0xff]  ;;  %1348 = vrot.lane.b32.xlu0 %v1307_v20, %s2788_s19 }
 0x160   :  { %v1075_v22 = vld [vmem:[#allocation4 + $0x19] sm:$0xff]  ;;  %1232 = vrot.lane.b32.xlu2 %v1191_v21, %s2789_s17 }
 0x161   :  { %v1038_v23 = vld [vmem:[#allocation4 + $0x20] sm:$0xff]  ;;  %1116 = vrot.lane.b32.xlu1 %v1075_v22, %s2790_s20 }
 0x162   :  { %1057 = vst.msk [vmem:[#allocation5 + $0x20] sm:$0xff] %vm861_vm4, %v1038_v23  ;;  %v911_v24 = vld [vmem:[#allocation3 + $0x50] ss:$2 sm:$0xff]  ;;  %v949_v25 = vld [vmem:[#allocation3 + $0x51] ss:$2 sm:$0xff]  ;;  %v783_v26 = vpop.f32.mrf.mxu0 }
 0x163   :  { %v981_v27 = vmax.f32 %v911_v24, %v949_v25  ;;  %874 = vst.msk [vmem:[#allocation3 + $0x60] sm:$0xff] %vm861_vm4, %v783_v26 }
 0x165   :  { %v1000_v28 = vmax.f32 %v981_v27, 0.0 }
 0x167   :  { %1019 = vst.msk [vmem:[#allocation4 + $0x28] sm:$0xff] %vm861_vm4, %v1000_v28 }
 0x16a   :  { %v786_v29 = vpop.f32.mrf.mxu0 }
 0x16b   :  { %875 = vst.msk [vmem:[#allocation3 + $0x68] sm:$0xff] %vm861_vm4, %v786_v29 }
 0x16e   :  { %v1308_v30 = vld [vmem:[#allocation4 + $0x23] sm:$0xff] }
 0x16f   :  { %v1192_v31 = vld [vmem:[#allocation4 + $0x22] sm:$0xff]  ;;  %1350 = vrot.lane.b32.xlu0 %v1308_v30, %s2788_s19 }
 0x170   :  { %v1076_v32 = vld [vmem:[#allocation4 + $0x21] sm:$0xff]  ;;  %1234 = vrot.lane.b32.xlu2 %v1192_v31, %s2789_s17 }
 0x171   :  { %v1039_v33 = vld [vmem:[#allocation4 + $0x28] sm:$0xff]  ;;  %1118 = vrot.lane.b32.xlu1 %v1076_v32, %s2790_s20 }
 0x172   :  { %1058 = vst.msk [vmem:[#allocation5 + $0x28] sm:$0xff] %vm861_vm4, %v1039_v33  ;;  %v913_v34 = vld [vmem:[#allocation3 + $0x60] ss:$2 sm:$0xff]  ;;  %v951_v35 = vld [vmem:[#allocation3 + $0x61] ss:$2 sm:$0xff]  ;;  %v789_v36 = vpop.f32.mrf.mxu0 }
 0x173   :  { %v982_v37 = vmax.f32 %v913_v34, %v951_v35  ;;  %876 = vst.msk [vmem:[#allocation3 + $0x70] sm:$0xff] %vm861_vm4, %v789_v36 }
 0x175   :  { %v1001_v38 = vmax.f32 %v982_v37, 0.0 }
 0x177   :  { %1020 = vst.msk [vmem:[#allocation4 + $0x30] sm:$0xff] %vm861_vm4, %v1001_v38 }
 0x17a   :  { %v792_v39 = vpop.f32.mrf.mxu0 }
 0x17b   :  { %877 = vst.msk [vmem:[#allocation3 + $0x78] sm:$0xff] %vm861_vm4, %v792_v39 }
 0x17e   :  { %v1309_v40 = vld [vmem:[#allocation4 + $0x2b] sm:$0xff] }
 0x17f   :  { %v1193_v41 = vld [vmem:[#allocation4 + $0x2a] sm:$0xff]  ;;  %1352 = vrot.lane.b32.xlu0 %v1309_v40, %s2788_s19 }
 0x180   :  { %v1077_v42 = vld [vmem:[#allocation4 + $0x29] sm:$0xff]  ;;  %1236 = vrot.lane.b32.xlu2 %v1193_v41, %s2789_s17 }
 0x181   :  { %v1040_v43 = vld [vmem:[#allocation4 + $0x30] sm:$0xff]  ;;  %1120 = vrot.lane.b32.xlu1 %v1077_v42, %s2790_s20  ;;  %v837_v44 = vpop.f32.mrf.mxu3 }
 0x182   :  { %1059 = vst.msk [vmem:[#allocation5 + $0x30] sm:$0xff] %vm861_vm4, %v1040_v43  ;;  %v915_v45 = vld [vmem:[#allocation3 + $0x70] ss:$2 sm:$0xff]  ;;  %v953_v46 = vld [vmem:[#allocation3 + $0x71] ss:$2 sm:$0xff]  ;;  %v795_v47 = vpop.f32.mrf.mxu0 }
 0x183   :  { %892 = vst.msk [vmem:[#allocation3 + $0xf0] sm:$0xff] %vm861_vm4, %v837_v44  ;;  %v983_v48 = vmax.f32 %v915_v45, %v953_v46 }
 0x184   :  { %878 = vst.msk [vmem:[#allocation3 + $0x80] sm:$0xff] %vm861_vm4, %v795_v47  ;;  %v825_v49 = vpop.f32.mrf.mxu1 }
 0x185   :  { %v1002_v50 = vmax.f32 %v983_v48, 0.0  ;;  %888 = vst.msk [vmem:[#allocation3 + $0xd0] sm:$0xff] %vm861_vm4, %v825_v49 }
 0x187   :  { %1021 = vst.msk [vmem:[#allocation4 + $0x38] sm:$0xff] %vm861_vm4, %v1002_v50 }
 0x18a   :  { %v798_v55 = vpop.f32.mrf.mxu0  ;;  %v1227_v22 = vpop.permute.xlu2 %1226 }
 0x18b   :  { %879 = vst.msk [vmem:[#allocation3 + $0x88] sm:$0xff] %vm861_vm4, %v798_v55 }
 0x18e   :  { %v1310_v57 = vld [vmem:[#allocation4 + $0x33] sm:$0xff] }
 0x18f   :  { %v1194_v58 = vld [vmem:[#allocation4 + $0x32] sm:$0xff]  ;;  %1354 = vrot.lane.b32.xlu0 %v1310_v57, %s2788_s19 }
 0x190   :  { %v1078_v59 = vld [vmem:[#allocation4 + $0x31] sm:$0xff]  ;;  %1238 = vrot.lane.b32.xlu2 %v1194_v58, %s2789_s17 }
 0x191   :  { %v1041_v60 = vld [vmem:[#allocation4 + $0x38] sm:$0xff]  ;;  %1122 = vrot.lane.b32.xlu1 %v1078_v59, %s2790_s20  ;;  %v840_v61 = vpop.f32.mrf.mxu3 }
 0x192   :  { %1060 = vst.msk [vmem:[#allocation5 + $0x38] sm:$0xff] %vm861_vm4, %v1041_v60  ;;  %v917_v62 = vld [vmem:[#allocation3 + $0x80] ss:$2 sm:$0xff]  ;;  %v955_v63 = vld [vmem:[#allocation3 + $0x81] ss:$2 sm:$0xff]  ;;  %v801_v0 = vpop.f32.mrf.mxu0 }
 0x193   :  { %893 = vst.msk [vmem:[#allocation3 + $0xf8] sm:$0xff] %vm861_vm4, %v840_v61  ;;  %v984_v1 = vmax.f32 %v917_v62, %v955_v63 }
 0x194   :  { %880 = vst.msk [vmem:[#allocation3 + $0x90] sm:$0xff] %vm861_vm4, %v801_v0  ;;  %v828_v2 = vpop.f32.mrf.mxu1 }
 0x195   :  { %v1003_v3 = vmax.f32 %v984_v1, 0.0  ;;  %889 = vst.msk [vmem:[#allocation3 + $0xd8] sm:$0xff] %vm861_vm4, %v828_v2 }
 0x197   :  { %1022 = vst.msk [vmem:[#allocation4 + $0x40] sm:$0xff] %vm861_vm4, %v1003_v3 }
 0x19a   :  { %v931_v4 = vld [vmem:[#allocation3 + $0xf0] ss:$2 sm:$0xff]  ;;  %v969_v5 = vld [vmem:[#allocation3 + $0xf1] ss:$2 sm:$0xff]  ;;  %v804_v6 = vpop.f32.mrf.mxu0  ;;  %v1229_v41 = vpop.permute.xlu2 %1228 }
 0x19b   :  { %v991_v7 = vmax.f32 %v931_v4, %v969_v5  ;;  %881 = vst.msk [vmem:[#allocation3 + $0x98] sm:$0xff] %vm861_vm4, %v804_v6 }
 0x19c   :  { %v927_v8 = vld [vmem:[#allocation3 + $0xd0] ss:$2 sm:$0xff]  ;;  %v965_v9 = vld [vmem:[#allocation3 + $0xd1] ss:$2 sm:$0xff] }
 0x19d   :  { %v1010_v10 = vmax.f32 %v991_v7, 0.0  ;;  %v989_v11 = vmax.f32 %v927_v8, %v965_v9 }
 0x19e   :  { %v1311_v12 = vld [vmem:[#allocation4 + $0x3b] sm:$0xff] }
 0x19f   :  { %v1195_v13 = vld [vmem:[#allocation4 + $0x3a] sm:$0xff]  ;;  %1029 = vst.msk [vmem:[#allocation4 + $0x78] sm:$0xff] %vm861_vm4, %v1010_v10  ;;  %1356 = vrot.lane.b32.xlu0 %v1311_v12, %s2788_s19  ;;  %v1008_v15 = vmax.f32 %v989_v11, 0.0 }
 0x1a0   :  { %v1079_v14 = vld [vmem:[#allocation4 + $0x39] sm:$0xff]  ;;  %1240 = vrot.lane.b32.xlu2 %v1195_v13, %s2789_s17 }
 0x1a1   :  { %v1042_v16 = vld [vmem:[#allocation4 + $0x40] sm:$0xff]  ;;  %1124 = vrot.lane.b32.xlu1 %v1079_v14, %s2790_s20  ;;  %1027 = vst.msk [vmem:[#allocation4 + $0x68] sm:$0xff] %vm861_vm4, %v1008_v15  ;;  %v843_v17 = vpop.f32.mrf.mxu3  ;;  %v1343_v25 = vpop.permute.xlu0 %1342 }
 0x1a2   :  { %1061 = vst.msk [vmem:[#allocation5 + $0x40] sm:$0xff] %vm861_vm4, %v1042_v16  ;;  %v919_v18 = vld [vmem:[#allocation3 + $0x90] ss:$2 sm:$0xff]  ;;  %v957_v19 = vld [vmem:[#allocation3 + $0x91] ss:$2 sm:$0xff]  ;;  %v807_v21 = vpop.f32.mrf.mxu0  ;;  %v831_v24 = vpop.f32.mrf.mxu1 }
 0x1a3   :  { %v1111_v20 = vpop.permute.xlu1 %1110  ;;  %894 = vst.msk [vmem:[#allocation3 + $0x100] sm:$0xff] %vm861_vm4, %v843_v17  ;;  %v985_v23 = vmax.f32 %v919_v18, %v957_v19 }
 0x1a4   :  { %1168 = vst.msk [vmem:[#allocation5] sm:$0xff] %vm1167_vm8, %v1111_v20 }
 0x1a5   :  { %1284 = vst.msk [vmem:[#allocation5] sm:$0xff] %vm1283_vm9, %v1227_v22  ;;  %v1004_v26 = vmax.f32 %v985_v23, 0.0 }
 0x1a6   :  { %1400 = vst.msk [vmem:[#allocation5] sm:$0xff] %vm1399_vm10, %v1343_v25  ;;  %v1049_v31 = vld [vmem:[#allocation4 + $0x78] sm:$0xff] }
 0x1a7   :  { %882 = vst.msk [vmem:[#allocation3 + $0xa0] sm:$0xff] %vm861_vm4, %v807_v21 }
 0x1a8   :  { %1023 = vst.msk [vmem:[#allocation4 + $0x48] sm:$0xff] %vm861_vm4, %v1004_v26  ;;  %v1047_v36 = vld [vmem:[#allocation4 + $0x68] sm:$0xff] }
 0x1a9   :  { %890 = vst.msk [vmem:[#allocation3 + $0xe0] sm:$0xff] %vm861_vm4, %v831_v24 }
 0x1aa   :  { %v810_v27 = vpop.f32.mrf.mxu0  ;;  %v846_v28 = vpop.f32.mrf.mxu3  ;;  %1068 = vst.msk [vmem:[#allocation5 + $0x78] sm:$0xff] %vm861_vm4, %v1049_v31 }
 0x1ab   :  { %883 = vst.msk [vmem:[#allocation3 + $0xa8] sm:$0xff] %vm861_vm4, %v810_v27  ;;  %v834_v29 = vpop.f32.mrf.mxu1  ;;  %v1231_v0 = vpop.permute.xlu2 %1230 }
 0x1ac   :  { %891 = vst.msk [vmem:[#allocation3 + $0xe8] sm:$0xff] %vm861_vm4, %v834_v29 }
 0x1ad   :  { %v1420_v30 = vld [vmem:[#allocation5] sm:$0xff]  ;;  %895 = vst.msk [vmem:[#allocation3 + $0x108] sm:$0xff] %vm861_vm4, %v846_v28 }
 0x1ae   :  { %2709 = vmatmul.msk.f32.vlgmr.msrb.gmra.mxu1 %vm1444_vm11, %v1420_v30  ;;  %1066 = vst.msk [vmem:[#allocation5 + $0x68] sm:$0xff] %vm861_vm4, %v1047_v36 }
 0x1af   :  { %v1312_v32 = vld [vmem:[#allocation4 + $0x43] sm:$0xff] }
 0x1b0   :  { %v1196_v33 = vld [vmem:[#allocation4 + $0x42] sm:$0xff]  ;;  %1358 = vrot.lane.b32.xlu0 %v1312_v32, %s2788_s19 }
 0x1b1   :  { %v1080_v34 = vld [vmem:[#allocation4 + $0x41] sm:$0xff]  ;;  %1242 = vrot.lane.b32.xlu2 %v1196_v33, %s2789_s17  ;;  %v1345_v48 = vpop.permute.xlu0 %1344 }
 0x1b2   :  { %v1043_v35 = vld [vmem:[#allocation4 + $0x48] sm:$0xff]  ;;  %1126 = vrot.lane.b32.xlu1 %v1080_v34, %s2790_s20  ;;  %v921_v37 = vld [vmem:[#allocation3 + $0xa0] ss:$2 sm:$0xff]  ;;  %v959_v38 = vld [vmem:[#allocation3 + $0xa1] ss:$2 sm:$0xff]  ;;  %v813_v40 = vpop.f32.mrf.mxu0 }
 0x1b3   :  { %1062 = vst.msk [vmem:[#allocation5 + $0x48] sm:$0xff] %vm861_vm4, %v1043_v35  ;;  %v1113_v39 = vpop.permute.xlu1 %1112  ;;  %v986_v42 = vmax.f32 %v921_v37, %v959_v38  ;;  %v929_v43 = vld [vmem:[#allocation3 + $0xe0] ss:$2 sm:$0xff]  ;;  %v967_v44 = vld [vmem:[#allocation3 + $0xe1] ss:$2 sm:$0xff] }
 0x1b4   :  { %1169 = vst.msk [vmem:[#allocation5 + $0x8] sm:$0xff] %vm1167_vm8, %v1113_v39  ;;  %v990_v45 = vmax.f32 %v929_v43, %v967_v44  ;;  %v933_v46 = vld [vmem:[#allocation3 + $0x100] ss:$2 sm:$0xff]  ;;  %v971_v47 = vld [vmem:[#allocation3 + $0x101] ss:$2 sm:$0xff] }
 0x1b5   :  { %1285 = vst.msk [vmem:[#allocation5 + $0x8] sm:$0xff] %vm1283_vm9, %v1229_v41  ;;  %v1005_v49 = vmax.f32 %v986_v42, 0.0  ;;  %v992_v50 = vmax.f32 %v933_v46, %v971_v47 }
 0x1b6   :  { %1401 = vst.msk [vmem:[#allocation5 + $0x8] sm:$0xff] %vm1399_vm10, %v1345_v48  ;;  %v1009_v51 = vmax.f32 %v990_v45, 0.0 }
 0x1b7   :  { %884 = vst.msk [vmem:[#allocation3 + $0xb0] sm:$0xff] %vm861_vm4, %v813_v40  ;;  %v1011_v52 = vmax.f32 %v992_v50, 0.0 }
 0x1b8   :  { %1024 = vst.msk [vmem:[#allocation4 + $0x50] sm:$0xff] %vm861_vm4, %v1005_v49  ;;  %v849_v53 = vpop.f32.mrf.mxu3 }
 0x1b9   :  { %1028 = vst.msk [vmem:[#allocation4 + $0x70] sm:$0xff] %vm861_vm4, %v1009_v51 }
 0x1ba   :  { %1030 = vst.msk [vmem:[#allocation4 + $0x80] sm:$0xff] %vm861_vm4, %v1011_v52  ;;  %v816_v54 = vpop.f32.mrf.mxu0  ;;  %v1233_v22 = vpop.permute.xlu2 %1232 }
 0x1bb   :  { %896 = vst.msk [vmem:[#allocation3 + $0x110] sm:$0xff] %vm861_vm4, %v849_v53 }
 0x1bc   :  { %885 = vst.msk [vmem:[#allocation3 + $0xb8] sm:$0xff] %vm861_vm4, %v816_v54 }
 0x1bd   :  { %v1421_v55 = vld [vmem:[#allocation5 + $0x8] sm:$0xff] }
 0x1be   :  { %2710 = vmatmul.msk.f32.gmra.mxu1 %vm1444_vm11, %v1421_v55 }
 0x1bf   :  { %v1313_v56 = vld [vmem:[#allocation4 + $0x4b] sm:$0xff] }
 0x1c0   :  { %v1197_v57 = vld [vmem:[#allocation4 + $0x4a] sm:$0xff]  ;;  %1360 = vrot.lane.b32.xlu0 %v1313_v56, %s2788_s19  ;;  %v852_v59 = vpop.f32.mrf.mxu3  ;;  %v1318_v50 = vld [vmem:[#allocation4 + $0x73] sm:$0xff] }
 0x1c1   :  { %v1081_v58 = vld [vmem:[#allocation4 + $0x49] sm:$0xff]  ;;  %1244 = vrot.lane.b32.xlu2 %v1197_v57, %s2789_s17  ;;  %897 = vst.msk [vmem:[#allocation3 + $0x118] sm:$0xff] %vm861_vm4, %v852_v59  ;;  %v1347_v2 = vpop.permute.xlu0 %1346  ;;  %v1050_v13 = vld [vmem:[#allocation4 + $0x80] sm:$0xff]  ;;  %v1202_v51 = vld [vmem:[#allocation4 + $0x72] sm:$0xff] }
 0x1c2   :  { %1128 = vrot.lane.b32.xlu1 %v1081_v58, %s2790_s20  ;;  %v819_v63 = vpop.f32.mrf.mxu0  ;;  %v1044_v4 = vld [vmem:[#allocation4 + $0x50] sm:$0xff]  ;;  %1069 = vst.msk [vmem:[#allocation5 + $0x80] sm:$0xff] %vm861_vm4, %v1050_v13  ;;  %v1319_v54 = vld [vmem:[#allocation4 + $0x7b] sm:$0xff] }
 0x1c3   :  { %v923_v60 = vld [vmem:[#allocation3 + $0xb0] ss:$2 sm:$0xff]  ;;  %v961_v61 = vld [vmem:[#allocation3 + $0xb1] ss:$2 sm:$0xff]  ;;  %v1115_v62 = vpop.permute.xlu1 %1114  ;;  %886 = vst.msk [vmem:[#allocation3 + $0xc0] sm:$0xff] %vm861_vm4, %v819_v63  ;;  %v1048_v9 = vld [vmem:[#allocation4 + $0x70] sm:$0xff] }
 0x1c4   :  { %v987_v1 = vmax.f32 %v923_v60, %v961_v61  ;;  %1170 = vst.msk [vmem:[#allocation5 + $0x10] sm:$0xff] %vm1167_vm8, %v1115_v62  ;;  %v1317_v44 = vld [vmem:[#allocation4 + $0x6b] sm:$0xff]  ;;  %v1203_v55 = vld [vmem:[#allocation4 + $0x7a] sm:$0xff] }
 0x1c5   :  { %1286 = vst.msk [vmem:[#allocation5 + $0x10] sm:$0xff] %vm1283_vm9, %v1231_v0  ;;  %v1201_v45 = vld [vmem:[#allocation4 + $0x6a] sm:$0xff]  ;;  %v1087_v56 = vld [vmem:[#allocation4 + $0x79] sm:$0xff] }
 0x1c6   :  { %v1006_v3 = vmax.f32 %v987_v1, 0.0  ;;  %1402 = vst.msk [vmem:[#allocation5 + $0x10] sm:$0xff] %vm1399_vm10, %v1347_v2  ;;  %v1085_v46 = vld [vmem:[#allocation4 + $0x69] sm:$0xff]  ;;  %v1086_v52 = vld [vmem:[#allocation4 + $0x71] sm:$0xff] }
 0x1c7   :  { %1063 = vst.msk [vmem:[#allocation5 + $0x50] sm:$0xff] %vm861_vm4, %v1044_v4 }
 0x1c8   :  { %1025 = vst.msk [vmem:[#allocation4 + $0x58] sm:$0xff] %vm861_vm4, %v1006_v3  ;;  %v935_v5 = vld [vmem:[#allocation3 + $0x110] ss:$2 sm:$0xff]  ;;  %v973_v6 = vld [vmem:[#allocation3 + $0x111] ss:$2 sm:$0xff]  ;;  %v855_v7 = vpop.f32.mrf.mxu3 }
 0x1c9   :  { %v993_v8 = vmax.f32 %v935_v5, %v973_v6  ;;  %898 = vst.msk [vmem:[#allocation3 + $0x120] sm:$0xff] %vm861_vm4, %v855_v7 }
 0x1ca   :  { %v822_v10 = vpop.f32.mrf.mxu0  ;;  %1067 = vst.msk [vmem:[#allocation5 + $0x70] sm:$0xff] %vm861_vm4, %v1048_v9  ;;  %v1235_v37 = vpop.permute.xlu2 %1234 }
 0x1cb   :  { %887 = vst.msk [vmem:[#allocation3 + $0xc8] sm:$0xff] %vm861_vm4, %v822_v10  ;;  %v1012_v11 = vmax.f32 %v993_v8, 0.0 }
 0x1cd   :  { %v1422_v12 = vld [vmem:[#allocation5 + $0x10] sm:$0xff]  ;;  %1031 = vst.msk [vmem:[#allocation4 + $0x88] sm:$0xff] %vm861_vm4, %v1012_v11 }
 0x1ce   :  { %2711 = vmatmul.msk.f32.gmra.mxu1 %vm1444_vm11, %v1422_v12 }
 0x1cf   :  { %v1314_v14 = vld [vmem:[#allocation4 + $0x53] sm:$0xff] }
 0x1d0   :  { %v1198_v15 = vld [vmem:[#allocation4 + $0x52] sm:$0xff]  ;;  %1362 = vrot.lane.b32.xlu0 %v1314_v14, %s2788_s19  ;;  %v858_v18 = vpop.f32.mrf.mxu3 }
 0x1d1   :  { %v1082_v16 = vld [vmem:[#allocation4 + $0x51] sm:$0xff]  ;;  %1246 = vrot.lane.b32.xlu2 %v1198_v15, %s2789_s17  ;;  %900 = vst.msk [vmem:[#allocation3 + $0x128] sm:$0x3] %vm899_vm12, %v858_v18  ;;  %v1349_v24 = vpop.permute.xlu0 %1348 }
 0x1d2   :  { %v1045_v17 = vld [vmem:[#allocation4 + $0x58] sm:$0xff]  ;;  %1130 = vrot.lane.b32.xlu1 %v1082_v16, %s2790_s20 }
 0x1d3   :  { %1064 = vst.msk [vmem:[#allocation5 + $0x58] sm:$0xff] %vm861_vm4, %v1045_v17  ;;  %v925_v19 = vld [vmem:[#allocation3 + $0xc0] ss:$2 sm:$0xff]  ;;  %v963_v20 = vld [vmem:[#allocation3 + $0xc1] ss:$2 sm:$0xff]  ;;  %v1117_v21 = vpop.permute.xlu1 %1116 }
 0x1d4   :  { %v988_v23 = vmax.f32 %v925_v19, %v963_v20  ;;  %1171 = vst.msk [vmem:[#allocation5 + $0x18] sm:$0xff] %vm1167_vm8, %v1117_v21  ;;  %v1051_v35 = vld [vmem:[#allocation4 + $0x88] sm:$0xff] }
 0x1d5   :  { %1287 = vst.msk [vmem:[#allocation5 + $0x18] sm:$0xff] %vm1283_vm9, %v1233_v22  ;;  %v1320_v60 = vld [vmem:[#allocation4 + $0x83] sm:$0xff] }
 0x1d6   :  { %v1007_v25 = vmax.f32 %v988_v23, 0.0  ;;  %1403 = vst.msk [vmem:[#allocation5 + $0x18] sm:$0xff] %vm1399_vm10, %v1349_v24  ;;  %v1204_v61 = vld [vmem:[#allocation4 + $0x82] sm:$0xff] }
 0x1d7   :  { %1070 = vst.msk [vmem:[#allocation5 + $0x88] sm:$0xff] %vm861_vm4, %v1051_v35  ;;  %v1088_v62 = vld [vmem:[#allocation4 + $0x81] sm:$0xff] }
 0x1d8   :  { %1026 = vst.msk [vmem:[#allocation4 + $0x60] sm:$0xff] %vm861_vm4, %v1007_v25  ;;  %v937_v26 = vld [vmem:[#allocation3 + $0x120] ss:$2 sm:$0x1f] }
 0x1d9   :  { %v975_v27 = vld [vmem:[#allocation3 + $0x121] ss:$2 sm:$0x1f] }
 0x1da   :  { %v994_v28 = vmax.f32 %v937_v26, %v975_v27  ;;  %v1237_v48 = vpop.permute.xlu2 %1236 }
 0x1dc   :  { %v1013_v29 = vmax.f32 %v994_v28, 0.0 }
 0x1dd   :  { %v1423_v30 = vld [vmem:[#allocation5 + $0x18] sm:$0xff] }
 0x1de   :  { %2712 = vmatmul.msk.f32.gmra.mxu1 %vm1444_vm11, %v1423_v30  ;;  %1033 = vst.msk [vmem:[#allocation4 + $0x90] sm:$0x1f] %vm1032_vm13, %v1013_v29  ;;  %vm1953_vm13 = vcmask 324608  }
 0x1df   :  { %v1315_v31 = vld [vmem:[#allocation4 + $0x5b] sm:$0xff]  ;;  %v1316_v40 = vld [vmem:[#allocation4 + $0x63] sm:$0xff] }
 0x1e0   :  { %v1199_v32 = vld [vmem:[#allocation4 + $0x5a] sm:$0xff]  ;;  %1364 = vrot.lane.b32.xlu0 %v1315_v31, %s2788_s19  ;;  %v1200_v41 = vld [vmem:[#allocation4 + $0x62] sm:$0xff] }
 0x1e1   :  { %v1083_v33 = vld [vmem:[#allocation4 + $0x59] sm:$0xff]  ;;  %1248 = vrot.lane.b32.xlu2 %v1199_v32, %s2789_s17  ;;  %v1351_v38 = vpop.permute.xlu0 %1350  ;;  %v1084_v42 = vld [vmem:[#allocation4 + $0x61] sm:$0xff] }
 0x1e2   :  { %1132 = vrot.lane.b32.xlu1 %v1083_v33, %s2790_s20  ;;  %v1046_v34 = vld [vmem:[#allocation4 + $0x60] sm:$0xff] }
 0x1e3   :  { %1065 = vst.msk [vmem:[#allocation5 + $0x60] sm:$0xff] %vm861_vm4, %v1046_v34  ;;  %v1119_v36 = vpop.permute.xlu1 %1118  ;;  %vm1843_vm4 = vcmask 654816  }
 0x1e4   :  { %1172 = vst.msk [vmem:[#allocation5 + $0x20] sm:$0xff] %vm1167_vm8, %v1119_v36 }
 0x1e5   :  { %1288 = vst.msk [vmem:[#allocation5 + $0x20] sm:$0xff] %vm1283_vm9, %v1235_v37  ;;  %v1052_v39 = vld [vmem:[#allocation4 + $0x90] sm:$0x3]  ;;  %v1322_v6 = vld [vmem:[#allocation4 + $0x93] sm:$0x3] }
 0x1e6   :  { %1404 = vst.msk [vmem:[#allocation5 + $0x20] sm:$0xff] %vm1399_vm10, %v1351_v38  ;;  %v1321_v0 = vld [vmem:[#allocation4 + $0x8b] sm:$0xff] }
 0x1e7   :  { %1071 = vst.msk [vmem:[#allocation5 + $0x90] sm:$0x3] %vm899_vm12, %v1052_v39  ;;  %v1205_v1 = vld [vmem:[#allocation4 + $0x8a] sm:$0xff]  ;;  %v1206_v7 = vld [vmem:[#allocation4 + $0x92] sm:$0x3]  ;;  %vm1852_vm12 = vcmask 652768  }
 0x1e8   :  { %1366 = vrot.lane.b32.xlu0 %v1316_v40, %s2788_s19  ;;  %v1089_v2 = vld [vmem:[#allocation4 + $0x89] sm:$0xff]  ;;  %v1090_v8 = vld [vmem:[#allocation4 + $0x91] sm:$0x3] }
 0x1e9   :  { %1250 = vrot.lane.b32.xlu2 %v1200_v41, %s2789_s17 }
 0x1ea   :  { %1134 = vrot.lane.b32.xlu1 %v1084_v42, %s2790_s20  ;;  %v1239_v58 = vpop.permute.xlu2 %1238 }
 0x1ed   :  { %v1424_v43 = vld [vmem:[#allocation5 + $0x20] sm:$0xff] }
 0x1ee   :  { %2713 = vmatmul.msk.f32.gmra.mxu1 %vm1444_vm11, %v1424_v43 }
 0x1f0   :  { %1368 = vrot.lane.b32.xlu0 %v1317_v44, %s2788_s19 }
 0x1f1   :  { %1252 = vrot.lane.b32.xlu2 %v1201_v45, %s2789_s17  ;;  %v1353_v49 = vpop.permute.xlu0 %1352 }
 0x1f2   :  { %1136 = vrot.lane.b32.xlu1 %v1085_v46, %s2790_s20 }
 0x1f3   :  { %v1121_v47 = vpop.permute.xlu1 %1120 }
 0x1f4   :  { %1173 = vst.msk [vmem:[#allocation5 + $0x28] sm:$0xff] %vm1167_vm8, %v1121_v47 }
 0x1f5   :  { %1289 = vst.msk [vmem:[#allocation5 + $0x28] sm:$0xff] %vm1283_vm9, %v1237_v48 }
 0x1f6   :  { %1405 = vst.msk [vmem:[#allocation5 + $0x28] sm:$0xff] %vm1399_vm10, %v1353_v49 }
 0x1f8   :  { %1370 = vrot.lane.b32.xlu0 %v1318_v50, %s2788_s19 }
 0x1f9   :  { %1254 = vrot.lane.b32.xlu2 %v1202_v51, %s2789_s17 }
 0x1fa   :  { %1138 = vrot.lane.b32.xlu1 %v1086_v52, %s2790_s20  ;;  %v1241_v4 = vpop.permute.xlu2 %1240 }
 0x1fd   :  { %v1425_v53 = vld [vmem:[#allocation5 + $0x28] sm:$0xff] }
 0x1fe   :  { %2714 = vmatmul.msk.f32.gmra.mxu1 %vm1444_vm11, %v1425_v53 }
 0x200   :  { %1372 = vrot.lane.b32.xlu0 %v1319_v54, %s2788_s19 }
 0x201   :  { %1256 = vrot.lane.b32.xlu2 %v1203_v55, %s2789_s17  ;;  %v1355_v59 = vpop.permute.xlu0 %1354 }
 0x202   :  { %1140 = vrot.lane.b32.xlu1 %v1087_v56, %s2790_s20 }
 0x203   :  { %v1123_v57 = vpop.permute.xlu1 %1122 }
 0x204   :  { %1174 = vst.msk [vmem:[#allocation5 + $0x30] sm:$0xff] %vm1167_vm8, %v1123_v57 }
 0x205   :  { %1290 = vst.msk [vmem:[#allocation5 + $0x30] sm:$0xff] %vm1283_vm9, %v1239_v58 }
 0x206   :  { %1406 = vst.msk [vmem:[#allocation5 + $0x30] sm:$0xff] %vm1399_vm10, %v1355_v59 }
 0x208   :  { %1374 = vrot.lane.b32.xlu0 %v1320_v60, %s2788_s19 }
 0x209   :  { %1258 = vrot.lane.b32.xlu2 %v1204_v61, %s2789_s17 }
 0x20a   :  { %1142 = vrot.lane.b32.xlu1 %v1088_v62, %s2790_s20 }
 0x20b   :  { %v1243_v11 = vpop.permute.xlu2 %1242 }
 0x20d   :  { %v1426_v63 = vld [vmem:[#allocation5 + $0x30] sm:$0xff] }
 0x20e   :  { %2715 = vmatmul.msk.f32.gmra.mxu1 %vm1444_vm11, %v1426_v63 }
 0x210   :  { %1376 = vrot.lane.b32.xlu0 %v1321_v0, %s2788_s19 }
 0x211   :  { %1260 = vrot.lane.b32.xlu2 %v1205_v1, %s2789_s17  ;;  %v1357_v5 = vpop.permute.xlu0 %1356 }
 0x212   :  { %1144 = vrot.lane.b32.xlu1 %v1089_v2, %s2790_s20 }
 0x213   :  { %v1125_v3 = vpop.permute.xlu1 %1124 }
 0x214   :  { %1175 = vst.msk [vmem:[#allocation5 + $0x38] sm:$0xff] %vm1167_vm8, %v1125_v3 }
 0x215   :  { %1291 = vst.msk [vmem:[#allocation5 + $0x38] sm:$0xff] %vm1283_vm9, %v1241_v4 }
 0x216   :  { %1407 = vst.msk [vmem:[#allocation5 + $0x38] sm:$0xff] %vm1399_vm10, %v1357_v5 }
 0x218   :  { %1378 = vrot.lane.b32.xlu0 %v1322_v6, %s2788_s19 }
 0x219   :  { %1262 = vrot.lane.b32.xlu2 %v1206_v7, %s2789_s17 }
 0x21a   :  { %1146 = vrot.lane.b32.xlu1 %v1090_v8, %s2790_s20 }
 0x21b   :  { %v1245_v16 = vpop.permute.xlu2 %1244 }
 0x21d   :  { %v1427_v9 = vld [vmem:[#allocation5 + $0x38] sm:$0xff] }
 0x21e   :  { %2716 = vmatmul.msk.f32.gmra.mxu1 %vm1444_vm11, %v1427_v9 }
 0x222   :  { %v1359_v12 = vpop.permute.xlu0 %1358 }
 0x224   :  { %v1127_v10 = vpop.permute.xlu1 %1126 }
 0x225   :  { %1176 = vst.msk [vmem:[#allocation5 + $0x40] sm:$0xff] %vm1167_vm8, %v1127_v10 }
 0x226   :  { %1292 = vst.msk [vmem:[#allocation5 + $0x40] sm:$0xff] %vm1283_vm9, %v1243_v11 }
 0x227   :  { %1408 = vst.msk [vmem:[#allocation5 + $0x40] sm:$0xff] %vm1399_vm10, %v1359_v12 }
 0x22b   :  { %v1519_v13 = vpop.f32.mrf.mxu1  ;;  %v1247_v20 = vpop.permute.xlu2 %1246 }
 0x22c   :  { %1577 = vst.msk [vmem:[#allocation6] sm:$0xff] %vm1576_vm14, %v1519_v13 }
 0x22e   :  { %v1428_v14 = vld [vmem:[#allocation5 + $0x40] sm:$0xff] }
 0x22f   :  { %2717 = vmatmul.msk.f32.gmra.mxu1 %vm1444_vm11, %v1428_v14 }
 0x232   :  { %v1361_v17 = vpop.permute.xlu0 %1360 }
 0x234   :  { %v1129_v15 = vpop.permute.xlu1 %1128 }
 0x235   :  { %1177 = vst.msk [vmem:[#allocation5 + $0x48] sm:$0xff] %vm1167_vm8, %v1129_v15 }
 0x236   :  { %1293 = vst.msk [vmem:[#allocation5 + $0x48] sm:$0xff] %vm1283_vm9, %v1245_v16 }
 0x237   :  { %1409 = vst.msk [vmem:[#allocation5 + $0x48] sm:$0xff] %vm1399_vm10, %v1361_v17 }
 0x23b   :  { %v1522_v18 = vpop.f32.mrf.mxu1  ;;  %v1249_v27 = vpop.permute.xlu2 %1248 }
 0x23c   :  { %1578 = vst.msk [vmem:[#allocation6 + $0x8] sm:$0xff] %vm1576_vm14, %v1522_v18 }
 0x23e   :  { %v1429_v19 = vld [vmem:[#allocation5 + $0x48] sm:$0xff] }
 0x23f   :  { %2718 = vmatmul.msk.f32.gmra.mxu1 %vm1444_vm11, %v1429_v19 }
 0x242   :  { %v1363_v25 = vpop.permute.xlu0 %1362 }
 0x243   :  { %v1597_v21 = vld [vmem:[#allocation6] ss:$2 sm:$0xff]  ;;  %v1617_v22 = vld [vmem:[#allocation6 + $0x1] ss:$2 sm:$0xff]  ;;  %v1251_v31 = vpop.permute.xlu2 %1250 }
 0x244   :  { %v1131_v23 = vpop.permute.xlu1 %1130  ;;  %v1636_v24 = vmax.f32 %v1597_v21, %v1617_v22 }
 0x245   :  { %1178 = vst.msk [vmem:[#allocation5 + $0x50] sm:$0xff] %vm1167_vm8, %v1131_v23 }
 0x246   :  { %1294 = vst.msk [vmem:[#allocation5 + $0x50] sm:$0xff] %vm1283_vm9, %v1247_v20  ;;  %v1646_v26 = vmax.f32 %v1636_v24, 0.0 }
 0x247   :  { %1410 = vst.msk [vmem:[#allocation5 + $0x50] sm:$0xff] %vm1399_vm10, %v1363_v25 }
 0x248   :  { %1656 = vst.msk [vmem:[#allocation7] sm:$0xff] %vm1576_vm14, %v1646_v26 }
 0x24b   :  { %v1525_v28 = vpop.f32.mrf.mxu1  ;;  %v1253_v34 = vpop.permute.xlu2 %1252 }
 0x24c   :  { %1579 = vst.msk [vmem:[#allocation6 + $0x10] sm:$0xff] %vm1576_vm14, %v1525_v28  ;;  %v1872_v28 = vld [vmem:[%s4362_s3 + $0x48] sm:$0xff] }
 0x24d   :  { %1907 = vmatpush.msra.mxu2 %v1872_v28 }
 0x24e   :  { %v1430_v29 = vld [vmem:[#allocation5 + $0x50] sm:$0xff] }
 0x24f   :  { %2719 = vmatmul.msk.f32.gmra.mxu1 %vm1444_vm11, %v1430_v29  ;;  %v1667_v30 = vld [vmem:[#allocation7] sm:$0xff] }
 0x250   :  { %1676 = vst.msk [vmem:[#allocation8] sm:$0xff] %vm1576_vm14, %v1667_v30 }
 0x252   :  { %v1365_v32 = vpop.permute.xlu0 %1364 }
 0x253   :  { %v1255_v44 = vpop.permute.xlu2 %1254 }
 0x254   :  { %v1133_v33 = vpop.permute.xlu1 %1132 }
 0x255   :  { %1179 = vst.msk [vmem:[#allocation5 + $0x58] sm:$0xff] %vm1167_vm8, %v1133_v33 }
 0x256   :  { %1295 = vst.msk [vmem:[#allocation5 + $0x58] sm:$0xff] %vm1283_vm9, %v1249_v27 }
 0x257   :  { %1411 = vst.msk [vmem:[#allocation5 + $0x58] sm:$0xff] %vm1399_vm10, %v1365_v32  ;;  %v1871_v32 = vld [vmem:[%s4362_s3 + $0x40] sm:$0xff] }
 0x258   :  { %1908 = vmatpush.msra.mxu2 %v1871_v32 }
 0x25a   :  { %v1367_v35 = vpop.permute.xlu0 %1366 }
 0x25b   :  { %v1528_v36 = vpop.f32.mrf.mxu1  ;;  %v1257_v51 = vpop.permute.xlu2 %1256 }
 0x25c   :  { %v1135_v37 = vpop.permute.xlu1 %1134  ;;  %1580 = vst.msk [vmem:[#allocation6 + $0x18] sm:$0xff] %vm1576_vm14, %v1528_v36  ;;  %v1869_v36 = vld [vmem:[%s4362_s3 + $0x30] sm:$0xff] }
 0x25d   :  { %1180 = vst.msk [vmem:[#allocation5 + $0x60] sm:$0xff] %vm1167_vm8, %v1135_v37  ;;  %v1868_v37 = vld [vmem:[%s4362_s3 + $0x28] sm:$0xff] }
 0x25e   :  { %v1431_v38 = vld [vmem:[#allocation5 + $0x58] sm:$0xff]  ;;  %1296 = vst.msk [vmem:[#allocation5 + $0x60] sm:$0xff] %vm1283_vm9, %v1251_v31 }
 0x25f   :  { %2720 = vmatmul.msk.f32.gmra.mxu1 %vm1444_vm11, %v1431_v38  ;;  %1412 = vst.msk [vmem:[#allocation5 + $0x60] sm:$0xff] %vm1399_vm10, %v1367_v35  ;;  %v1867_v38 = vld [vmem:[%s4362_s3 + $0x20] sm:$0xff] }
 0x262   :  { %v1369_v39 = vpop.permute.xlu0 %1368 }
 0x263   :  { %v1599_v40 = vld [vmem:[#allocation6 + $0x10] ss:$2 sm:$0xff]  ;;  %v1619_v41 = vld [vmem:[#allocation6 + $0x11] ss:$2 sm:$0xff]  ;;  %v1259_v59 = vpop.permute.xlu2 %1258 }
 0x264   :  { %v1137_v42 = vpop.permute.xlu1 %1136  ;;  %v1637_v43 = vmax.f32 %v1599_v40, %v1619_v41  ;;  %v1866_v40 = vld [vmem:[%s4362_s3 + $0x18] sm:$0xff]  ;;  %v1865_v41 = vld [vmem:[%s4362_s3 + $0x10] sm:$0xff] }
 0x265   :  { %1181 = vst.msk [vmem:[#allocation5 + $0x68] sm:$0xff] %vm1167_vm8, %v1137_v42 }
 0x266   :  { %1297 = vst.msk [vmem:[#allocation5 + $0x68] sm:$0xff] %vm1283_vm9, %v1253_v34  ;;  %v1647_v45 = vmax.f32 %v1637_v43, 0.0  ;;  %v1432_v46 = vld [vmem:[#allocation5 + $0x60] sm:$0xff]  ;;  %v1870_v34 = vld [vmem:[%s4362_s3 + $0x38] sm:$0xff] }
 0x267   :  { %1413 = vst.msk [vmem:[#allocation5 + $0x68] sm:$0xff] %vm1399_vm10, %v1369_v39  ;;  %2721 = vmatmul.msk.f32.gmra.mxu1 %vm1444_vm11, %v1432_v46  ;;  %1909 = vmatpush.msra.mxu2 %v1870_v34 }
 0x268   :  { %1657 = vst.msk [vmem:[#allocation7 + $0x8] sm:$0xff] %vm1576_vm14, %v1647_v45  ;;  %v1864_v45 = vld [vmem:[%s4362_s3 + $0x8] sm:$0xff] }
 0x269   :  { %1910 = vmatpush.msra.mxu2 %v1869_v36 }
 0x26a   :  { %v1371_v47 = vpop.permute.xlu0 %1370 }
 0x26b   :  { %v1531_v48 = vpop.f32.mrf.mxu1  ;;  %v1261_v0 = vpop.permute.xlu2 %1260  ;;  %1911 = vmatpush.msra.mxu2 %v1868_v37 }
 0x26c   :  { %v1139_v49 = vpop.permute.xlu1 %1138  ;;  %1581 = vst.msk [vmem:[#allocation6 + $0x20] sm:$0xff] %vm1576_vm14, %v1531_v48 }
 0x26d   :  { %1182 = vst.msk [vmem:[#allocation5 + $0x70] sm:$0xff] %vm1167_vm8, %v1139_v49  ;;  %1912 = vmatpush.msra.mxu2 %v1867_v38 }
 0x26e   :  { %v1433_v50 = vld [vmem:[#allocation5 + $0x68] sm:$0xff]  ;;  %1298 = vst.msk [vmem:[#allocation5 + $0x70] sm:$0xff] %vm1283_vm9, %v1255_v44 }
 0x26f   :  { %1414 = vst.msk [vmem:[#allocation5 + $0x70] sm:$0xff] %vm1399_vm10, %v1371_v47  ;;  %2722 = vmatmul.msk.f32.gmra.mxu1 %vm1444_vm11, %v1433_v50  ;;  %v1798_v52 = vld [vmem:[#allocation7 + $0x3] sm:$0xff]  ;;  %1913 = vmatpush.msra.mxu2 %v1866_v40  ;;  %v1863_v47 = vld [vmem:[%s4362_s3] sm:$0xff]  ;;  %s2794_s3 = smov 64  }
 0x270   :  { %v1742_v53 = vld [vmem:[#allocation7 + $0x2] sm:$0xff]  ;;  %1816 = vrot.lane.b32.xlu0 %v1798_v52, %s2791_s2 }
 0x271   :  { %v1686_v54 = vld [vmem:[#allocation7 + $0x1] sm:$0xff]  ;;  %1760 = vrot.lane.b32.xlu2 %v1742_v53, %s2792_s24  ;;  %1914 = vmatpush.msra.mxu2 %v1865_v41 }
 0x272   :  { %v1668_v55 = vld [vmem:[#allocation7 + $0x8] sm:$0xff]  ;;  %1704 = vrot.lane.b32.xlu1 %v1686_v54, %s2789_s17  ;;  %v1373_v56 = vpop.permute.xlu0 %1372 }
 0x273   :  { %1677 = vst.msk [vmem:[#allocation8 + $0x8] sm:$0xff] %vm1576_vm14, %v1668_v55  ;;  %v1263_v10 = vpop.permute.xlu2 %1262  ;;  %1915 = vmatpush.msra.mxu2 %v1864_v45 }
 0x274   :  { %v1141_v57 = vpop.permute.xlu1 %1140 }
 0x275   :  { %1183 = vst.msk [vmem:[#allocation5 + $0x78] sm:$0xff] %vm1167_vm8, %v1141_v57  ;;  %1916 = vmatpush.msra.mxu2 %v1863_v47 }
 0x276   :  { %1299 = vst.msk [vmem:[#allocation5 + $0x78] sm:$0xff] %vm1283_vm9, %v1257_v51  ;;  %v1434_v58 = vld [vmem:[#allocation5 + $0x70] sm:$0xff] }
 0x277   :  { %1415 = vst.msk [vmem:[#allocation5 + $0x78] sm:$0xff] %vm1399_vm10, %v1373_v56  ;;  %2723 = vmatmul.msk.f32.gmra.mxu1 %vm1444_vm11, %v1434_v58 }
 0x27a   :  { %v1375_v60 = vpop.permute.xlu0 %1374 }
 0x27b   :  { %v1534_v61 = vpop.f32.mrf.mxu1 }
 0x27c   :  { %v1143_v62 = vpop.permute.xlu1 %1142  ;;  %1582 = vst.msk [vmem:[#allocation6 + $0x28] sm:$0xff] %vm1576_vm14, %v1534_v61 }
 0x27d   :  { %1184 = vst.msk [vmem:[#allocation5 + $0x80] sm:$0xff] %vm1167_vm8, %v1143_v62 }
 0x27e   :  { %v1435_v63 = vld [vmem:[#allocation5 + $0x78] sm:$0xff]  ;;  %1300 = vst.msk [vmem:[#allocation5 + $0x80] sm:$0xff] %vm1283_vm9, %v1259_v59 }
 0x27f   :  { %1416 = vst.msk [vmem:[#allocation5 + $0x80] sm:$0xff] %vm1399_vm10, %v1375_v60  ;;  %2724 = vmatmul.msk.f32.gmra.mxu1 %vm1444_vm11, %v1435_v63 }
 0x282   :  { %v1377_v5 = vpop.permute.xlu0 %1376 }
 0x283   :  { %v1601_v1 = vld [vmem:[#allocation6 + $0x20] ss:$2 sm:$0xff]  ;;  %v1621_v2 = vld [vmem:[#allocation6 + $0x21] ss:$2 sm:$0xff] }
 0x284   :  { %v1145_v3 = vpop.permute.xlu1 %1144  ;;  %v1638_v4 = vmax.f32 %v1601_v1, %v1621_v2 }
 0x285   :  { %1185 = vst.msk [vmem:[#allocation5 + $0x88] sm:$0xff] %vm1167_vm8, %v1145_v3  ;;  %vm1684_vm8 = vcmask 160768  }
 0x286   :  { %1301 = vst.msk [vmem:[#allocation5 + $0x88] sm:$0xff] %vm1283_vm9, %v1261_v0  ;;  %v1648_v6 = vmax.f32 %v1638_v4, 0.0  ;;  %v1436_v7 = vld [vmem:[#allocation5 + $0x80] sm:$0xff]  ;;  %vm1740_vm9 = vcmask 324768  }
 0x287   :  { %1417 = vst.msk [vmem:[#allocation5 + $0x88] sm:$0xff] %vm1399_vm10, %v1377_v5  ;;  %2725 = vmatmul.msk.f32.gmra.mxu1 %vm1444_vm11, %v1436_v7  ;;  %vm1796_vm10 = vcmask 488768  }
 0x288   :  { %1658 = vst.msk [vmem:[#allocation7 + $0x10] sm:$0xff] %vm1576_vm14, %v1648_v6 }
 0x28a   :  { %v1379_v12 = vpop.permute.xlu0 %1378 }
 0x28b   :  { %v1537_v8 = vpop.f32.mrf.mxu1 }
 0x28c   :  { %v1147_v9 = vpop.permute.xlu1 %1146  ;;  %1583 = vst.msk [vmem:[#allocation6 + $0x30] sm:$0xff] %vm1576_vm14, %v1537_v8 }
 0x28d   :  { %1187 = vst.msk [vmem:[#allocation5 + $0x90] sm:$0x3] %vm1186_vm15, %v1147_v9  ;;  %vm2016_vm15 = vcmask 285696  }
 0x28e   :  { %v1437_v11 = vld [vmem:[#allocation5 + $0x88] sm:$0xff]  ;;  %1303 = vst.msk [vmem:[#allocation5 + $0x90] sm:$0x3] %vm1302_vm0, %v1263_v10  ;;  %vm2033_vm0 = vcmask 803328  }
 0x28f   :  { %1419 = vst.msk [vmem:[#allocation5 + $0x90] sm:$0x3] %vm1418_vm1, %v1379_v12  ;;  %2726 = vmatmul.msk.f32.gmra.mxu1 %vm1444_vm11, %v1437_v11  ;;  %v1799_v13 = vld [vmem:[#allocation7 + $0xb] sm:$0xff]  ;;  %vm2594_vm1 = vcmask 1045504  }
 0x290   :  { %v1743_v14 = vld [vmem:[#allocation7 + $0xa] sm:$0xff]  ;;  %1818 = vrot.lane.b32.xlu0 %v1799_v13, %s2791_s2 }
 0x291   :  { %v1687_v15 = vld [vmem:[#allocation7 + $0x9] sm:$0xff]  ;;  %1762 = vrot.lane.b32.xlu2 %v1743_v14, %s2792_s24 }
 0x292   :  { %v1669_v16 = vld [vmem:[#allocation7 + $0x10] sm:$0xff]  ;;  %1706 = vrot.lane.b32.xlu1 %v1687_v15, %s2789_s17 }
 0x293   :  { %1678 = vst.msk [vmem:[#allocation8 + $0x10] sm:$0xff] %vm1576_vm14, %v1669_v16 }
 0x296   :  { %v1438_v17 = vld [vmem:[#allocation5 + $0x90] sm:$0x3] }
 0x297   :  { %2727 = vmatmul.msk.f32.gmra.mxu1 %vm1444_vm11, %v1438_v17 }
 0x29b   :  { %v1540_v18 = vpop.f32.mrf.mxu1 }
 0x29c   :  { %1584 = vst.msk [vmem:[#allocation6 + $0x38] sm:$0xff] %vm1576_vm14, %v1540_v18 }
 0x2a3   :  { %v1603_v19 = vld [vmem:[#allocation6 + $0x30] ss:$2 sm:$0xff]  ;;  %v1623_v20 = vld [vmem:[#allocation6 + $0x31] ss:$2 sm:$0xff] }
 0x2a4   :  { %v1639_v21 = vmax.f32 %v1603_v19, %v1623_v20 }
 0x2a6   :  { %v1649_v22 = vmax.f32 %v1639_v21, 0.0 }
 0x2a8   :  { %1659 = vst.msk [vmem:[#allocation7 + $0x18] sm:$0xff] %vm1576_vm14, %v1649_v22 }
 0x2ac   :  { %v1543_v23 = vpop.f32.mrf.mxu1 }
 0x2ad   :  { %1585 = vst.msk [vmem:[#allocation6 + $0x40] sm:$0xff] %vm1576_vm14, %v1543_v23 }
 0x2af   :  { %v1800_v24 = vld [vmem:[#allocation7 + $0x13] sm:$0xff] }
 0x2b0   :  { %v1744_v25 = vld [vmem:[#allocation7 + $0x12] sm:$0xff]  ;;  %1820 = vrot.lane.b32.xlu0 %v1800_v24, %s2791_s2 }
 0x2b1   :  { %v1688_v26 = vld [vmem:[#allocation7 + $0x11] sm:$0xff]  ;;  %1764 = vrot.lane.b32.xlu2 %v1744_v25, %s2792_s24 }
 0x2b2   :  { %v1670_v27 = vld [vmem:[#allocation7 + $0x18] sm:$0xff]  ;;  %1708 = vrot.lane.b32.xlu1 %v1688_v26, %s2789_s17 }
 0x2b3   :  { %1679 = vst.msk [vmem:[#allocation8 + $0x18] sm:$0xff] %vm1576_vm14, %v1670_v27 }
 0x2bc   :  { %v1546_v29 = vpop.f32.mrf.mxu1 }
 0x2bd   :  { %1586 = vst.msk [vmem:[#allocation6 + $0x48] sm:$0xff] %vm1576_vm14, %v1546_v29 }
 0x2c4   :  { %v1605_v30 = vld [vmem:[#allocation6 + $0x40] ss:$2 sm:$0xff]  ;;  %v1625_v31 = vld [vmem:[#allocation6 + $0x41] ss:$2 sm:$0xff] }
 0x2c5   :  { %v1640_v33 = vmax.f32 %v1605_v30, %v1625_v31 }
 0x2c7   :  { %v1650_v35 = vmax.f32 %v1640_v33, 0.0 }
 0x2c9   :  { %1660 = vst.msk [vmem:[#allocation7 + $0x20] sm:$0xff] %vm1576_vm14, %v1650_v35 }
 0x2cb   :  { %v1761_v52 = vpop.permute.xlu2 %1760 }
 0x2cc   :  { %v1549_v39 = vpop.f32.mrf.mxu1 }
 0x2cd   :  { %1587 = vst.msk [vmem:[#allocation6 + $0x50] sm:$0xff] %vm1576_vm14, %v1549_v39 }
 0x2d0   :  { %v1801_v42 = vld [vmem:[#allocation7 + $0x1b] sm:$0xff] }
 0x2d1   :  { %v1745_v43 = vld [vmem:[#allocation7 + $0x1a] sm:$0xff]  ;;  %1822 = vrot.lane.b32.xlu0 %v1801_v42, %s2791_s2 }
 0x2d2   :  { %v1689_v44 = vld [vmem:[#allocation7 + $0x19] sm:$0xff]  ;;  %1766 = vrot.lane.b32.xlu2 %v1745_v43, %s2792_s24 }
 0x2d3   :  { %v1671_v46 = vld [vmem:[#allocation7 + $0x20] sm:$0xff]  ;;  %1710 = vrot.lane.b32.xlu1 %v1689_v44, %s2789_s17 }
 0x2d4   :  { %1680 = vst.msk [vmem:[#allocation8 + $0x20] sm:$0xff] %vm1576_vm14, %v1671_v46 }
 0x2dc   :  { %v1552_v48 = vpop.f32.mrf.mxu1 }
 0x2dd   :  { %1588 = vst.msk [vmem:[#allocation6 + $0x58] sm:$0xff] %vm1576_vm14, %v1552_v48 }
 0x2e2   :  { %v1817_v55 = vpop.permute.xlu0 %1816 }
 0x2e4   :  { %v1607_v49 = vld [vmem:[#allocation6 + $0x50] ss:$2 sm:$0xff]  ;;  %v1627_v50 = vld [vmem:[#allocation6 + $0x51] ss:$2 sm:$0xff]  ;;  %v1705_v51 = vpop.permute.xlu1 %1704  ;;  %v1555_v54 = vpop.f32.mrf.mxu1 }
 0x2e5   :  { %v1641_v53 = vmax.f32 %v1607_v49, %v1627_v50  ;;  %1732 = vst.msk [vmem:[#allocation8] sm:$0xff] %vm1731_vm2, %v1705_v51 }
 0x2e6   :  { %1788 = vst.msk [vmem:[#allocation8] sm:$0xff] %vm1787_vm3, %v1761_v52 }
 0x2e7   :  { %v1651_v56 = vmax.f32 %v1641_v53, 0.0  ;;  %1844 = vst.msk [vmem:[#allocation8] sm:$0xff] %vm1843_vm4, %v1817_v55 }
 0x2e8   :  { %1589 = vst.msk [vmem:[#allocation6 + $0x60] sm:$0xff] %vm1576_vm14, %v1555_v54 }
 0x2e9   :  { %1661 = vst.msk [vmem:[#allocation7 + $0x28] sm:$0xff] %vm1576_vm14, %v1651_v56 }
 0x2eb   :  { %v1763_v10 = vpop.permute.xlu2 %1762 }
 0x2ec   :  { %v1558_v57 = vpop.f32.mrf.mxu1 }
 0x2ed   :  { %1590 = vst.msk [vmem:[#allocation6 + $0x68] sm:$0xff] %vm1576_vm14, %v1558_v57 }
 0x2ee   :  { %v1854_v58 = vld [vmem:[#allocation8] sm:$0xff] }
 0x2ef   :  { %2728 = vmatmul.msk.f32.vlgmr.msra.gmra.mxu2 %vm1873_vm5, %v1854_v58 }
 0x2f0   :  { %v1802_v59 = vld [vmem:[#allocation7 + $0x23] sm:$0xff] }
 0x2f1   :  { %v1746_v60 = vld [vmem:[#allocation7 + $0x22] sm:$0xff]  ;;  %1824 = vrot.lane.b32.xlu0 %v1802_v59, %s2791_s2 }
 0x2f2   :  { %v1690_v61 = vld [vmem:[#allocation7 + $0x21] sm:$0xff]  ;;  %1768 = vrot.lane.b32.xlu2 %v1746_v60, %s2792_s24 }
 0x2f3   :  { %v1672_v62 = vld [vmem:[#allocation7 + $0x28] sm:$0xff]  ;;  %1712 = vrot.lane.b32.xlu1 %v1690_v61, %s2789_s17 }
 0x2f4   :  { %1681 = vst.msk [vmem:[#allocation8 + $0x28] sm:$0xff] %vm1576_vm14, %v1672_v62  ;;  %v1609_v63 = vld [vmem:[#allocation6 + $0x60] ss:$2 sm:$0xff]  ;;  %v1629_v0 = vld [vmem:[#allocation6 + $0x61] ss:$2 sm:$0xff]  ;;  %v1561_v1 = vpop.f32.mrf.mxu1 }
 0x2f5   :  { %v1642_v2 = vmax.f32 %v1609_v63, %v1629_v0  ;;  %1591 = vst.msk [vmem:[#allocation6 + $0x70] sm:$0xff] %vm1576_vm14, %v1561_v1 }
 0x2f7   :  { %v1652_v3 = vmax.f32 %v1642_v2, 0.0 }
 0x2f9   :  { %1662 = vst.msk [vmem:[#allocation7 + $0x30] sm:$0xff] %vm1576_vm14, %v1652_v3 }
 0x2fc   :  { %v1564_v4 = vpop.f32.mrf.mxu1 }
 0x2fd   :  { %1592 = vst.msk [vmem:[#allocation6 + $0x78] sm:$0xff] %vm1576_vm14, %v1564_v4 }
 0x300   :  { %v1803_v5 = vld [vmem:[#allocation7 + $0x2b] sm:$0xff] }
 0x301   :  { %v1747_v6 = vld [vmem:[#allocation7 + $0x2a] sm:$0xff]  ;;  %1826 = vrot.lane.b32.xlu0 %v1803_v5, %s2791_s2 }
 0x302   :  { %v1691_v7 = vld [vmem:[#allocation7 + $0x29] sm:$0xff]  ;;  %1770 = vrot.lane.b32.xlu2 %v1747_v6, %s2792_s24  ;;  %v1819_v15 = vpop.permute.xlu0 %1818 }
 0x303   :  { %v1673_v8 = vld [vmem:[#allocation7 + $0x30] sm:$0xff]  ;;  %1714 = vrot.lane.b32.xlu1 %v1691_v7, %s2789_s17 }
 0x304   :  { %1682 = vst.msk [vmem:[#allocation8 + $0x30] sm:$0xff] %vm1576_vm14, %v1673_v8  ;;  %v1707_v9 = vpop.permute.xlu1 %1706  ;;  %v1611_v11 = vld [vmem:[#allocation6 + $0x70] ss:$2 sm:$0xff]  ;;  %v1631_v12 = vld [vmem:[#allocation6 + $0x71] ss:$2 sm:$0xff]  ;;  %v1567_v13 = vpop.f32.mrf.mxu1 }
 0x305   :  { %1733 = vst.msk [vmem:[#allocation8 + $0x8] sm:$0xff] %vm1731_vm2, %v1707_v9  ;;  %v1643_v14 = vmax.f32 %v1611_v11, %v1631_v12 }
 0x306   :  { %1789 = vst.msk [vmem:[#allocation8 + $0x8] sm:$0xff] %vm1787_vm3, %v1763_v10 }
 0x307   :  { %1845 = vst.msk [vmem:[#allocation8 + $0x8] sm:$0xff] %vm1843_vm4, %v1819_v15  ;;  %v1653_v16 = vmax.f32 %v1643_v14, 0.0 }
 0x308   :  { %1593 = vst.msk [vmem:[#allocation6 + $0x80] sm:$0xff] %vm1576_vm14, %v1567_v13 }
 0x309   :  { %1663 = vst.msk [vmem:[#allocation7 + $0x38] sm:$0xff] %vm1576_vm14, %v1653_v16 }
 0x30b   :  { %v1765_v37 = vpop.permute.xlu2 %1764 }
 0x30c   :  { %v1570_v17 = vpop.f32.mrf.mxu1 }
 0x30d   :  { %1594 = vst.msk [vmem:[#allocation6 + $0x88] sm:$0xff] %vm1576_vm14, %v1570_v17 }
 0x30e   :  { %v1855_v18 = vld [vmem:[#allocation8 + $0x8] sm:$0xff] }
 0x30f   :  { %2729 = vmatmul.msk.f32.gmra.mxu2 %vm1873_vm5, %v1855_v18 }
 0x310   :  { %v1804_v19 = vld [vmem:[#allocation7 + $0x33] sm:$0xff] }
 0x311   :  { %v1748_v20 = vld [vmem:[#allocation7 + $0x32] sm:$0xff]  ;;  %1828 = vrot.lane.b32.xlu0 %v1804_v19, %s2791_s2 }
 0x312   :  { %v1692_v21 = vld [vmem:[#allocation7 + $0x31] sm:$0xff]  ;;  %1772 = vrot.lane.b32.xlu2 %v1748_v20, %s2792_s24 }
 0x313   :  { %v1674_v22 = vld [vmem:[#allocation7 + $0x38] sm:$0xff]  ;;  %1716 = vrot.lane.b32.xlu1 %v1692_v21, %s2789_s17 }
 0x314   :  { %1683 = vst.msk [vmem:[#allocation8 + $0x38] sm:$0xff] %vm1576_vm14, %v1674_v22  ;;  %v1613_v23 = vld [vmem:[#allocation6 + $0x80] ss:$2 sm:$0xff]  ;;  %v1633_v24 = vld [vmem:[#allocation6 + $0x81] ss:$2 sm:$0xff]  ;;  %v1573_v25 = vpop.f32.mrf.mxu1 }
 0x315   :  { %v1644_v26 = vmax.f32 %v1613_v23, %v1633_v24  ;;  %1596 = vst.msk [vmem:[#allocation6 + $0x90] sm:$0x3] %vm1595_vm6, %v1573_v25 }
 0x317   :  { %v1654_v27 = vmax.f32 %v1644_v26, 0.0 }
 0x319   :  { %1664 = vst.msk [vmem:[#allocation7 + $0x40] sm:$0xff] %vm1576_vm14, %v1654_v27 }
 0x31c   :  { %v1615_v28 = vld [vmem:[#allocation6 + $0x90] ss:$2 sm:$0x1]  ;;  %v1635_v29 = vld [vmem:[#allocation6 + $0x91] ss:$2 sm:$0x1] }
 0x31d   :  { %v1645_v30 = vmax.f32 %v1615_v28, %v1635_v29 }
 0x31f   :  { %v1655_v31 = vmax.f32 %v1645_v30, 0.0 }
 0x320   :  { %v1805_v32 = vld [vmem:[#allocation7 + $0x3b] sm:$0xff] }
 0x321   :  { %v1749_v33 = vld [vmem:[#allocation7 + $0x3a] sm:$0xff]  ;;  %1830 = vrot.lane.b32.xlu0 %v1805_v32, %s2791_s2  ;;  %1666 = vst.msk [vmem:[#allocation7 + $0x48] sm:$0x1] %vm1665_vm7, %v1655_v31  ;;  %v1750_v39 = vld [vmem:[#allocation7 + $0x42] sm:$0x3f]  ;;  %v2793_v32 = vmov 0.0  }
 0x322   :  { %v1693_v34 = vld [vmem:[#allocation7 + $0x39] sm:$0xff]  ;;  %1774 = vrot.lane.b32.xlu2 %v1749_v33, %s2792_s24  ;;  %v1821_v38 = vpop.permute.xlu0 %1820  ;;  %v1694_v41 = vld [vmem:[#allocation7 + $0x41] sm:$0x3f]  ;;  %2022 = vst [vmem:[#allocation11] sm:$0xff] %v2793_v32 }
 0x323   :  { %1718 = vrot.lane.b32.xlu1 %v1693_v34, %s2789_s17  ;;  %v1675_v35 = vld [vmem:[#allocation7 + $0x40] sm:$0x3f]  ;;  %2023 = vst [vmem:[#allocation11 + $0x8] sm:$0xff] %v2793_v32 }
 0x324   :  { %v1709_v36 = vpop.permute.xlu1 %1708  ;;  %1685 = vst.msk [vmem:[#allocation8 + $0x40] sm:$0x3f] %vm1684_vm8, %v1675_v35 }
 0x325   :  { %1734 = vst.msk [vmem:[#allocation8 + $0x10] sm:$0xff] %vm1731_vm2, %v1709_v36 }
 0x326   :  { %1790 = vst.msk [vmem:[#allocation8 + $0x10] sm:$0xff] %vm1787_vm3, %v1765_v37 }
 0x327   :  { %1846 = vst.msk [vmem:[#allocation8 + $0x10] sm:$0xff] %vm1843_vm4, %v1821_v38 }
 0x328   :  { %v1806_v40 = vld [vmem:[#allocation7 + $0x43] sm:$0x3f]  ;;  %2024 = vst [vmem:[#allocation11 + $0x10] sm:$0xf] %v2793_v32 }
 0x329   :  { %1832 = vrot.lane.b32.xlu0 %v1806_v40, %s2791_s2  ;;  %v2229_v32 = vld [vmem:[%s4363_s4 + $0x138] sm:$0xff] }
 0x32a   :  { %1776 = vrot.lane.b32.xlu2 %v1750_v39, %s2792_s24  ;;  %s2795_s24 = smov [#allocation12]  }
 0x32b   :  { %1720 = vrot.lane.b32.xlu1 %v1694_v41, %s2789_s17  ;;  %s2660_s13 = sshll.u32 %s2795_s24, 4  ;;  %s2661_s13 = int_to_ptr.vmem [resolvable:$true] %s2660_s13 }
 0x32c   :  { %v1767_v44 = vpop.permute.xlu2 %1766 }
 0x32e   :  { %v1856_v42 = vld [vmem:[#allocation8 + $0x10] sm:$0xff] }
 0x32f   :  { %2730 = vmatmul.msk.f32.gmra.mxu2 %vm1873_vm5, %v1856_v42 }
 0x343   :  { %v1823_v45 = vpop.permute.xlu0 %1822 }
 0x345   :  { %v1711_v43 = vpop.permute.xlu1 %1710 }
 0x346   :  { %1735 = vst.msk [vmem:[#allocation8 + $0x18] sm:$0xff] %vm1731_vm2, %v1711_v43 }
 0x347   :  { %1791 = vst.msk [vmem:[#allocation8 + $0x18] sm:$0xff] %vm1787_vm3, %v1767_v44 }
 0x348   :  { %1847 = vst.msk [vmem:[#allocation8 + $0x18] sm:$0xff] %vm1843_vm4, %v1823_v45 }
 0x34c   :  { %v1769_v48 = vpop.permute.xlu2 %1768 }
 0x34f   :  { %v1857_v46 = vld [vmem:[#allocation8 + $0x18] sm:$0xff] }
 0x350   :  { %2731 = vmatmul.msk.f32.gmra.mxu2 %vm1873_vm5, %v1857_v46 }
 0x35c   :  { %v1771_v53 = vpop.permute.xlu2 %1770 }
 0x363   :  { %v1825_v49 = vpop.permute.xlu0 %1824 }
 0x365   :  { %v1713_v47 = vpop.permute.xlu1 %1712 }
 0x366   :  { %1736 = vst.msk [vmem:[#allocation8 + $0x20] sm:$0xff] %vm1731_vm2, %v1713_v47 }
 0x367   :  { %1792 = vst.msk [vmem:[#allocation8 + $0x20] sm:$0xff] %vm1787_vm3, %v1769_v48 }
 0x368   :  { %1848 = vst.msk [vmem:[#allocation8 + $0x20] sm:$0xff] %vm1843_vm4, %v1825_v49 }
 0x36c   :  { %v1773_v57 = vpop.permute.xlu2 %1772 }
 0x36f   :  { %v1858_v50 = vld [vmem:[#allocation8 + $0x20] sm:$0xff] }
 0x370   :  { %2732 = vmatmul.msk.f32.gmra.mxu2 %vm1873_vm5, %v1858_v50 }
 0x372   :  { %v1918_v51 = vpop.f32.mrf.mxu2 }
 0x373   :  { %1945 = vst.msk [vmem:[#allocation9] sm:$0xff] %vm1444_vm11, %v1918_v51  ;;  %v1827_v54 = vpop.permute.xlu0 %1826 }
 0x375   :  { %v1715_v52 = vpop.permute.xlu1 %1714 }
 0x376   :  { %1737 = vst.msk [vmem:[#allocation8 + $0x28] sm:$0xff] %vm1731_vm2, %v1715_v52 }
 0x377   :  { %1793 = vst.msk [vmem:[#allocation8 + $0x28] sm:$0xff] %vm1787_vm3, %v1771_v53 }
 0x378   :  { %1849 = vst.msk [vmem:[#allocation8 + $0x28] sm:$0xff] %vm1843_vm4, %v1827_v54 }
 0x37c   :  { %v1775_v61 = vpop.permute.xlu2 %1774 }
 0x37f   :  { %v1859_v55 = vld [vmem:[#allocation8 + $0x28] sm:$0xff] }
 0x380   :  { %2733 = vmatmul.msk.f32.gmra.mxu2 %vm1873_vm5, %v1859_v55 }
 0x383   :  { %v1829_v58 = vpop.permute.xlu0 %1828 }
 0x384   :  { %v1777_v5 = vpop.permute.xlu2 %1776 }
 0x385   :  { %v1717_v56 = vpop.permute.xlu1 %1716 }
 0x386   :  { %1738 = vst.msk [vmem:[#allocation8 + $0x30] sm:$0xff] %vm1731_vm2, %v1717_v56 }
 0x387   :  { %1794 = vst.msk [vmem:[#allocation8 + $0x30] sm:$0xff] %vm1787_vm3, %v1773_v57 }
 0x388   :  { %1850 = vst.msk [vmem:[#allocation8 + $0x30] sm:$0xff] %vm1843_vm4, %v1829_v58 }
 0x38f   :  { %v1860_v59 = vld [vmem:[#allocation8 + $0x30] sm:$0xff] }
 0x390   :  { %2734 = vmatmul.msk.f32.gmra.mxu2 %vm1873_vm5, %v1860_v59 }
 0x392   :  { %v1921_v60 = vpop.f32.mrf.mxu2 }
 0x393   :  { %1946 = vst.msk [vmem:[#allocation9 + $0x8] sm:$0xff] %vm1444_vm11, %v1921_v60  ;;  %v1831_v62 = vpop.permute.xlu0 %1830 }
 0x395   :  { %v1719_v63 = vpop.permute.xlu1 %1718 }
 0x396   :  { %1739 = vst.msk [vmem:[#allocation8 + $0x38] sm:$0xff] %vm1731_vm2, %v1719_v63  ;;  %vm2629_vm2 = vcmask 1043456  }
 0x397   :  { %1795 = vst.msk [vmem:[#allocation8 + $0x38] sm:$0xff] %vm1787_vm3, %v1775_v61  ;;  %vm2590_vm3 = vcmask 244736  }
 0x398   :  { %1851 = vst.msk [vmem:[#allocation8 + $0x38] sm:$0xff] %vm1843_vm4, %v1831_v62  ;;  %vm2653_vm4 = vcmask 33792  }
 0x39a   :  { %v1955_v0 = vld [vmem:[#allocation9] ss:$2 sm:$0xff]  ;;  %v1965_v1 = vld [vmem:[#allocation9 + $0x1] ss:$2 sm:$0xff] }
 0x39b   :  { %v1974_v2 = vmax.f32 %v1955_v0, %v1965_v1  ;;  %v1833_v6 = vpop.permute.xlu0 %1832 }
 0x39d   :  { %v1721_v3 = vpop.permute.xlu1 %1720  ;;  %v1979_v4 = vmax.f32 %v1974_v2, 0.0 }
 0x39e   :  { %1741 = vst.msk [vmem:[#allocation8 + $0x40] sm:$0x3f] %vm1740_vm9, %v1721_v3 }
 0x39f   :  { %1797 = vst.msk [vmem:[#allocation8 + $0x40] sm:$0x3f] %vm1796_vm10, %v1777_v5  ;;  %1984 = vxpose.xlu1.b32.start [1/5] (short) (narrow) %v1979_v4, 40  ;;  %v1861_v7 = vld [vmem:[#allocation8 + $0x38] sm:$0xff] }
 0x3a0   :  { %1853 = vst.msk [vmem:[#allocation8 + $0x40] sm:$0x3f] %vm1852_vm12, %v1833_v6  ;;  %2735 = vmatmul.msk.f32.gmra.mxu2 %vm1873_vm5, %v1861_v7  ;;  %v2205_v6 = vld [vmem:[%s4363_s4 + $0x78] sm:$0xff] }
 0x3a1   :  { %v2237_v7 = vld [vmem:[%s4363_s4 + $0x178] sm:$0xff]  ;;  %2381 = vmatpush.msrb.mxu3 %v2205_v6 }
 0x3a2   :  { %2421 = vmatpush.msrb.mxu2 %v2237_v7 }
 0x3a7   :  { %v1862_v8 = vld [vmem:[#allocation8 + $0x40] sm:$0x3f] }
 0x3a8   :  { %2736 = vmatmul.msk.f32.gmra.mxu2 %vm1873_vm5, %v1862_v8  ;;  %v2204_v8 = vld [vmem:[%s4363_s4 + $0x70] sm:$0xff] }
 0x3a9   :  { %2382 = vmatpush.msrb.mxu3 %v2204_v8  ;;  %v2261_v8 = vld [vmem:[%s4363_s4 + $0x238] sm:$0xff] }
 0x3b2   :  { %v1924_v9 = vpop.f32.mrf.mxu2 }
 0x3b3   :  { %1947 = vst.msk [vmem:[#allocation9 + $0x10] sm:$0xff] %vm1444_vm11, %v1924_v9  ;;  %v2236_v9 = vld [vmem:[%s4363_s4 + $0x170] sm:$0xff] }
 0x3b4   :  { %2422 = vmatpush.msrb.mxu2 %v2236_v9  ;;  %v2212_v9 = vld [vmem:[%s4363_s4 + $0xb0] sm:$0xff] }
 0x3d3   :  { %v1927_v10 = vpop.f32.mrf.mxu2 }
 0x3d4   :  { %1948 = vst.msk [vmem:[#allocation9 + $0x18] sm:$0xff] %vm1444_vm11, %v1927_v10 }
 0x3db   :  { %v1957_v11 = vld [vmem:[#allocation9 + $0x10] ss:$2 sm:$0xff]  ;;  %v1967_v12 = vld [vmem:[#allocation9 + $0x11] ss:$2 sm:$0xff] }
 0x3dc   :  { %v1975_v13 = vmax.f32 %v1957_v11, %v1967_v12  ;;  %v2203_v12 = vld [vmem:[%s4363_s4 + $0x68] sm:$0xff] }
 0x3dd   :  { %2383 = vmatpush.msrb.mxu3 %v2203_v12  ;;  %v2211_v12 = vld [vmem:[%s4363_s4 + $0xa8] sm:$0xff] }
 0x3de   :  { %v1980_v14 = vmax.f32 %v1975_v13, 0.0  ;;  %v2235_v13 = vld [vmem:[%s4363_s4 + $0x168] sm:$0xff] }
 0x3df   :  { %2423 = vmatpush.msrb.mxu2 %v2235_v13  ;;  %v2259_v13 = vld [vmem:[%s4363_s4 + $0x228] sm:$0xff] }
 0x3e0   :  { %1985 = vxpose.xlu1.b32.cont [2/5] (short) (narrow) %v1980_v14, 40 }
 0x3f3   :  { %v1930_v15 = vpop.f32.mrf.mxu2 }
 0x3f4   :  { %1949 = vst.msk [vmem:[#allocation9 + $0x20] sm:$0xff] %vm1444_vm11, %v1930_v15 }
 0x403   :  { %v1933_v16 = vpop.f32.mrf.mxu2 }
 0x404   :  { %1950 = vst.msk [vmem:[#allocation9 + $0x28] sm:$0xff] %vm1444_vm11, %v1933_v16 }
 0x40b   :  { %v1959_v17 = vld [vmem:[#allocation9 + $0x20] ss:$2 sm:$0xff]  ;;  %v1969_v18 = vld [vmem:[#allocation9 + $0x21] ss:$2 sm:$0xff] }
 0x40c   :  { %v1976_v19 = vmax.f32 %v1959_v17, %v1969_v18  ;;  %v2202_v18 = vld [vmem:[%s4363_s4 + $0x60] sm:$0xff] }
 0x40d   :  { %2384 = vmatpush.msrb.mxu3 %v2202_v18  ;;  %v2257_v18 = vld [vmem:[%s4363_s4 + $0x218] sm:$0xff] }
 0x40e   :  { %v1981_v20 = vmax.f32 %v1976_v19, 0.0  ;;  %v2234_v19 = vld [vmem:[%s4363_s4 + $0x160] sm:$0xff] }
 0x40f   :  { %2424 = vmatpush.msrb.mxu2 %v2234_v19  ;;  %v2208_v19 = vld [vmem:[%s4363_s4 + $0x90] sm:$0xff] }
 0x410   :  { %1986 = vxpose.xlu1.b32.cont [3/5] (short) (narrow) %v1981_v20, 40  ;;  %v2201_v20 = vld [vmem:[%s4363_s4 + $0x58] sm:$0xff] }
 0x411   :  { %2385 = vmatpush.msrb.mxu3 %v2201_v20 }
 0x413   :  { %v1936_v21 = vpop.f32.mrf.mxu2 }
 0x414   :  { %1951 = vst.msk [vmem:[#allocation9 + $0x30] sm:$0xff] %vm1444_vm11, %v1936_v21  ;;  %v2233_v21 = vld [vmem:[%s4363_s4 + $0x158] sm:$0xff] }
 0x415   :  { %2425 = vmatpush.msrb.mxu2 %v2233_v21 }
 0x423   :  { %v1939_v22 = vpop.f32.mrf.mxu2 }
 0x424   :  { %1952 = vst.msk [vmem:[#allocation9 + $0x38] sm:$0xff] %vm1444_vm11, %v1939_v22  ;;  %vm2026_vm11 = vcmask 278528  }
 0x42b   :  { %v1942_v23 = vpop.f32.mrf.mxu2  ;;  %v1961_v24 = vld [vmem:[#allocation9 + $0x30] ss:$2 sm:$0xff]  ;;  %v1971_v25 = vld [vmem:[#allocation9 + $0x31] ss:$2 sm:$0xff] }
 0x42c   :  { %1954 = vst.msk [vmem:[#allocation9 + $0x40] sm:$0x3f] %vm1953_vm13, %v1942_v23  ;;  %v1977_v26 = vmax.f32 %v1961_v24, %v1971_v25  ;;  %v2333_v24 = vld [vmem:[%s4363_s4 + $0x478] sm:$0xff]  ;;  %v2200_v25 = vld [vmem:[%s4363_s4 + $0x50] sm:$0xff] }
 0x42d   :  { %2541 = vmatpush.msra.mxu1 %v2333_v24  ;;  %2386 = vmatpush.msrb.mxu3 %v2200_v25  ;;  %v2255_v24 = vld [vmem:[%s4363_s4 + $0x208] sm:$0xff]  ;;  %v2206_v25 = vld [vmem:[%s4363_s4 + $0x80] sm:$0xff] }
 0x42e   :  { %v1982_v27 = vmax.f32 %v1977_v26, 0.0  ;;  %v2232_v26 = vld [vmem:[%s4363_s4 + $0x150] sm:$0xff] }
 0x42f   :  { %2426 = vmatpush.msrb.mxu2 %v2232_v26  ;;  %v2254_v26 = vld [vmem:[%s4363_s4 + $0x200] sm:$0xff] }
 0x430   :  { %1987 = vxpose.xlu1.b32.cont [4/5] (short) (narrow) %v1982_v27, 40  ;;  %v2199_v27 = vld [vmem:[%s4363_s4 + $0x48] sm:$0xff] }
 0x431   :  { %2387 = vmatpush.msrb.mxu3 %v2199_v27 }
 0x433   :  { %v1963_v28 = vld [vmem:[#allocation9 + $0x40] ss:$2 sm:$0x7]  ;;  %v1973_v29 = vld [vmem:[#allocation9 + $0x41] ss:$2 sm:$0x7] }
 0x434   :  { %v1978_v30 = vmax.f32 %v1963_v28, %v1973_v29  ;;  %v2231_v28 = vld [vmem:[%s4363_s4 + $0x148] sm:$0xff]  ;;  %v2198_v29 = vld [vmem:[%s4363_s4 + $0x40] sm:$0xff] }
 0x435   :  { %2427 = vmatpush.msrb.mxu2 %v2231_v28  ;;  %2388 = vmatpush.msrb.mxu3 %v2198_v29  ;;  %v2327_v29 = vld [vmem:[%s4363_s4 + $0x448] sm:$0xff] }
 0x436   :  { %v1983_v31 = vmax.f32 %v1978_v30, 0.0  ;;  %v2230_v30 = vld [vmem:[%s4363_s4 + $0x140] sm:$0xff] }
 0x437   :  { %2428 = vmatpush.msrb.mxu2 %v2230_v30 }
 0x438   :  { %1988 = vxpose.xlu1.b32.end [5/5] (short) (narrow) %v1983_v31, 40  ;;  %v2197_v31 = vld [vmem:[%s4363_s4 + $0x38] sm:$0xff] }
 0x439   :  { %2389 = vmatpush.msrb.mxu3 %v2197_v31  ;;  %2429 = vmatpush.msrb.mxu2 %v2229_v32 }
 0x4bc   :  { %v2000_v33 = vpop.trf.xlu1 }
 0x4bd   :  { %2017 = vst.msk [vmem:[#allocation10] sm:$0xff] %vm2016_vm15, %v2000_v33  ;;  %v2332_v33 = vld [vmem:[%s4363_s4 + $0x470] sm:$0xff] }
 0x4be   :  { %2542 = vmatpush.msra.mxu1 %v2332_v33 }
 0x4c4   :  { %v2001_v34 = vpop.trf.xlu1  ;;  %v2037_v35 = vld [vmem:[#allocation10 + $0x3] sm:$0x1]  ;;  %v2028_v36 = vld [vmem:[#allocation10 + $0x1] sm:$0x1]  ;;  %v2025_v37 = vld [vmem:[#allocation10] sm:$0x1] }
 0x4c5   :  { %2018 = vst.msk [vmem:[#allocation10 + $0x8] sm:$0xff] %vm2016_vm15, %v2001_v34  ;;  %2039 = vrot.lane.b32.xlu0 %v2037_v35, %s2794_s3  ;;  %2030 = vrot.lane.b32.xlu2 %v2028_v36, %s2794_s3  ;;  %v2043_v38 = vld [vmem:[#allocation10 + $0x4] sm:$0x1]  ;;  %v2035_v39 = vld [vmem:[#allocation10 + $0x2] sm:$0x1]  ;;  %v2195_v36 = vld [vmem:[%s4363_s4 + $0x28] sm:$0xff] }
 0x4c6   :  { %2027 = vst.msk [vmem:[#allocation11] sm:$0x1] %vm2026_vm11, %v2025_v37  ;;  %v2051_v40 = vld [vmem:[#allocation10 + $0x6] sm:$0x1]  ;;  %v2053_v42 = vld [vmem:[#allocation10 + $0x7] sm:$0x1] }
 0x4c7   :  { %2044 = vst.msk [vmem:[#allocation11 + $0x4] sm:$0x1] %vm2026_vm11, %v2043_v38  ;;  %v2045_v43 = vld [vmem:[#allocation10 + $0x5] sm:$0x1]  ;;  %v2227_v37 = vld [vmem:[%s4363_s4 + $0x128] sm:$0xff]  ;;  %v2194_v38 = vld [vmem:[%s4363_s4 + $0x20] sm:$0xff] }
 0x4c8   :  { %2036 = vst.msk [vmem:[#allocation11 + $0x2] sm:$0x1] %vm2026_vm11, %v2035_v39  ;;  %v2196_v34 = vld [vmem:[%s4363_s4 + $0x30] sm:$0xff]  ;;  %v2226_v39 = vld [vmem:[%s4363_s4 + $0x120] sm:$0xff] }
 0x4c9   :  { %2052 = vst.msk [vmem:[#allocation11 + $0x6] sm:$0x1] %vm2026_vm11, %v2051_v40  ;;  %v2228_v35 = vld [vmem:[%s4363_s4 + $0x130] sm:$0xff]  ;;  %2390 = vmatpush.msrb.mxu3 %v2196_v34  ;;  %v2193_v40 = vld [vmem:[%s4363_s4 + $0x18] sm:$0xff] }
 0x4ca   :  { %2430 = vmatpush.msrb.mxu2 %v2228_v35  ;;  %v2326_v35 = vld [vmem:[%s4363_s4 + $0x440] sm:$0xff] }
 0x4cb   :  { %2391 = vmatpush.msrb.mxu3 %v2195_v36  ;;  %v2325_v36 = vld [vmem:[%s4363_s4 + $0x438] sm:$0xff] }
 0x4cc   :  { %v2002_v41 = vpop.trf.xlu1  ;;  %v2059_v44 = vld [vmem:[#allocation10 + $0x8] sm:$0x1]  ;;  %v2075_v45 = vld [vmem:[#allocation10 + $0xc] sm:$0x1]  ;;  %v2067_v46 = vld [vmem:[#allocation10 + $0xa] sm:$0x1]  ;;  %2431 = vmatpush.msrb.mxu2 %v2227_v37 }
 0x4cd   :  { %2019 = vst.msk [vmem:[#allocation10 + $0x10] sm:$0xff] %vm2016_vm15, %v2002_v41  ;;  %2055 = vrot.lane.b32.xlu0 %v2053_v42, %s2794_s3  ;;  %2047 = vrot.lane.b32.xlu2 %v2045_v43, %s2794_s3  ;;  %v2083_v47 = vld [vmem:[#allocation10 + $0xe] sm:$0x1]  ;;  %v2069_v62 = vld [vmem:[#allocation10 + $0xb] sm:$0x1]  ;;  %v2192_v42 = vld [vmem:[%s4363_s4 + $0x10] sm:$0xff] }
 0x4ce   :  { %2060 = vst.msk [vmem:[#allocation11 + $0x8] sm:$0x1] %vm2026_vm11, %v2059_v44  ;;  %v2061_v63 = vld [vmem:[#allocation10 + $0x9] sm:$0x1]  ;;  %v2085_v0 = vld [vmem:[#allocation10 + $0xf] sm:$0x1]  ;;  %2392 = vmatpush.msrb.mxu3 %v2194_v38  ;;  %2432 = vmatpush.msrb.mxu2 %v2226_v39 }
 0x4cf   :  { %2076 = vst.msk [vmem:[#allocation11 + $0xc] sm:$0x1] %vm2026_vm11, %v2075_v45  ;;  %v2077_v1 = vld [vmem:[#allocation10 + $0xd] sm:$0x1]  ;;  %v2224_v43 = vld [vmem:[%s4363_s4 + $0x110] sm:$0xff]  ;;  %v2191_v44 = vld [vmem:[%s4363_s4 + $0x8] sm:$0xff] }
 0x4d0   :  { %2068 = vst.msk [vmem:[#allocation11 + $0xa] sm:$0x1] %vm2026_vm11, %v2067_v46  ;;  %v2225_v41 = vld [vmem:[%s4363_s4 + $0x118] sm:$0xff]  ;;  %2393 = vmatpush.msrb.mxu3 %v2193_v40  ;;  %v2223_v45 = vld [vmem:[%s4363_s4 + $0x108] sm:$0xff] }
 0x4d1   :  { %2084 = vst.msk [vmem:[#allocation11 + $0xe] sm:$0x1] %vm2026_vm11, %v2083_v47  ;;  %2433 = vmatpush.msrb.mxu2 %v2225_v41  ;;  %v2190_v47 = vld [vmem:[%s4363_s4] sm:$0xff]  ;;  %v2253_v37 = vld [vmem:[%s4363_s4 + $0x1f8] sm:$0xff] }
 0x4d2   :  { %2394 = vmatpush.msrb.mxu3 %v2192_v42  ;;  %v2301_v38 = vld [vmem:[%s4363_s4 + $0x378] sm:$0xff] }
 0x4d3   :  { %2434 = vmatpush.msrb.mxu2 %v2224_v43  ;;  %v2252_v43 = vld [vmem:[%s4363_s4 + $0x1f0] sm:$0xff] }
 0x4d4   :  { %v2003_v48 = vpop.trf.xlu1  ;;  %v2117_v49 = vld [vmem:[#allocation10 + $0x17] sm:$0x1]  ;;  %v2109_v50 = vld [vmem:[#allocation10 + $0x15] sm:$0x1]  ;;  %v2107_v51 = vld [vmem:[#allocation10 + $0x14] sm:$0x1]  ;;  %2395 = vmatpush.msrb.mxu3 %v2191_v44 }
 0x4d5   :  { %2020 = vst.msk [vmem:[#allocation10 + $0x18] sm:$0xff] %vm2016_vm15, %v2003_v48  ;;  %2119 = vrot.lane.b32.xlu0 %v2117_v49, %s2794_s3  ;;  %2111 = vrot.lane.b32.xlu2 %v2109_v50, %s2794_s3  ;;  %v2115_v52 = vld [vmem:[#allocation10 + $0x16] sm:$0x1]  ;;  %v2091_v53 = vld [vmem:[#allocation10 + $0x10] sm:$0x1]  ;;  %v2331_v48 = vld [vmem:[%s4363_s4 + $0x468] sm:$0xff] }
 0x4d6   :  { %2108 = vst.msk [vmem:[#allocation11 + $0x1] sm:$0x1] %vm2026_vm11, %v2107_v51  ;;  %v2099_v54 = vld [vmem:[#allocation10 + $0x12] sm:$0x1]  ;;  %v2101_v10 = vld [vmem:[#allocation10 + $0x13] sm:$0x1]  ;;  %2435 = vmatpush.msrb.mxu2 %v2223_v45  ;;  %2396 = vmatpush.msrb.mxu3 %v2190_v47 }
 0x4d7   :  { %2116 = vst.msk [vmem:[#allocation11 + $0x3] sm:$0x1] %vm2026_vm11, %v2115_v52  ;;  %v2093_v11 = vld [vmem:[#allocation10 + $0x11] sm:$0x1]  ;;  %v2221_v49 = vld [vmem:[%s4363_s4 + $0xf8] sm:$0xff]  ;;  %2543 = vmatpush.msra.mxu1 %v2331_v48  ;;  %v2220_v52 = vld [vmem:[%s4363_s4 + $0xf0] sm:$0xff] }
 0x4d8   :  { %2092 = vst.msk [vmem:[#allocation11 + $0x10] sm:$0x1] %vm2026_vm11, %v2091_v53  ;;  %v2222_v50 = vld [vmem:[%s4363_s4 + $0x100] sm:$0xff]  ;;  %v2269_v51 = vld [vmem:[%s4363_s4 + $0x278] sm:$0xff]  ;;  %2401 = vmatpush.msra.mxu3 %v2221_v49  ;;  %v2268_v53 = vld [vmem:[%s4363_s4 + $0x270] sm:$0xff] }
 0x4d9   :  { %2100 = vst.msk [vmem:[#allocation11 + $0x12] sm:$0x1] %vm2026_vm11, %v2099_v54  ;;  %2436 = vmatpush.msrb.mxu2 %v2222_v50  ;;  %v2219_v54 = vld [vmem:[%s4363_s4 + $0xe8] sm:$0xff]  ;;  %v2300_v44 = vld [vmem:[%s4363_s4 + $0x370] sm:$0xff]  ;;  %v2250_v47 = vld [vmem:[%s4363_s4 + $0x1e0] sm:$0xff] }
 0x4da   :  { %2402 = vmatpush.msra.mxu3 %v2220_v52  ;;  %v2251_v45 = vld [vmem:[%s4363_s4 + $0x1e8] sm:$0xff]  ;;  %v2298_v48 = vld [vmem:[%s4363_s4 + $0x360] sm:$0xff]  ;;  %v2249_v49 = vld [vmem:[%s4363_s4 + $0x1d8] sm:$0xff] }
 0x4db   :  { %2461 = vmatpush.msra.mxu2 %v2269_v51  ;;  %v2297_v50 = vld [vmem:[%s4363_s4 + $0x358] sm:$0xff] }
 0x4dc   :  { %v2133_v55 = vld [vmem:[#allocation10 + $0x1b] sm:$0x1]  ;;  %v2125_v56 = vld [vmem:[#allocation10 + $0x19] sm:$0x1]  ;;  %v2004_v57 = vpop.trf.xlu1  ;;  %v2123_v58 = vld [vmem:[#allocation10 + $0x18] sm:$0x1]  ;;  %2403 = vmatpush.msra.mxu3 %v2219_v54 }
 0x4dd   :  { %2135 = vrot.lane.b32.xlu0 %v2133_v55, %s2794_s3  ;;  %2127 = vrot.lane.b32.xlu2 %v2125_v56, %s2794_s3  ;;  %2021 = vst.msk [vmem:[#allocation10 + $0x20] sm:$0xff] %vm2016_vm15, %v2004_v57  ;;  %v2131_v59 = vld [vmem:[#allocation10 + $0x1a] sm:$0x1]  ;;  %v2139_v60 = vld [vmem:[#allocation10 + $0x1c] sm:$0x1]  ;;  %v2218_v56 = vld [vmem:[%s4363_s4 + $0xe0] sm:$0xff] }
 0x4de   :  { %2124 = vst.msk [vmem:[#allocation11 + $0x5] sm:$0x1] %vm2026_vm11, %v2123_v58  ;;  %v2147_v61 = vld [vmem:[#allocation10 + $0x1e] sm:$0x1]  ;;  %v2149_v2 = vld [vmem:[#allocation10 + $0x1f] sm:$0x1]  ;;  %2462 = vmatpush.msra.mxu2 %v2268_v53  ;;  %2404 = vmatpush.msra.mxu3 %v2218_v56 }
 0x4df   :  { %2132 = vst.msk [vmem:[#allocation11 + $0x7] sm:$0x1] %vm2026_vm11, %v2131_v59  ;;  %v2141_v3 = vld [vmem:[#allocation10 + $0x1d] sm:$0x1]  ;;  %v2266_v58 = vld [vmem:[%s4363_s4 + $0x260] sm:$0xff]  ;;  %v2217_v59 = vld [vmem:[%s4363_s4 + $0xd8] sm:$0xff] }
 0x4e0   :  { %2140 = vst.msk [vmem:[#allocation11 + $0x9] sm:$0x1] %vm2026_vm11, %v2139_v60  ;;  %v2267_v55 = vld [vmem:[%s4363_s4 + $0x268] sm:$0xff]  ;;  %v2265_v60 = vld [vmem:[%s4363_s4 + $0x258] sm:$0xff]  ;;  %2405 = vmatpush.msra.mxu3 %v2217_v59  ;;  %v2248_v54 = vld [vmem:[%s4363_s4 + $0x1d0] sm:$0xff] }
 0x4e1   :  { %2148 = vst.msk [vmem:[#allocation11 + $0xb] sm:$0x1] %vm2026_vm11, %v2147_v61  ;;  %2463 = vmatpush.msra.mxu2 %v2267_v55  ;;  %v2330_v61 = vld [vmem:[%s4363_s4 + $0x460] sm:$0xff]  ;;  %v2296_v55 = vld [vmem:[%s4363_s4 + $0x350] sm:$0xff]  ;;  %v2295_v59 = vld [vmem:[%s4363_s4 + $0x348] sm:$0xff] }
 0x4e2   :  { %2544 = vmatpush.msra.mxu1 %v2330_v61  ;;  %v2324_v56 = vld [vmem:[%s4363_s4 + $0x430] sm:$0xff]  ;;  %v2246_v61 = vld [vmem:[%s4363_s4 + $0x1c0] sm:$0xff] }
 0x4e3   :  { %2464 = vmatpush.msra.mxu2 %v2266_v58  ;;  %v2247_v58 = vld [vmem:[%s4363_s4 + $0x1c8] sm:$0xff] }
 0x4e4   :  { %v2165_v4 = vld [vmem:[#allocation10 + $0x23] sm:$0x1]  ;;  %v2157_v5 = vld [vmem:[#allocation10 + $0x21] sm:$0x1]  ;;  %v2155_v14 = vld [vmem:[#allocation10 + $0x20] sm:$0x1] }
 0x4e5   :  { %2071 = vrot.lane.b32.xlu0 %v2069_v62, %s2794_s3  ;;  %2063 = vrot.lane.b32.xlu2 %v2061_v63, %s2794_s3  ;;  %v2163_v15 = vld [vmem:[#allocation10 + $0x22] sm:$0x1]  ;;  %v2171_v16 = vld [vmem:[#allocation10 + $0x24] sm:$0x1]  ;;  %2156 = vst.msk [vmem:[#allocation11 + $0xd] sm:$0x1] %vm2026_vm11, %v2155_v14 }
 0x4e6   :  { %v2179_v17 = vld [vmem:[#allocation10 + $0x26] sm:$0x1]  ;;  %2164 = vst.msk [vmem:[#allocation11 + $0xf] sm:$0x1] %vm2026_vm11, %v2163_v15  ;;  %v2181_v22 = vld [vmem:[#allocation10 + $0x27] sm:$0x1]  ;;  %2465 = vmatpush.msra.mxu2 %v2265_v60 }
 0x4e7   :  { %2172 = vst.msk [vmem:[#allocation11 + $0x11] sm:$0x1] %vm2026_vm11, %v2171_v16  ;;  %v2173_v23 = vld [vmem:[#allocation10 + $0x25] sm:$0x1]  ;;  %v2210_v14 = vld [vmem:[%s4363_s4 + $0xa0] sm:$0xff]  ;;  %v2209_v16 = vld [vmem:[%s4363_s4 + $0x98] sm:$0xff] }
 0x4e8   :  { %2180 = vst.msk [vmem:[#allocation11 + $0x13] sm:$0x1] %vm2026_vm11, %v2179_v17  ;;  %v2216_v62 = vld [vmem:[%s4363_s4 + $0xd0] sm:$0xff]  ;;  %v2258_v15 = vld [vmem:[%s4363_s4 + $0x220] sm:$0xff] }
 0x4e9   :  { %v2264_v63 = vld [vmem:[%s4363_s4 + $0x250] sm:$0xff]  ;;  %2406 = vmatpush.msra.mxu3 %v2216_v62  ;;  %v2322_v60 = vld [vmem:[%s4363_s4 + $0x420] sm:$0xff] }
 0x4ea   :  { %2466 = vmatpush.msra.mxu2 %v2264_v63  ;;  %v2328_v17 = vld [vmem:[%s4363_s4 + $0x450] sm:$0xff]  ;;  %v2294_v62 = vld [vmem:[%s4363_s4 + $0x340] sm:$0xff]  ;;  %v2321_v63 = vld [vmem:[%s4363_s4 + $0x418] sm:$0xff] }
 0x4ed   :  { %2087 = vrot.lane.b32.xlu0 %v2085_v0, %s2794_s3  ;;  %2079 = vrot.lane.b32.xlu2 %v2077_v1, %s2794_s3  ;;  %v2215_v0 = vld [vmem:[%s4363_s4 + $0xc8] sm:$0xff] }
 0x4ee   :  { %v2263_v1 = vld [vmem:[%s4363_s4 + $0x248] sm:$0xff]  ;;  %2407 = vmatpush.msra.mxu3 %v2215_v0  ;;  %v2245_v0 = vld [vmem:[%s4363_s4 + $0x1b8] sm:$0xff] }
 0x4ef   :  { %2467 = vmatpush.msra.mxu2 %v2263_v1  ;;  %v2293_v1 = vld [vmem:[%s4363_s4 + $0x338] sm:$0xff] }
 0x4f5   :  { %2151 = vrot.lane.b32.xlu0 %v2149_v2, %s2794_s3  ;;  %2143 = vrot.lane.b32.xlu2 %v2141_v3, %s2794_s3  ;;  %v2214_v2 = vld [vmem:[%s4363_s4 + $0xc0] sm:$0xff] }
 0x4f6   :  { %2408 = vmatpush.msra.mxu3 %v2214_v2 }
 0x4fd   :  { %2167 = vrot.lane.b32.xlu0 %v2165_v4, %s2794_s3  ;;  %2159 = vrot.lane.b32.xlu2 %v2157_v5, %s2794_s3  ;;  %v2262_v4 = vld [vmem:[%s4363_s4 + $0x240] sm:$0xff]  ;;  %v2213_v5 = vld [vmem:[%s4363_s4 + $0xb8] sm:$0xff] }
 0x4fe   :  { %2468 = vmatpush.msra.mxu2 %v2262_v4  ;;  %2409 = vmatpush.msra.mxu3 %v2213_v5  ;;  %v2244_v4 = vld [vmem:[%s4363_s4 + $0x1b0] sm:$0xff] }
 0x4ff   :  { %v2292_v5 = vld [vmem:[%s4363_s4 + $0x330] sm:$0xff] }
 0x500   :  { %2469 = vmatpush.msra.mxu2 %v2261_v8  ;;  %2410 = vmatpush.msra.mxu3 %v2212_v9  ;;  %v2291_v8 = vld [vmem:[%s4363_s4 + $0x328] sm:$0xff]  ;;  %v2318_v9 = vld [vmem:[%s4363_s4 + $0x400] sm:$0xff] }
 0x502   :  { %2411 = vmatpush.msra.mxu3 %v2211_v12  ;;  %v2241_v12 = vld [vmem:[%s4363_s4 + $0x198] sm:$0xff] }
 0x504   :  { %2412 = vmatpush.msra.mxu3 %v2210_v14 }
 0x505   :  { %2103 = vrot.lane.b32.xlu0 %v2101_v10, %s2794_s3  ;;  %2095 = vrot.lane.b32.xlu2 %v2093_v11, %s2794_s3  ;;  %v2329_v10 = vld [vmem:[%s4363_s4 + $0x458] sm:$0xff]  ;;  %v2260_v11 = vld [vmem:[%s4363_s4 + $0x230] sm:$0xff] }
 0x506   :  { %2545 = vmatpush.msra.mxu1 %v2329_v10  ;;  %2470 = vmatpush.msra.mxu2 %v2260_v11  ;;  %v2242_v10 = vld [vmem:[%s4363_s4 + $0x1a0] sm:$0xff] }
 0x507   :  { %2413 = vmatpush.msra.mxu3 %v2209_v16  ;;  %v2290_v11 = vld [vmem:[%s4363_s4 + $0x320] sm:$0xff]  ;;  %v2240_v16 = vld [vmem:[%s4363_s4 + $0x190] sm:$0xff] }
 0x508   :  { %2471 = vmatpush.msra.mxu2 %v2259_v13  ;;  %2546 = vmatpush.msra.mxu1 %v2328_v17  ;;  %v2289_v13 = vld [vmem:[%s4363_s4 + $0x318] sm:$0xff]  ;;  %v2288_v17 = vld [vmem:[%s4363_s4 + $0x310] sm:$0xff] }
 0x509   :  { %2414 = vmatpush.msra.mxu3 %v2208_v19  ;;  %v2287_v19 = vld [vmem:[%s4363_s4 + $0x308] sm:$0xff] }
 0x50a   :  { %2472 = vmatpush.msra.mxu2 %v2258_v15  ;;  %2547 = vmatpush.msra.mxu1 %v2327_v29  ;;  %v2283_v29 = vld [vmem:[%s4363_s4 + $0x2e8] sm:$0xff] }
 0x50c   :  { %2473 = vmatpush.msra.mxu2 %v2257_v18  ;;  %2548 = vmatpush.msra.mxu1 %v2326_v35  ;;  %v2239_v18 = vld [vmem:[%s4363_s4 + $0x188] sm:$0xff] }
 0x50d   :  { %2183 = vrot.lane.b32.xlu0 %v2181_v22, %s2794_s3  ;;  %2175 = vrot.lane.b32.xlu2 %v2173_v23, %s2794_s3  ;;  %v2256_v22 = vld [vmem:[%s4363_s4 + $0x210] sm:$0xff]  ;;  %v2207_v23 = vld [vmem:[%s4363_s4 + $0x88] sm:$0xff] }
 0x50e   :  { %2474 = vmatpush.msra.mxu2 %v2256_v22  ;;  %2415 = vmatpush.msra.mxu3 %v2207_v23  ;;  %v2285_v22 = vld [vmem:[%s4363_s4 + $0x2f8] sm:$0xff] }
 0x50f   :  { %2549 = vmatpush.msra.mxu1 %v2325_v36  ;;  %v2349_v23 = vld [vmem:[%s4363_s4 + $0x4f8] sm:$0xff] }
 0x510   :  { %2475 = vmatpush.msra.mxu2 %v2255_v24  ;;  %2416 = vmatpush.msra.mxu3 %v2206_v25 }
 0x511   :  { %2550 = vmatpush.msra.mxu1 %v2324_v56  ;;  %v2271_v56 = vld [vmem:[%s4363_s4 + $0x288] sm:$0xff] }
 0x512   :  { %2476 = vmatpush.msra.mxu2 %v2254_v26 }
 0x51f   :  { %v2031_v46 = vpop.permute.xlu2 %2030 }
 0x520   :  { %2034 = vst.msk [vmem:[#allocation11] sm:$0x1] %vm2033_vm0, %v2031_v46  ;;  %v2299_v46 = vld [vmem:[%s4363_s4 + $0x368] sm:$0xff] }
 0x527   :  { %v2048_v57 = vpop.permute.xlu2 %2047 }
 0x528   :  { %2050 = vst.msk [vmem:[#allocation11 + $0x4] sm:$0x1] %vm2033_vm0, %v2048_v57  ;;  %v2323_v57 = vld [vmem:[%s4363_s4 + $0x428] sm:$0xff] }
 0x529   :  { %2551 = vmatpush.msra.mxu1 %v2323_v57  ;;  %v2335_v57 = vld [vmem:[%s4363_s4 + $0x488] sm:$0xff] }
 0x52b   :  { %2552 = vmatpush.msra.mxu1 %v2322_v60  ;;  %v2317_v60 = vld [vmem:[%s4363_s4 + $0x3f8] sm:$0xff] }
 0x52d   :  { %2553 = vmatpush.msra.mxu1 %v2321_v63  ;;  %v2316_v63 = vld [vmem:[%s4363_s4 + $0x3f0] sm:$0xff] }
 0x52f   :  { %v2112_v3 = vpop.permute.xlu2 %2111 }
 0x530   :  { %2114 = vst.msk [vmem:[#allocation11 + $0x1] sm:$0x1] %vm2033_vm0, %v2112_v3  ;;  %v2320_v3 = vld [vmem:[%s4363_s4 + $0x410] sm:$0xff] }
 0x531   :  { %2554 = vmatpush.msra.mxu1 %v2320_v3  ;;  %v2312_v3 = vld [vmem:[%s4363_s4 + $0x3d0] sm:$0xff] }
 0x537   :  { %v2040_v6 = vpop.permute.xlu0 %2039  ;;  %v2128_v7 = vpop.permute.xlu2 %2127 }
 0x538   :  { %2042 = vst.msk [vmem:[#allocation11 + $0x2] sm:$0x1] %vm2033_vm0, %v2040_v6  ;;  %v2319_v6 = vld [vmem:[%s4363_s4 + $0x408] sm:$0xff] }
 0x539   :  { %2130 = vst.msk [vmem:[#allocation11 + $0x5] sm:$0x1] %vm2033_vm0, %v2128_v7  ;;  %v2243_v7 = vld [vmem:[%s4363_s4 + $0x1a8] sm:$0xff]  ;;  %2555 = vmatpush.msra.mxu1 %v2319_v6  ;;  %v2309_v6 = vld [vmem:[%s4363_s4 + $0x3b8] sm:$0xff] }
 0x53b   :  { %2556 = vmatpush.msra.mxu1 %v2318_v9  ;;  %v2306_v9 = vld [vmem:[%s4363_s4 + $0x3a0] sm:$0xff] }
 0x53f   :  { %v2056_v20 = vpop.permute.xlu0 %2055  ;;  %v2064_v21 = vpop.permute.xlu2 %2063 }
 0x540   :  { %2058 = vst.msk [vmem:[#allocation11 + $0x6] sm:$0x1] %vm2033_vm0, %v2056_v20  ;;  %v2238_v20 = vld [vmem:[%s4363_s4 + $0x180] sm:$0xff] }
 0x541   :  { %2066 = vst.msk [vmem:[#allocation11 + $0x8] sm:$0x1] %vm2033_vm0, %v2064_v21  ;;  %v2286_v21 = vld [vmem:[%s4363_s4 + $0x300] sm:$0xff] }
 0x547   :  { %v2120_v27 = vpop.permute.xlu0 %2119  ;;  %v2080_v28 = vpop.permute.xlu2 %2079 }
 0x548   :  { %2122 = vst.msk [vmem:[#allocation11 + $0x3] sm:$0x1] %vm2033_vm0, %v2120_v27  ;;  %v2284_v27 = vld [vmem:[%s4363_s4 + $0x2f0] sm:$0xff] }
 0x549   :  { %2082 = vst.msk [vmem:[#allocation11 + $0xc] sm:$0x1] %vm2033_vm0, %v2080_v28  ;;  %v2348_v28 = vld [vmem:[%s4363_s4 + $0x4f0] sm:$0xff] }
 0x54f   :  { %v2136_v30 = vpop.permute.xlu0 %2135  ;;  %v2144_v31 = vpop.permute.xlu2 %2143 }
 0x550   :  { %2138 = vst.msk [vmem:[#allocation11 + $0x7] sm:$0x1] %vm2033_vm0, %v2136_v30  ;;  %v2347_v30 = vld [vmem:[%s4363_s4 + $0x4e8] sm:$0xff] }
 0x551   :  { %2146 = vst.msk [vmem:[#allocation11 + $0x9] sm:$0x1] %vm2033_vm0, %v2144_v31  ;;  %v2282_v31 = vld [vmem:[%s4363_s4 + $0x2e0] sm:$0xff] }
 0x557   :  { %v2187_v32 = vld [vmem:[#allocation11] sm:$0xff]  ;;  %v2072_v33 = vpop.permute.xlu0 %2071  ;;  %v2160_v34 = vpop.permute.xlu2 %2159 }
 0x558   :  { %2357 = vst [vmem:[#allocation1] ss:$4 sm:$0xff] %v2187_v32  ;;  %v2346_v32 = vld [vmem:[%s4363_s4 + $0x4e0] sm:$0xff] }
 0x559   :  { %2074 = vst.msk [vmem:[#allocation11 + $0xa] sm:$0x1] %vm2033_vm0, %v2072_v33  ;;  %v2281_v33 = vld [vmem:[%s4363_s4 + $0x2d8] sm:$0xff] }
 0x55a   :  { %2162 = vst.msk [vmem:[#allocation11 + $0xd] sm:$0x1] %vm2033_vm0, %v2160_v34  ;;  %v2345_v34 = vld [vmem:[%s4363_s4 + $0x4d8] sm:$0xff] }
 0x55f   :  { %v2088_v39 = vpop.permute.xlu0 %2087  ;;  %v2096_v40 = vpop.permute.xlu2 %2095  ;;  %v2360_v41 = vld.sshfl [vmem:[#allocation1] sm:$0xff pattern:$0x73625140]  ;;  %v2362_v42 = vld.sshfl [vmem:[#allocation1 + $0x10] sm:$0xff pattern:$0x73625140] }
 0x560   :  { %2090 = vst.msk [vmem:[#allocation11 + $0xe] sm:$0x1] %vm2033_vm0, %v2088_v39  ;;  %2397 = vmatmul.f32.vlgmr.msrb.gmra.mxu3 %v2360_v41  ;;  %2437 = vmatmul.f32.vlgmr.msrb.gmra.mxu2 %v2362_v42  ;;  %v2361_v52 = vld.sshfl [vmem:[#allocation1 + $0x8] sm:$0xff pattern:$0x73625140]  ;;  %v2278_v41 = vld [vmem:[%s4363_s4 + $0x2c0] sm:$0xff] }
 0x561   :  { %2098 = vst.msk [vmem:[#allocation11 + $0x10] sm:$0x1] %vm2033_vm0, %v2096_v40  ;;  %2441 = vmatpush.msrb.mxu3 %v2253_v37  ;;  %2501 = vmatpush.msrb.mxu2 %v2301_v38  ;;  %v2363_v24 = vld.sshfl [vmem:[#allocation1 + $0x18] sm:$0xff pattern:$0x73625140]  ;;  %v2280_v37 = vld [vmem:[%s4363_s4 + $0x2d0] sm:$0xff] }
 0x562   :  { %v2344_v38 = vld [vmem:[%s4363_s4 + $0x4d0] sm:$0xff]  ;;  %v2279_v39 = vld [vmem:[%s4363_s4 + $0x2c8] sm:$0xff]  ;;  %v2342_v42 = vld [vmem:[%s4363_s4 + $0x4c0] sm:$0xff] }
 0x563   :  { %2442 = vmatpush.msrb.mxu3 %v2252_v43  ;;  %2502 = vmatpush.msrb.mxu2 %v2300_v44  ;;  %v2343_v40 = vld [vmem:[%s4363_s4 + $0x4c8] sm:$0xff]  ;;  %v2277_v43 = vld [vmem:[%s4363_s4 + $0x2b8] sm:$0xff] }
 0x564   :  { %v2341_v44 = vld [vmem:[%s4363_s4 + $0x4b8] sm:$0xff] }
 0x565   :  { %2443 = vmatpush.msrb.mxu3 %v2251_v45  ;;  %2503 = vmatpush.msrb.mxu2 %v2299_v46  ;;  %v2276_v46 = vld [vmem:[%s4363_s4 + $0x2b0] sm:$0xff] }
 0x567   :  { %2444 = vmatpush.msrb.mxu3 %v2250_v47  ;;  %v2152_v51 = vpop.permute.xlu0 %2151  ;;  %2504 = vmatpush.msrb.mxu2 %v2298_v48  ;;  %v2176_v53 = vpop.permute.xlu2 %2175  ;;  %v2340_v47 = vld [vmem:[%s4363_s4 + $0x4b0] sm:$0xff]  ;;  %v2275_v48 = vld [vmem:[%s4363_s4 + $0x2a8] sm:$0xff] }
 0x568   :  { %2154 = vst.msk [vmem:[#allocation11 + $0xb] sm:$0x1] %vm2033_vm0, %v2152_v51  ;;  %2417 = vmatmul.f32.vlgmr.msra.gmra.mxu3 %v2361_v52  ;;  %v2338_v51 = vld [vmem:[%s4363_s4 + $0x4a0] sm:$0xff]  ;;  %v2273_v52 = vld [vmem:[%s4363_s4 + $0x298] sm:$0xff] }
 0x569   :  { %2445 = vmatpush.msrb.mxu3 %v2249_v49  ;;  %2505 = vmatpush.msrb.mxu2 %v2297_v50  ;;  %2178 = vst.msk [vmem:[#allocation11 + $0x11] sm:$0x1] %vm2033_vm0, %v2176_v53  ;;  %v2339_v49 = vld [vmem:[%s4363_s4 + $0x4a8] sm:$0xff]  ;;  %v2274_v50 = vld [vmem:[%s4363_s4 + $0x2a0] sm:$0xff]  ;;  %v2337_v53 = vld [vmem:[%s4363_s4 + $0x498] sm:$0xff] }
 0x56b   :  { %2446 = vmatpush.msrb.mxu3 %v2248_v54  ;;  %2506 = vmatpush.msrb.mxu2 %v2296_v55  ;;  %v2272_v54 = vld [vmem:[%s4363_s4 + $0x290] sm:$0xff] }
 0x56c   :  { %v2336_v55 = vld [vmem:[%s4363_s4 + $0x490] sm:$0xff] }
 0x56d   :  { %2447 = vmatpush.msrb.mxu3 %v2247_v58  ;;  %2507 = vmatpush.msrb.mxu2 %v2295_v59  ;;  %v2270_v58 = vld [vmem:[%s4363_s4 + $0x280] sm:$0xff] }
 0x56e   :  { %v2334_v59 = vld [vmem:[%s4363_s4 + $0x480] sm:$0xff] }
 0x56f   :  { %2448 = vmatpush.msrb.mxu3 %v2246_v61  ;;  %2508 = vmatpush.msrb.mxu2 %v2294_v62  ;;  %v2168_v2 = vpop.permute.xlu0 %2167 }
 0x570   :  { %2170 = vst.msk [vmem:[#allocation11 + $0xf] sm:$0x1] %vm2033_vm0, %v2168_v2  ;;  %v2313_v2 = vld [vmem:[%s4363_s4 + $0x3d8] sm:$0xff] }
 0x571   :  { %2449 = vmatpush.msrb.mxu3 %v2245_v0  ;;  %2509 = vmatpush.msrb.mxu2 %v2293_v1  ;;  %v2315_v0 = vld [vmem:[%s4363_s4 + $0x3e8] sm:$0xff]  ;;  %v2314_v1 = vld [vmem:[%s4363_s4 + $0x3e0] sm:$0xff] }
 0x573   :  { %2450 = vmatpush.msrb.mxu3 %v2244_v4  ;;  %2510 = vmatpush.msrb.mxu2 %v2292_v5  ;;  %v2311_v4 = vld [vmem:[%s4363_s4 + $0x3c8] sm:$0xff]  ;;  %v2310_v5 = vld [vmem:[%s4363_s4 + $0x3c0] sm:$0xff] }
 0x575   :  { %2451 = vmatpush.msrb.mxu3 %v2243_v7  ;;  %2511 = vmatpush.msrb.mxu2 %v2291_v8  ;;  %v2308_v7 = vld [vmem:[%s4363_s4 + $0x3b0] sm:$0xff]  ;;  %v2307_v8 = vld [vmem:[%s4363_s4 + $0x3a8] sm:$0xff] }
 0x577   :  { %v2188_v14 = vld [vmem:[#allocation11 + $0x8] sm:$0xff]  ;;  %2452 = vmatpush.msrb.mxu3 %v2242_v10  ;;  %2512 = vmatpush.msrb.mxu2 %v2290_v11  ;;  %v2104_v15 = vpop.permute.xlu0 %2103  ;;  %v2305_v10 = vld [vmem:[%s4363_s4 + $0x398] sm:$0xff]  ;;  %v2304_v11 = vld [vmem:[%s4363_s4 + $0x390] sm:$0xff] }
 0x578   :  { %2359 = vst [vmem:[#allocation1 + $0x20] ss:$4 sm:$0xff] %v2188_v14 }
 0x579   :  { %2106 = vst.msk [vmem:[#allocation11 + $0x12] sm:$0x1] %vm2033_vm0, %v2104_v15  ;;  %2453 = vmatpush.msrb.mxu3 %v2241_v12  ;;  %2513 = vmatpush.msrb.mxu2 %v2289_v13  ;;  %v2303_v12 = vld [vmem:[%s4363_s4 + $0x388] sm:$0xff]  ;;  %v2302_v13 = vld [vmem:[%s4363_s4 + $0x380] sm:$0xff] }
 0x57b   :  { %2454 = vmatpush.msrb.mxu3 %v2240_v16  ;;  %2514 = vmatpush.msrb.mxu2 %v2288_v17  ;;  %v2585_v16 = vld [vmem:[%s4365_s6 + $0x18] sm:$0x3f]  ;;  %v2584_v17 = vld [vmem:[%s4365_s6 + $0x10] sm:$0xff] }
 0x57d   :  { %2455 = vmatpush.msrb.mxu3 %v2239_v18  ;;  %2515 = vmatpush.msrb.mxu2 %v2287_v19  ;;  %v2583_v18 = vld [vmem:[%s4365_s6 + $0x8] sm:$0xff] }
 0x57f   :  { %2456 = vmatpush.msrb.mxu3 %v2238_v20  ;;  %2516 = vmatpush.msrb.mxu2 %v2286_v21  ;;  %v2184_v25 = vpop.permute.xlu0 %2183  ;;  %v2364_v26 = vld.sshfl [vmem:[#allocation1 + $0x20] sm:$0xff pattern:$0x73625140]  ;;  %v2366_v36 = vld.sshfl [vmem:[#allocation1 + $0x30] sm:$0xff pattern:$0x73625140] }
 0x580   :  { %2457 = vmatmul.f32.vlgmr.msrb.gmra.mxu3 %v2363_v24  ;;  %2186 = vst.msk [vmem:[#allocation11 + $0x13] sm:$0x1] %vm2033_vm0, %v2184_v25  ;;  %2477 = vmatmul.f32.vlgmr.msra.gmra.mxu2 %v2364_v26  ;;  %v2365_v61 = vld.sshfl [vmem:[#allocation1 + $0x28] sm:$0xff pattern:$0x73625140]  ;;  %v2582_v20 = vld [vmem:[%s4365_s6] sm:$0xff] }
 0x581   :  { %2481 = vmatpush.msra.mxu3 %v2285_v22  ;;  %2561 = vmatpush.msra.mxu2 %v2349_v23  ;;  %v2367_v14 = vld.sshfl [vmem:[#allocation1 + $0x38] sm:$0xff pattern:$0x73625140]  ;;  %v2757_v21 = vld [vmem:[%s4364_s5] ss:$0 sm:$0xff] }
 0x582   :  { %v2621_v22 = vld [vmem:[%s4367_s8 + $0x10] sm:$0xf] }
 0x583   :  { %2482 = vmatpush.msra.mxu3 %v2284_v27  ;;  %2562 = vmatpush.msra.mxu2 %v2348_v28 }
 0x584   :  { %2739 = vmatpush.msk.msrb.mxu1 %vm2629_vm2, %v2621_v22 }
 0x585   :  { %2483 = vmatpush.msra.mxu3 %v2283_v29  ;;  %2563 = vmatpush.msra.mxu2 %v2347_v30 }
 0x587   :  { %v2189_v35 = vld [vmem:[#allocation11 + $0x10] sm:$0xf]  ;;  %2484 = vmatpush.msra.mxu3 %v2282_v31  ;;  %2564 = vmatpush.msra.mxu2 %v2346_v32 }
 0x588   :  { %2368 = vst [vmem:[#allocation1] ss:$4 sm:$0xff] %v2189_v35  ;;  %2517 = vmatmul.f32.vlgmr.msrb.gmra.mxu2 %v2366_v36 }
 0x589   :  { %2485 = vmatpush.msra.mxu3 %v2281_v33  ;;  %2565 = vmatpush.msra.mxu2 %v2345_v34 }
 0x58b   :  { %2486 = vmatpush.msra.mxu3 %v2280_v37  ;;  %2566 = vmatpush.msra.mxu2 %v2344_v38 }
 0x58d   :  { %2487 = vmatpush.msra.mxu3 %v2279_v39  ;;  %2567 = vmatpush.msra.mxu2 %v2343_v40 }
 0x58f   :  { %2488 = vmatpush.msra.mxu3 %v2278_v41  ;;  %2568 = vmatpush.msra.mxu2 %v2342_v42  ;;  %v2369_v45 = vld.sshfl [vmem:[#allocation1] sm:$0xff pattern:$0x73625140]  ;;  %v2370_v62 = vld.sshfl [vmem:[#allocation1 + $0x8] sm:$0xff pattern:$0x73625140] }
 0x590   :  { %2557 = vmatmul.f32.vlgmr.msra.gmra.mxu1 %v2369_v45  ;;  %v2620_v42 = vld [vmem:[%s4367_s8 + $0x8] sm:$0xff] }
 0x591   :  { %2489 = vmatpush.msra.mxu3 %v2277_v43  ;;  %2569 = vmatpush.msra.mxu2 %v2341_v44  ;;  %v2619_v43 = vld [vmem:[%s4367_s8] sm:$0xff]  ;;  %s2662_s8 = sshll.u32 %s4369_s10, 4  ;;  %s2663_s8 = int_to_ptr.hbm [resolvable:$true] %s2662_s8 }
 0x592   :  { %2647 = vmatpush.msrb.mxu1 %v2620_v42  ;;  %v2758_v44 = vld [vmem:[%s4366_s7] ss:$0 sm:$0xff] }
 0x593   :  { %2490 = vmatpush.msra.mxu3 %v2276_v46  ;;  %2570 = vmatpush.msra.mxu2 %v2340_v47 }
 0x594   :  { %2648 = vmatpush.msrb.mxu1 %v2619_v43 }
 0x595   :  { %2491 = vmatpush.msra.mxu3 %v2275_v48  ;;  %2571 = vmatpush.msra.mxu2 %v2339_v49  ;;  %v2759_v48 = vld [vmem:[%s4368_s9] ss:$0 sm:$0xff] }
 0x597   :  { %2492 = vmatpush.msra.mxu3 %v2274_v50  ;;  %2572 = vmatpush.msra.mxu2 %v2338_v51 }
 0x599   :  { %2493 = vmatpush.msra.mxu3 %v2273_v52  ;;  %2573 = vmatpush.msra.mxu2 %v2337_v53 }
 0x59b   :  { %2494 = vmatpush.msra.mxu3 %v2272_v54  ;;  %2574 = vmatpush.msra.mxu2 %v2336_v55 }
 0x59d   :  { %2495 = vmatpush.msra.mxu3 %v2271_v56  ;;  %2575 = vmatpush.msra.mxu2 %v2335_v57 }
 0x59f   :  { %2496 = vmatpush.msra.mxu3 %v2270_v58  ;;  %2576 = vmatpush.msra.mxu2 %v2334_v59 }
 0x5a0   :  { %2497 = vmatmul.f32.vlgmr.msra.gmra.mxu3 %v2365_v61  ;;  %2577 = vmatmul.f32.vlgmr.msra.gmra.mxu2 %v2370_v62 }
 0x5a1   :  { %2521 = vmatpush.msrb.mxu3 %v2317_v60 }
 0x5a3   :  { %2522 = vmatpush.msrb.mxu3 %v2316_v63 }
 0x5a5   :  { %2523 = vmatpush.msrb.mxu3 %v2315_v0 }
 0x5a7   :  { %2524 = vmatpush.msrb.mxu3 %v2314_v1 }
 0x5a9   :  { %2525 = vmatpush.msrb.mxu3 %v2313_v2 }
 0x5ab   :  { %2526 = vmatpush.msrb.mxu3 %v2312_v3 }
 0x5ad   :  { %2527 = vmatpush.msrb.mxu3 %v2311_v4 }
 0x5af   :  { %2528 = vmatpush.msrb.mxu3 %v2310_v5 }
 0x5b1   :  { %2529 = vmatpush.msrb.mxu3 %v2309_v6 }
 0x5b3   :  { %2530 = vmatpush.msrb.mxu3 %v2308_v7 }
 0x5b5   :  { %2531 = vmatpush.msrb.mxu3 %v2307_v8 }
 0x5b7   :  { %2532 = vmatpush.msrb.mxu3 %v2306_v9 }
 0x5b9   :  { %2533 = vmatpush.msrb.mxu3 %v2305_v10 }
 0x5bb   :  { %2534 = vmatpush.msrb.mxu3 %v2304_v11 }
 0x5bd   :  { %2535 = vmatpush.msrb.mxu3 %v2303_v12 }
 0x5bf   :  { %2536 = vmatpush.msrb.mxu3 %v2302_v13 }
 0x5c0   :  { %2537 = vmatmul.f32.vlgmr.msrb.gmra.mxu3 %v2367_v14 }
 0x5c1   :  { %2737 = vmatpush.msk.msra.mxu3 %vm2594_vm1, %v2585_v16 }
 0x5c3   :  { %2611 = vmatpush.msra.mxu3 %v2584_v17 }
 0x5c5   :  { %2612 = vmatpush.msra.mxu3 %v2583_v18 }
 0x5c7   :  { %2613 = vmatpush.msra.mxu3 %v2582_v20 }
 0x5e3   :  { %v2398_v15 = vpop.f32.mrf.mxu3  ;;  %v2438_v23 = vpop.f32.mrf.mxu2 }
 0x5e4   :  { %v2399_v24 = vadd.f32 %v2757_v21, %v2398_v15 }
 0x5eb   :  { %v2418_v19 = vpop.f32.mrf.mxu3 }
 0x5ec   :  { %v2419_v25 = vadd.f32 %v2418_v19, %v2399_v24 }
 0x5ee   :  { %v2439_v28 = vadd.f32 %v2438_v23, %v2419_v25 }
 0x603   :  { %v2458_v26 = vpop.f32.mrf.mxu3  ;;  %v2478_v27 = vpop.f32.mrf.mxu2 }
 0x604   :  { %v2459_v29 = vadd.f32 %v2458_v26, %v2439_v28 }
 0x606   :  { %v2479_v31 = vadd.f32 %v2478_v27, %v2459_v29 }
 0x60b   :  { %v2518_v33 = vpop.f32.mrf.mxu2 }
 0x60d   :  { %v2558_v37 = vpop.f32.mrf.mxu1 }
 0x623   :  { %v2498_v30 = vpop.f32.mrf.mxu3  ;;  %v2578_v39 = vpop.f32.mrf.mxu2 }
 0x624   :  { %v2499_v32 = vadd.f32 %v2498_v30, %v2479_v31 }
 0x626   :  { %v2519_v34 = vadd.f32 %v2518_v33, %v2499_v32 }
 0x643   :  { %v2538_v35 = vpop.f32.mrf.mxu3 }
 0x644   :  { %v2539_v36 = vadd.f32 %v2538_v35, %v2519_v34 }
 0x646   :  { %v2559_v38 = vadd.f32 %v2558_v37, %v2539_v36 }
 0x648   :  { %v2579_v40 = vadd.f32 %v2578_v39, %v2559_v38 }
 0x64a   :  { %v2581_v41 = vmax.f32 %v2579_v40, 0.0 }
 0x64c   :  { %2738 = vmatmul.msk.f32.vlgmr.msra.gmra.mxu3 %vm2590_vm3, %v2581_v41 }
 0x6cf   :  { %v2615_v45 = vpop.f32.mrf.mxu3 }
 0x6d0   :  { %v2616_v46 = vadd.f32 %v2758_v44, %v2615_v45 }
 0x6d2   :  { %v2618_v47 = vmax.f32 %v2616_v46, 0.0 }
 0x6d4   :  { %2740 = vmatmul.msk.f32.vlgmr.msrb.gmra.mxu1 %vm1576_vm14, %v2618_v47 }
 0x751   :  { %v2650_v49 = vpop.f32.mrf.mxu1 }
 0x752   :  { %v2651_v50 = vadd.f32 %v2759_v48, %v2650_v49 }
 0x754   :  { %2654 = vst.msk [vmem:[#allocation12] sm:$0x3] %vm2653_vm4, %v2651_v50 }
 0x755   :  { %2665 = dma.vmem_to_hbm [thread:$0]  %s2661_s13, 32, %s2663_s8, [#allocation13]  }
 0x756   :  { %2784 = dma.done.wait [#allocation13], 32  }
 0x757   :  { %2785 = vsyncadd [#allocation13], 4294967264 }
 0x758   :  { %2670 = vsyncpa [#allocation13], 1 }

</bundles_post_ra>
